<compile_context>
chip_gen: v6e
topology: v6e:2x2x1
jax: 0.10.0
libtpu: 0.0.40
codegen_flags: <defaults>
</compile_context>

<pallas_src>
import functools

import numpy as np
import jax
import jax.numpy as jnp
from jax.experimental import pallas as pl
from jax.experimental.pallas import tpu as pltpu


# ----------------------------------------------------------------------------
# Constants
# ----------------------------------------------------------------------------
FC_IN = 7200            # 32 * 15 * 15  (PyTorch NCHW flatten of conv2 output)
FC_K_PAD = 7680         # FC_IN padded to a multiple of 128 (zero rows/cols)
FC_TK = 1920            # K tile for the FC matmul -> 4 grid steps, ~1MB bf16/blk
FC_OUT = 256

_CPARAMS = pltpu.CompilerParams(vmem_limit_bytes=32 * 1024 * 1024)
_VMEM = functools.partial(pl.BlockSpec, memory_space=pltpu.MemorySpace.VMEM)


def _full_spec(arr):
    """Whole-array block, resident across the grid (constant index map)."""
    return pl.BlockSpec(arr.shape, lambda k: (0, 0))


# ----------------------------------------------------------------------------
# Pallas kernels
# ----------------------------------------------------------------------------
def _conv_gemm_kernel(w_ref, p_ref, b_ref, o_ref):
    # o = relu(w @ patches + b), channel-major output (C_out, spatial).
    acc = jnp.dot(w_ref[...], p_ref[...], preferred_element_type=jnp.float32)
    o_ref[...] = jnp.maximum(acc + b_ref[...], 0.0).astype(o_ref.dtype)


def conv_gemm(w, patches, b):
    """w:(C_out, F) bf16, patches:(F, M) bf16, b:(C_out,1) f32 -> (C_out, M) bf16."""
    c_out = w.shape[0]
    m = patches.shape[1]
    return pl.pallas_call(
        _conv_gemm_kernel,
        out_shape=jax.ShapeDtypeStruct((c_out, m), jnp.bfloat16),
        in_specs=[_VMEM(), _VMEM(), _VMEM()],
        out_specs=_VMEM(),
        compiler_params=_CPARAMS,
    )(w, patches, b)


def _lstm_gates(g, c, H):
    # PyTorch gate order [i, f, g, o]; c' = f*c + i*g ; h' = o*tanh(c')
    i = jax.nn.sigmoid(g[:, 0 * H:1 * H])
    f = jax.nn.sigmoid(g[:, 1 * H:2 * H])
    gg = jnp.tanh(g[:, 2 * H:3 * H])
    o = jax.nn.sigmoid(g[:, 3 * H:4 * H])
    c_new = f * c + i * gg
    h_new = o * jnp.tanh(c_new)
    return h_new, c_new


def _fused_tail_kernel(x_ref, fcw_ref, fcb_ref,
                       prew_ref, pact_ref, h1_ref, c1_ref, h2_ref, c2_ref,
                       w1x_ref, w1r_ref, w1h_ref, b1_ref,
                       w2x_ref, w2h1_ref, w2a_ref, w2hh_ref, b2_ref,
                       aw_ref, ab_ref, cw_ref, cb_ref,
                       logit_ref, value_ref, h1o_ref, c1o_ref, h2o_ref, c2o_ref,
                       acc_ref):
    """K-tiled Linear(7200->256)+ReLU, then LSTM1, LSTM2, actor & critic heads.

    Grid axis 0 runs over K tiles of the FC weight ("arbitrary").  Everything
    after the FC runs once, on the last grid step, entirely from VMEM.
    """
    k = pl.program_id(0)

    @pl.when(k == 0)
    def _init():
        acc_ref[...] = jnp.zeros_like(acc_ref)

    # bf16 x bf16 -> f32 accumulation on the MXU.
    acc_ref[...] += jnp.dot(x_ref[...], fcw_ref[...],
                            preferred_element_type=jnp.float32)

    @pl.when(k == pl.num_programs(0) - 1)
    def _finish():
        bf16 = jnp.bfloat16
        feats = jnp.maximum(acc_ref[...] + fcb_ref[...], 0.0)       # (B,256) f32
        feats_b = feats.astype(bf16)

        # --- LSTM 1: input = [feats, p_reward], hidden H1 -------------------
        H1 = h1_ref.shape[-1]
        g1 = (jnp.dot(feats_b, w1x_ref[...], preferred_element_type=jnp.float32)
              + jnp.dot(h1_ref[...].astype(bf16), w1h_ref[...],
                        preferred_element_type=jnp.float32)
              + prew_ref[...] * w1r_ref[...]        # scalar p_reward column
              + b1_ref[...])
        h1n, c1n = _lstm_gates(g1, c1_ref[...], H1)

        # --- LSTM 2: input = [feats, output_1, p_action], hidden 128 --------
        H2 = h2_ref.shape[-1]
        g2 = (jnp.dot(feats_b, w2x_ref[...], preferred_element_type=jnp.float32)
              + jnp.dot(h1n.astype(bf16), w2h1_ref[...],
                        preferred_element_type=jnp.float32)
              + jnp.dot(pact_ref[...].astype(bf16), w2a_ref[...],
                        preferred_element_type=jnp.float32)
              + jnp.dot(h2_ref[...].astype(bf16), w2hh_ref[...],
                        preferred_element_type=jnp.float32)
              + b2_ref[...])
        h2n, c2n = _lstm_gates(g2, c2_ref[...], H2)

        # --- actor / critic heads on output_2 --------------------------------
        h2b = h2n.astype(bf16)
        logit_ref[...] = (jnp.dot(h2b, aw_ref[...],
                                  preferred_element_type=jnp.float32)
                          + ab_ref[...]).astype(logit_ref.dtype)
        value_ref[...] = (jnp.dot(h2b, cw_ref[...],
                                  preferred_element_type=jnp.float32)
                          + cb_ref[...]).astype(value_ref.dtype)
        h1o_ref[...] = h1n.astype(h1o_ref.dtype)
        c1o_ref[...] = c1n.astype(c1o_ref.dtype)
        h2o_ref[...] = h2n.astype(h2o_ref.dtype)
        c2o_ref[...] = c2n.astype(c2o_ref.dtype)


def _fused_tail(flat, p, p_action, p_reward, h1, c1, h2, c2, *, H1, H2, A, B):
    n_k = FC_K_PAD // FC_TK
    small_in = [p_reward, p_action, h1, c1, h2, c2,
                p["lstm1_wx"], p["lstm1_wr"], p["lstm1_wh"], p["lstm1_b"],
                p["lstm2_wx"], p["lstm2_wh1"], p["lstm2_wa"], p["lstm2_whh"],
                p["lstm2_b"],
                p["actor_w"], p["actor_b"], p["critic_w"], p["critic_b"]]
    in_specs = ([pl.BlockSpec((B, FC_TK), lambda k: (0, k)),       # flat (K tiles)
                 pl.BlockSpec((FC_TK, FC_OUT), lambda k: (k, 0)),  # fc_w (K tiles)
                 _full_spec(p["fc_b"])]
                + [_full_spec(x) for x in small_in])
    out_shape = (jax.ShapeDtypeStruct((B, A), jnp.float32),
                 jax.ShapeDtypeStruct((B, 1), jnp.float32),
                 jax.ShapeDtypeStruct((B, H1), jnp.float32),
                 jax.ShapeDtypeStruct((B, H1), jnp.float32),
                 jax.ShapeDtypeStruct((B, H2), jnp.float32),
                 jax.ShapeDtypeStruct((B, H2), jnp.float32))
    out_specs = tuple(pl.BlockSpec(s.shape, lambda k: (0, 0)) for s in out_shape)
    return pl.pallas_call(
        _fused_tail_kernel,
        grid=(n_k,),
        out_shape=out_shape,
        in_specs=in_specs,
        out_specs=out_specs,
        scratch_shapes=[pltpu.VMEM((B, FC_OUT), jnp.float32)],
        compiler_params=pltpu.CompilerParams(
            dimension_semantics=("arbitrary",),
            vmem_limit_bytes=32 * 1024 * 1024),
    )(flat, p["fc_w"], p["fc_b"], *small_in)


# ----------------------------------------------------------------------------
# Glue: channel-major im2col (layout only; all compute is in the kernels)
# ----------------------------------------------------------------------------
def _im2col_nchw(x, kh, kw, stride):
    """x:(C, H, W) -> patches (C*kh*kw, OH*OW), feature order (c, kh, kw).

    Matches a reshape of PyTorch OIHW conv weights to (C_out, C_in*kh*kw), and
    column order (oh, ow), so that (C_out, OH*OW) GEMM outputs flatten in
    PyTorch NCHW order with no runtime transpose."""
    C, H, W = x.shape
    OH = (H - kh) // stride + 1
    OW = (W - kw) // stride + 1
    cols = []
    for i in range(kh):
        for j in range(kw):
            cols.append(x[:, i:i + stride * OH:stride, j:j + stride * OW:stride])
    p = jnp.stack(cols, axis=1)                       # (C, kh*kw, OH, OW)
    return p.reshape(C * kh * kw, OH * OW), (OH, OW)


# ----------------------------------------------------------------------------
# Parameter init (deterministic, synthetic weights; layouts chosen for kernels)
# ----------------------------------------------------------------------------
def init_params(key, mem_units, num_actions):
    """conv weights: PyTorch OIHW reshaped to (C_out, C_in*kh*kw), bf16.
       fc_w: PyTorch Linear weight transposed to (7200, 256), zero-padded along
             K to 7680, bf16.
       LSTM weights: transposed to (in, 4H) and split by input component,
             gate order [i, f, g, o]; bias = b_ih + b_hh, f32.
       Porting real PyTorch weights means exactly these reshapes / transposes."""
    ks = jax.random.split(key, 12)
    f32, bf16 = jnp.float32, jnp.bfloat16

    def w(k, fan_in, shape, scale=None):
        s = scale if scale is not None else 1.0 / np.sqrt(float(fan_in))
        return jax.random.normal(k, shape, f32) * s

    H1, H2, A = mem_units, 128, num_actions
    p = {}
    p["conv1_w"] = w(ks[0], 3 * 8 * 8, (16, 3 * 8 * 8)).astype(bf16)
    p["conv1_b"] = jnp.zeros((16, 1), f32)
    p["conv2_w"] = w(ks[1], 16 * 4 * 4, (32, 16 * 4 * 4)).astype(bf16)
    p["conv2_b"] = jnp.zeros((32, 1), f32)
    fc_w = w(ks[2], FC_IN, (FC_IN, FC_OUT))
    p["fc_w"] = jnp.pad(fc_w, ((0, FC_K_PAD - FC_IN), (0, 0))).astype(bf16)
    p["fc_b"] = jnp.zeros((1, FC_OUT), f32)

    in1 = 256 + 1
    p["lstm1_wx"] = w(ks[3], in1, (256, 4 * H1)).astype(bf16)     # feats part
    p["lstm1_wr"] = w(ks[4], in1, (1, 4 * H1)).astype(f32)        # p_reward col
    p["lstm1_wh"] = w(ks[5], H1, (H1, 4 * H1)).astype(bf16)       # hidden
    p["lstm1_b"] = jnp.zeros((1, 4 * H1), f32)                    # b_ih + b_hh

    in2 = 256 + H1 + A
    p["lstm2_wx"] = w(ks[6], in2, (256, 4 * H2)).astype(bf16)     # feats part
    p["lstm2_wh1"] = w(ks[7], in2, (H1, 4 * H2)).astype(bf16)     # output_1 part
    p["lstm2_wa"] = w(ks[8], in2, (A, 4 * H2)).astype(bf16)       # p_action part
    p["lstm2_whh"] = w(ks[9], H2, (H2, 4 * H2)).astype(bf16)      # hidden
    p["lstm2_b"] = jnp.zeros((1, 4 * H2), f32)

    # orthogonal init approximated by a scaled normal (row norms ~= gain);
    # init detail only, forward semantics are unaffected.
    p["actor_w"] = w(ks[10], 128, (128, A), scale=0.01 / np.sqrt(128.0)).astype(bf16)
    p["actor_b"] = jnp.zeros((1, A), f32)
    p["critic_w"] = w(ks[11], 128, (128, 1), scale=1.0 / np.sqrt(128.0)).astype(bf16)
    p["critic_b"] = jnp.zeros((1, 1), f32)
    return p


# ----------------------------------------------------------------------------
# Forward pass (mirrors A3C_StackedLSTM.forward)
# ----------------------------------------------------------------------------
def a3c_stacked_lstm_forward(params, obs, p_action, p_reward,
                             state_1=None, state_2=None, *, mem_units=32):
    B = obs.shape[0]
    H1, H2 = mem_units, 128
    A = p_action.shape[-1]
    if state_1 is None:
        state_1 = (jnp.zeros((1, B, H1), jnp.float32),
                   jnp.zeros((1, B, H1), jnp.float32))
    if state_2 is None:
        state_2 = (jnp.zeros((1, B, H2), jnp.float32),
                   jnp.zeros((1, B, H2), jnp.float32))
    h1, c1 = state_1[0][0], state_1[1][0]             # (B, H1)
    h2, c2 = state_2[0][0], state_2[1][0]             # (B, 128)

    # --- encoder convs (channel-major GEMMs, bf16 activations) --------------
    obs_b = obs.astype(jnp.bfloat16)                  # NCHW, kept channel-major
    flats = []
    for b in range(B):                                # B == 1 in practice
        p1, (oh1, ow1) = _im2col_nchw(obs_b[b], 8, 8, 4)            # (192, 1024)
        y1 = conv_gemm(params["conv1_w"], p1, params["conv1_b"])    # (16, 1024)
        p2, _ = _im2col_nchw(y1.reshape(16, oh1, ow1), 4, 4, 2)     # (256, 225)
        y2 = conv_gemm(params["conv2_w"], p2, params["conv2_b"])    # (32, 225)
        flats.append(y2.reshape(-1))                  # NCHW flatten order (c,h,w)
    flat = jnp.stack(flats, axis=0)                   # (B, 7200) bf16
    flat = jnp.pad(flat, ((0, 0), (0, FC_K_PAD - FC_IN)))           # (B, 7680)

    # --- fused FC + LSTM stack + heads (single pallas_call) -----------------
    logits, value, h1n, c1n, h2n, c2n = _fused_tail(
        flat, params, p_action, p_reward, h1, c1, h2, c2,
        H1=H1, H2=H2, A=A, B=B)

    # Restore the leading seq / num-layers dim of 1 (PyTorch shapes)
    return (logits[None], value[None],
            (h1n[None], c1n[None]), (h2n[None], c2n[None]))


# ----------------------------------------------------------------------------
# Pure-JAX f32 reference (same bf16-rounded weights) for correctness checking
# ----------------------------------------------------------------------------
def _ref_forward(p, obs, p_action, p_reward, state_1, state_2):
    f32 = jnp.float32
    P = jax.lax.Precision.HIGHEST
    dot = functools.partial(jnp.dot, precision=P)

    w1 = p["conv1_w"].astype(f32).reshape(16, 3, 8, 8)
    w2 = p["conv2_w"].astype(f32).reshape(32, 16, 4, 4)
    y1 = jax.lax.conv_general_dilated(
        obs, w1, (4, 4), "VALID",
        dimension_numbers=("NCHW", "OIHW", "NCHW"), precision=P)
    y1 = jax.nn.relu(y1 + p["conv1_b"].reshape(1, 16, 1, 1))
    y2 = jax.lax.conv_general_dilated(
        y1, w2, (2, 2), "VALID",
        dimension_numbers=("NCHW", "OIHW", "NCHW"), precision=P)
    y2 = jax.nn.relu(y2 + p["conv2_b"].reshape(1, 32, 1, 1))
    flat = y2.reshape(y2.shape[0], -1)                          # NCHW flatten
    feats = jax.nn.relu(dot(flat, p["fc_w"].astype(f32)[:FC_IN]) + p["fc_b"])

    def cell(g, c):
        H = c.shape[-1]
        i = jax.nn.sigmoid(g[:, :H]); f = jax.nn.sigmoid(g[:, H:2 * H])
        gg = jnp.tanh(g[:, 2 * H:3 * H]); o = jax.nn.sigmoid(g[:, 3 * H:])
        cn = f * c + i * gg
        return o * jnp.tanh(cn), cn

    h1, c1 = state_1[0][0], state_1[1][0]
    g1 = (dot(feats, p["lstm1_wx"].astype(f32)) + p_reward * p["lstm1_wr"]
          + dot(h1, p["lstm1_wh"].astype(f32)) + p["lstm1_b"])
    h1n, c1n = cell(g1, c1)
    h2, c2 = state_2[0][0], state_2[1][0]
    g2 = (dot(feats, p["lstm2_wx"].astype(f32))
          + dot(h1n, p["lstm2_wh1"].astype(f32))
          + dot(p_action, p["lstm2_wa"].astype(f32))
          + dot(h2, p["lstm2_whh"].astype(f32)) + p["lstm2_b"])
    h2n, c2n = cell(g2, c2)
    logits = dot(h2n, p["actor_w"].astype(f32)) + p["actor_b"]
    value = dot(h2n, p["critic_w"].astype(f32)) + p["critic_b"]
    return (logits[None], value[None], (h1n[None], c1n[None]), (h2n[None], c2n[None]))


# ----------------------------------------------------------------------------
if __name__ == "__main__":
    key = jax.random.PRNGKey(0)
    k_obs, k_act, k_rew, k_par = jax.random.split(key, 4)

    mem_units = 32      # config['mem-units']
    num_actions = 4
    batch = 1           # default init states in the reference imply batch == 1

    params = init_params(k_par, mem_units, num_actions)

    # Linear(7200, 256) pins the encoder input to (B, 3, 132, 132):
    # conv1 -> 32x32, conv2 -> 15x15, 32*15*15 == 7200.
    obs = jax.random.normal(k_obs, (batch, 3, 132, 132), jnp.float32)
    p_action = jax.nn.one_hot(
        jax.random.randint(k_act, (batch,), 0, num_actions),
        num_actions, dtype=jnp.float32)               # (B, num_actions)
    p_reward = jax.random.normal(k_rew, (batch, 1), jnp.float32)   # (B, 1)

    fwd = jax.jit(functools.partial(a3c_stacked_lstm_forward, mem_units=mem_units))
    logits, value, s1, s2 = fwd(params, obs, p_action, p_reward, None, None)
    jax.block_until_ready((logits, value, s1, s2))

    # shape checks (PyTorch convention: leading seq / num-layers dim of 1)
    assert logits.shape == (1, batch, num_actions)
    assert value.shape == (1, batch, 1)
    assert s1[0].shape == (1, batch, mem_units) and s1[1].shape == (1, batch, mem_units)
    assert s2[0].shape == (1, batch, 128) and s2[1].shape == (1, batch, 128)
    assert jnp.all(jnp.isfinite(logits)) and jnp.all(jnp.isfinite(value))

    # numerical check against a pure-JAX f32 reference (same bf16-rounded weights)
    zero1 = (jnp.zeros((1, batch, mem_units), jnp.float32),
             jnp.zeros((1, batch, mem_units), jnp.float32))
    zero2 = (jnp.zeros((1, batch, 128), jnp.float32),
             jnp.zeros((1, batch, 128), jnp.float32))
    r_logits, r_value, r_s1, r_s2 = _ref_forward(
        params, obs, p_action, p_reward, zero1, zero2)
    for got, want in ((logits, r_logits), (value, r_value),
                      (s1[0], r_s1[0]), (s1[1], r_s1[1]),
                      (s2[0], r_s2[0]), (s2[1], r_s2[1])):
        np.testing.assert_allclose(np.asarray(got), np.asarray(want),
                                   rtol=5e-2, atol=5e-2)

    print("KERNEL_OK")
</pallas_src>

<mosaic_0001>
module attributes {stable_mosaic.version = 11 : i64} {
  func.func @_conv_gemm_kernel(%arg0: memref<16x192xbf16, #tpu.memory_space<vmem>>, %arg1: memref<192x1024xbf16, #tpu.memory_space<vmem>>, %arg2: memref<16x1xf32, #tpu.memory_space<vmem>>, %arg3: memref<16x1024xbf16, #tpu.memory_space<vmem>>) attributes {dimension_semantics = [], scalar_prefetch = 0 : i64, scratch_operands = 0 : i64, tpu.core_type = #tpu.core_type<tc>} {
    %c0 = arith.constant 0 : index
    %c0_0 = arith.constant 0 : index
    %0 = vector.load %arg0[%c0, %c0_0] : memref<16x192xbf16, #tpu.memory_space<vmem>>, vector<16x192xbf16>
    %c0_1 = arith.constant 0 : index
    %c0_2 = arith.constant 0 : index
    %1 = vector.load %arg1[%c0_1, %c0_2] : memref<192x1024xbf16, #tpu.memory_space<vmem>>, vector<192x1024xbf16>
    %cst = arith.constant dense<0.000000e+00> : vector<16x1024xf32>
    %2 = tpu.matmul %0, %1, %cst {dimension_numbers = #tpu.dot_dimension_numbers<[1], [0], [0], [1], [0, 0, 1, 1], [], []>} : vector<16x192xbf16>, vector<192x1024xbf16>, vector<16x1024xf32> -> vector<16x1024xf32>
    %c0_3 = arith.constant 0 : index
    %c0_4 = arith.constant 0 : index
    %3 = vector.load %arg2[%c0_3, %c0_4] : memref<16x1xf32, #tpu.memory_space<vmem>>, vector<16x1xf32>
    %4 = vector.broadcast %3 : vector<16x1xf32> to vector<16x1024xf32>
    %5 = arith.addf %2, %4 : vector<16x1024xf32>
    %cst_5 = arith.constant 0.000000e+00 : f32
    %6 = vector.broadcast %cst_5 : f32 to vector<16x1024xf32>
    %7 = arith.maximumf %5, %6 : vector<16x1024xf32>
    %8 = arith.truncf %7 : vector<16x1024xf32> to vector<16x1024xbf16>
    %c0_6 = arith.constant 0 : index
    %c0_7 = arith.constant 0 : index
    %9 = vector.load %arg3[%c0_6, %c0_7] : memref<16x1024xbf16, #tpu.memory_space<vmem>>, vector<16x1024xbf16>
    tpu.vector_store %arg3[%c0_6, %c0_7], %8 {strides = array<i32>} : memref<16x1024xbf16, #tpu.memory_space<vmem>>, vector<16x1024xbf16>,
    return
  }
}

module attributes {stable_mosaic.version = 11 : i64} {
  func.func @_conv_gemm_kernel(%arg0: memref<32x256xbf16, #tpu.memory_space<vmem>>, %arg1: memref<256x225xbf16, #tpu.memory_space<vmem>>, %arg2: memref<32x1xf32, #tpu.memory_space<vmem>>, %arg3: memref<32x225xbf16, #tpu.memory_space<vmem>>) attributes {dimension_semantics = [], scalar_prefetch = 0 : i64, scratch_operands = 0 : i64, tpu.core_type = #tpu.core_type<tc>} {
    %c0 = arith.constant 0 : index
    %c0_0 = arith.constant 0 : index
    %0 = vector.load %arg0[%c0, %c0_0] : memref<32x256xbf16, #tpu.memory_space<vmem>>, vector<32x256xbf16>
    %c0_1 = arith.constant 0 : index
    %c0_2 = arith.constant 0 : index
    %1 = vector.load %arg1[%c0_1, %c0_2] : memref<256x225xbf16, #tpu.memory_space<vmem>>, vector<256x225xbf16>
    %cst = arith.constant dense<0.000000e+00> : vector<32x225xf32>
    %2 = tpu.matmul %0, %1, %cst {dimension_numbers = #tpu.dot_dimension_numbers<[1], [0], [0], [1], [0, 0, 1, 1], [], []>} : vector<32x256xbf16>, vector<256x225xbf16>, vector<32x225xf32> -> vector<32x225xf32>
    %c0_3 = arith.constant 0 : index
    %c0_4 = arith.constant 0 : index
    %3 = vector.load %arg2[%c0_3, %c0_4] : memref<32x1xf32, #tpu.memory_space<vmem>>, vector<32x1xf32>
    %4 = vector.broadcast %3 : vector<32x1xf32> to vector<32x225xf32>
    %5 = arith.addf %2, %4 : vector<32x225xf32>
    %cst_5 = arith.constant 0.000000e+00 : f32
    %6 = vector.broadcast %cst_5 : f32 to vector<32x225xf32>
    %7 = arith.maximumf %5, %6 : vector<32x225xf32>
    %8 = arith.truncf %7 : vector<32x225xf32> to vector<32x225xbf16>
    %c0_6 = arith.constant 0 : index
    %c0_7 = arith.constant 0 : index
    %9 = vector.load %arg3[%c0_6, %c0_7] : memref<32x225xbf16, #tpu.memory_space<vmem>>, vector<32x225xbf16>
    tpu.vector_store %arg3[%c0_6, %c0_7], %8 {strides = array<i32>} : memref<32x225xbf16, #tpu.memory_space<vmem>>, vector<32x225xbf16>,
    return
  }
}

module attributes {stable_mosaic.version = 11 : i64} {
  func.func @_fused_tail_kernel(%arg0: i32, %arg1: memref<1x1920xbf16, #tpu.memory_space<vmem>>, %arg2: memref<1920x256xbf16, #tpu.memory_space<vmem>>, %arg3: memref<1x256xf32, #tpu.memory_space<vmem>>, %arg4: memref<1x1xf32, #tpu.memory_space<vmem>>, %arg5: memref<1x4xf32, #tpu.memory_space<vmem>>, %arg6: memref<1x32xf32, #tpu.memory_space<vmem>>, %arg7: memref<1x32xf32, #tpu.memory_space<vmem>>, %arg8: memref<1x128xf32, #tpu.memory_space<vmem>>, %arg9: memref<1x128xf32, #tpu.memory_space<vmem>>, %arg10: memref<256x128xbf16, #tpu.memory_space<vmem>>, %arg11: memref<1x128xf32, #tpu.memory_space<vmem>>, %arg12: memref<32x128xbf16, #tpu.memory_space<vmem>>, %arg13: memref<1x128xf32, #tpu.memory_space<vmem>>, %arg14: memref<256x512xbf16, #tpu.memory_space<vmem>>, %arg15: memref<32x512xbf16, #tpu.memory_space<vmem>>, %arg16: memref<4x512xbf16, #tpu.memory_space<vmem>>, %arg17: memref<128x512xbf16, #tpu.memory_space<vmem>>, %arg18: memref<1x512xf32, #tpu.memory_space<vmem>>, %arg19: memref<128x4xbf16, #tpu.memory_space<vmem>>, %arg20: memref<1x4xf32, #tpu.memory_space<vmem>>, %arg21: memref<128x1xbf16, #tpu.memory_space<vmem>>, %arg22: memref<1x1xf32, #tpu.memory_space<vmem>>, %arg23: memref<1x4xf32, #tpu.memory_space<vmem>>, %arg24: memref<1x1xf32, #tpu.memory_space<vmem>>, %arg25: memref<1x32xf32, #tpu.memory_space<vmem>>, %arg26: memref<1x32xf32, #tpu.memory_space<vmem>>, %arg27: memref<1x128xf32, #tpu.memory_space<vmem>>, %arg28: memref<1x128xf32, #tpu.memory_space<vmem>>, %arg29: memref<1x256xf32, #tpu.memory_space<vmem>>) attributes {dimension_semantics = [#tpu.dimension_semantics<arbitrary>], iteration_bounds = array<i64: 4>, scalar_prefetch = 0 : i64, scratch_operands = 1 : i64, tpu.core_type = #tpu.core_type<tc>, window_params = [{transform_indices = @transform_0, window_bounds = array<i64: 1, 1920>}, {transform_indices = @transform_1, window_bounds = array<i64: 1920, 256>}, {pipeline_mode = #tpu.pipeline_mode<synchronous>, transform_indices = @transform_2, window_bounds = array<i64: 1, 256>}, {pipeline_mode = #tpu.pipeline_mode<synchronous>, transform_indices = @transform_3, window_bounds = array<i64: 1, 1>}, {pipeline_mode = #tpu.pipeline_mode<synchronous>, transform_indices = @transform_4, window_bounds = array<i64: 1, 4>}, {pipeline_mode = #tpu.pipeline_mode<synchronous>, transform_indices = @transform_5, window_bounds = array<i64: 1, 32>}, {pipeline_mode = #tpu.pipeline_mode<synchronous>, transform_indices = @transform_6, window_bounds = array<i64: 1, 32>}, {pipeline_mode = #tpu.pipeline_mode<synchronous>, transform_indices = @transform_7, window_bounds = array<i64: 1, 128>}, {pipeline_mode = #tpu.pipeline_mode<synchronous>, transform_indices = @transform_8, window_bounds = array<i64: 1, 128>}, {pipeline_mode = #tpu.pipeline_mode<synchronous>, transform_indices = @transform_9, window_bounds = array<i64: 256, 128>}, {pipeline_mode = #tpu.pipeline_mode<synchronous>, transform_indices = @transform_10, window_bounds = array<i64: 1, 128>}, {pipeline_mode = #tpu.pipeline_mode<synchronous>, transform_indices = @transform_11, window_bounds = array<i64: 32, 128>}, {pipeline_mode = #tpu.pipeline_mode<synchronous>, transform_indices = @transform_12, window_bounds = array<i64: 1, 128>}, {pipeline_mode = #tpu.pipeline_mode<synchronous>, transform_indices = @transform_13, window_bounds = array<i64: 256, 512>}, {pipeline_mode = #tpu.pipeline_mode<synchronous>, transform_indices = @transform_14, window_bounds = array<i64: 32, 512>}, {pipeline_mode = #tpu.pipeline_mode<synchronous>, transform_indices = @transform_15, window_bounds = array<i64: 4, 512>}, {pipeline_mode = #tpu.pipeline_mode<synchronous>, transform_indices = @transform_16, window_bounds = array<i64: 128, 512>}, {pipeline_mode = #tpu.pipeline_mode<synchronous>, transform_indices = @transform_17, window_bounds = array<i64: 1, 512>}, {pipeline_mode = #tpu.pipeline_mode<synchronous>, transform_indices = @transform_18, window_bounds = array<i64: 128, 4>}, {pipeline_mode = #tpu.pipeline_mode<synchronous>, transform_indices = @transform_19, window_bounds = array<i64: 1, 4>}, {pipeline_mode = #tpu.pipeline_mode<synchronous>, transform_indices = @transform_20, window_bounds = array<i64: 128, 1>}, {pipeline_mode = #tpu.pipeline_mode<synchronous>, transform_indices = @transform_21, window_bounds = array<i64: 1, 1>}, {pipeline_mode = #tpu.pipeline_mode<synchronous>, transform_indices = @transform_22, window_bounds = array<i64: 1, 4>}, {pipeline_mode = #tpu.pipeline_mode<synchronous>, transform_indices = @transform_23, window_bounds = array<i64: 1, 1>}, {pipeline_mode = #tpu.pipeline_mode<synchronous>, transform_indices = @transform_24, window_bounds = array<i64: 1, 32>}, {pipeline_mode = #tpu.pipeline_mode<synchronous>, transform_indices = @transform_25, window_bounds = array<i64: 1, 32>}, {pipeline_mode = #tpu.pipeline_mode<synchronous>, transform_indices = @transform_26, window_bounds = array<i64: 1, 128>}, {pipeline_mode = #tpu.pipeline_mode<synchronous>, transform_indices = @transform_27, window_bounds = array<i64: 1, 128>}]} {
    %c0_i32 = arith.constant 0 : i32
    %0 = arith.cmpi eq, %arg0, %c0_i32 : i32
    %1 = arith.extui %0 : i1 to i32
    %c0_i32_0 = arith.constant 0 : i32
    %2 = arith.cmpi ne, %1, %c0_i32_0 : i32
    scf.if %2 {
      %cst_9 = arith.constant 0.000000e+00 : f32
      %12 = vector.broadcast %cst_9 : f32 to vector<1x256xf32>
      %c0_10 = arith.constant 0 : index
      %c0_11 = arith.constant 0 : index
      %13 = vector.load %arg29[%c0_10, %c0_11] : memref<1x256xf32, #tpu.memory_space<vmem>>, vector<1x256xf32>
      tpu.vector_store %arg29[%c0_10, %c0_11], %12 {strides = array<i32>} : memref<1x256xf32, #tpu.memory_space<vmem>>, vector<1x256xf32>,
    } else {
    }
    %c0 = arith.constant 0 : index
    %c0_1 = arith.constant 0 : index
    %3 = vector.load %arg29[%c0, %c0_1] : memref<1x256xf32, #tpu.memory_space<vmem>>, vector<1x256xf32>
    %c0_2 = arith.constant 0 : index
    %c0_3 = arith.constant 0 : index
    %4 = vector.load %arg1[%c0_2, %c0_3] : memref<1x1920xbf16, #tpu.memory_space<vmem>>, vector<1x1920xbf16>
    %c0_4 = arith.constant 0 : index
    %c0_5 = arith.constant 0 : index
    %5 = vector.load %arg2[%c0_4, %c0_5] : memref<1920x256xbf16, #tpu.memory_space<vmem>>, vector<1920x256xbf16>
    %cst = arith.constant dense<0.000000e+00> : vector<1x256xf32>
    %6 = tpu.matmul %4, %5, %cst {dimension_numbers = #tpu.dot_dimension_numbers<[1], [0], [0], [1], [0, 0, 1, 1], [], []>} : vector<1x1920xbf16>, vector<1920x256xbf16>, vector<1x256xf32> -> vector<1x256xf32>
    %7 = arith.addf %3, %6 : vector<1x256xf32>
    %c0_6 = arith.constant 0 : index
    %c0_7 = arith.constant 0 : index
    %8 = vector.load %arg29[%c0_6, %c0_7] : memref<1x256xf32, #tpu.memory_space<vmem>>, vector<1x256xf32>
    tpu.vector_store %arg29[%c0_6, %c0_7], %7 {strides = array<i32>} : memref<1x256xf32, #tpu.memory_space<vmem>>, vector<1x256xf32>,
    %c3_i32 = arith.constant 3 : i32
    %9 = arith.cmpi eq, %arg0, %c3_i32 : i32
    %10 = arith.extui %9 : i1 to i32
    %c0_i32_8 = arith.constant 0 : i32
    %11 = arith.cmpi ne, %10, %c0_i32_8 : i32
    scf.if %11 {
      %c0_9 = arith.constant 0 : index
      %c0_10 = arith.constant 0 : index
      %12 = vector.load %arg29[%c0_9, %c0_10] : memref<1x256xf32, #tpu.memory_space<vmem>>, vector<1x256xf32>
      %c0_11 = arith.constant 0 : index
      %c0_12 = arith.constant 0 : index
      %13 = vector.load %arg3[%c0_11, %c0_12] : memref<1x256xf32, #tpu.memory_space<vmem>>, vector<1x256xf32>
      %14 = arith.addf %12, %13 : vector<1x256xf32>
      %cst_13 = arith.constant 0.000000e+00 : f32
      %15 = vector.broadcast %cst_13 : f32 to vector<1x256xf32>
      %16 = arith.maximumf %14, %15 : vector<1x256xf32>
      %17 = arith.truncf %16 : vector<1x256xf32> to vector<1x256xbf16>
      %c0_14 = arith.constant 0 : index
      %c0_15 = arith.constant 0 : index
      %18 = vector.load %arg10[%c0_14, %c0_15] : memref<256x128xbf16, #tpu.memory_space<vmem>>, vector<256x128xbf16>
      %cst_16 = arith.constant dense<0.000000e+00> : vector<1x128xf32>
      %19 = tpu.matmul %17, %18, %cst_16 {dimension_numbers = #tpu.dot_dimension_numbers<[1], [0], [0], [1], [0, 0, 1, 1], [], []>} : vector<1x256xbf16>, vector<256x128xbf16>, vector<1x128xf32> -> vector<1x128xf32>
      %c0_17 = arith.constant 0 : index
      %c0_18 = arith.constant 0 : index
      %20 = vector.load %arg6[%c0_17, %c0_18] : memref<1x32xf32, #tpu.memory_space<vmem>>, vector<1x32xf32>
      %21 = arith.truncf %20 : vector<1x32xf32> to vector<1x32xbf16>
      %c0_19 = arith.constant 0 : index
      %c0_20 = arith.constant 0 : index
      %22 = vector.load %arg12[%c0_19, %c0_20] : memref<32x128xbf16, #tpu.memory_space<vmem>>, vector<32x128xbf16>
      %cst_21 = arith.constant dense<0.000000e+00> : vector<1x128xf32>
      %23 = tpu.matmul %21, %22, %cst_21 {dimension_numbers = #tpu.dot_dimension_numbers<[1], [0], [0], [1], [0, 0, 1, 1], [], []>} : vector<1x32xbf16>, vector<32x128xbf16>, vector<1x128xf32> -> vector<1x128xf32>
      %24 = arith.addf %19, %23 : vector<1x128xf32>
      %c0_22 = arith.constant 0 : index
      %c0_23 = arith.constant 0 : index
      %25 = vector.load %arg4[%c0_22, %c0_23] : memref<1x1xf32, #tpu.memory_space<vmem>>, vector<1x1xf32>
      %c0_24 = arith.constant 0 : index
      %c0_25 = arith.constant 0 : index
      %26 = vector.load %arg11[%c0_24, %c0_25] : memref<1x128xf32, #tpu.memory_space<vmem>>, vector<1x128xf32>
      %27 = vector.broadcast %25 : vector<1x1xf32> to vector<1x128xf32>
      %28 = arith.mulf %27, %26 : vector<1x128xf32>
      %29 = arith.addf %24, %28 : vector<1x128xf32>
      %c0_26 = arith.constant 0 : index
      %c0_27 = arith.constant 0 : index
      %30 = vector.load %arg13[%c0_26, %c0_27] : memref<1x128xf32, #tpu.memory_space<vmem>>, vector<1x128xf32>
      %31 = arith.addf %29, %30 : vector<1x128xf32>
      %c0_28 = arith.constant 0 : index
      %c0_29 = arith.constant 0 : index
      %32 = vector.load %arg7[%c0_28, %c0_29] : memref<1x32xf32, #tpu.memory_space<vmem>>, vector<1x32xf32>
      %33 = vector.extract_strided_slice %31 {offsets = [0, 0], sizes = [1, 32], strides = [1, 1]} : vector<1x128xf32> to vector<1x32xf32>
      %34 = arith.negf %33 : vector<1x32xf32>
      %35 = math.exp %34 : vector<1x32xf32>
      %cst_30 = arith.constant 1.000000e+00 : f32
      %36 = vector.broadcast %cst_30 : f32 to vector<1x32xf32>
      %37 = arith.addf %36, %35 : vector<1x32xf32>
      %38 = arith.divf %36, %37 : vector<1x32xf32>
      %39 = vector.extract_strided_slice %31 {offsets = [0, 32], sizes = [1, 32], strides = [1, 1]} : vector<1x128xf32> to vector<1x32xf32>
      %40 = arith.negf %39 : vector<1x32xf32>
      %41 = math.exp %40 : vector<1x32xf32>
      %cst_31 = arith.constant 1.000000e+00 : f32
      %42 = vector.broadcast %cst_31 : f32 to vector<1x32xf32>
      %43 = arith.addf %42, %41 : vector<1x32xf32>
      %44 = arith.divf %42, %43 : vector<1x32xf32>
      %45 = vector.extract_strided_slice %31 {offsets = [0, 64], sizes = [1, 32], strides = [1, 1]} : vector<1x128xf32> to vector<1x32xf32>
      %46 = math.tanh %45 : vector<1x32xf32>
      %47 = vector.extract_strided_slice %31 {offsets = [0, 96], sizes = [1, 32], strides = [1, 1]} : vector<1x128xf32> to vector<1x32xf32>
      %48 = arith.negf %47 : vector<1x32xf32>
      %49 = math.exp %48 : vector<1x32xf32>
      %cst_32 = arith.constant 1.000000e+00 : f32
      %50 = vector.broadcast %cst_32 : f32 to vector<1x32xf32>
      %51 = arith.addf %50, %49 : vector<1x32xf32>
      %52 = arith.divf %50, %51 : vector<1x32xf32>
      %53 = arith.mulf %44, %32 : vector<1x32xf32>
      %54 = arith.mulf %38, %46 : vector<1x32xf32>
      %55 = arith.addf %53, %54 : vector<1x32xf32>
      %56 = math.tanh %55 : vector<1x32xf32>
      %57 = arith.mulf %52, %56 : vector<1x32xf32>
      %c0_33 = arith.constant 0 : index
      %c0_34 = arith.constant 0 : index
      %58 = vector.load %arg14[%c0_33, %c0_34] : memref<256x512xbf16, #tpu.memory_space<vmem>>, vector<256x512xbf16>
      %cst_35 = arith.constant dense<0.000000e+00> : vector<1x512xf32>
      %59 = tpu.matmul %17, %58, %cst_35 {dimension_numbers = #tpu.dot_dimension_numbers<[1], [0], [0], [1], [0, 0, 1, 1], [], []>} : vector<1x256xbf16>, vector<256x512xbf16>, vector<1x512xf32> -> vector<1x512xf32>
      %60 = arith.truncf %57 : vector<1x32xf32> to vector<1x32xbf16>
      %c0_36 = arith.constant 0 : index
      %c0_37 = arith.constant 0 : index
      %61 = vector.load %arg15[%c0_36, %c0_37] : memref<32x512xbf16, #tpu.memory_space<vmem>>, vector<32x512xbf16>
      %cst_38 = arith.constant dense<0.000000e+00> : vector<1x512xf32>
      %62 = tpu.matmul %60, %61, %cst_38 {dimension_numbers = #tpu.dot_dimension_numbers<[1], [0], [0], [1], [0, 0, 1, 1], [], []>} : vector<1x32xbf16>, vector<32x512xbf16>, vector<1x512xf32> -> vector<1x512xf32>
      %63 = arith.addf %59, %62 : vector<1x512xf32>
      %c0_39 = arith.constant 0 : index
      %c0_40 = arith.constant 0 : index
      %64 = vector.load %arg5[%c0_39, %c0_40] : memref<1x4xf32, #tpu.memory_space<vmem>>, vector<1x4xf32>
      %65 = arith.truncf %64 : vector<1x4xf32> to vector<1x4xbf16>
      %c0_41 = arith.constant 0 : index
      %c0_42 = arith.constant 0 : index
      %66 = vector.load %arg16[%c0_41, %c0_42] : memref<4x512xbf16, #tpu.memory_space<vmem>>, vector<4x512xbf16>
      %cst_43 = arith.constant dense<0.000000e+00> : vector<1x512xf32>
      %67 = tpu.matmul %65, %66, %cst_43 {dimension_numbers = #tpu.dot_dimension_numbers<[1], [0], [0], [1], [0, 0, 1, 1], [], []>} : vector<1x4xbf16>, vector<4x512xbf16>, vector<1x512xf32> -> vector<1x512xf32>
      %68 = arith.addf %63, %67 : vector<1x512xf32>
      %c0_44 = arith.constant 0 : index
      %c0_45 = arith.constant 0 : index
      %69 = vector.load %arg8[%c0_44, %c0_45] : memref<1x128xf32, #tpu.memory_space<vmem>>, vector<1x128xf32>
      %70 = arith.truncf %69 : vector<1x128xf32> to vector<1x128xbf16>
      %c0_46 = arith.constant 0 : index
      %c0_47 = arith.constant 0 : index
      %71 = vector.load %arg17[%c0_46, %c0_47] : memref<128x512xbf16, #tpu.memory_space<vmem>>, vector<128x512xbf16>
      %cst_48 = arith.constant dense<0.000000e+00> : vector<1x512xf32>
      %72 = tpu.matmul %70, %71, %cst_48 {dimension_numbers = #tpu.dot_dimension_numbers<[1], [0], [0], [1], [0, 0, 1, 1], [], []>} : vector<1x128xbf16>, vector<128x512xbf16>, vector<1x512xf32> -> vector<1x512xf32>
      %73 = arith.addf %68, %72 : vector<1x512xf32>
      %c0_49 = arith.constant 0 : index
      %c0_50 = arith.constant 0 : index
      %74 = vector.load %arg18[%c0_49, %c0_50] : memref<1x512xf32, #tpu.memory_space<vmem>>, vector<1x512xf32>
      %75 = arith.addf %73, %74 : vector<1x512xf32>
      %c0_51 = arith.constant 0 : index
      %c0_52 = arith.constant 0 : index
      %76 = vector.load %arg9[%c0_51, %c0_52] : memref<1x128xf32, #tpu.memory_space<vmem>>, vector<1x128xf32>
      %77 = vector.extract_strided_slice %75 {offsets = [0, 0], sizes = [1, 128], strides = [1, 1]} : vector<1x512xf32> to vector<1x128xf32>
      %78 = arith.negf %77 : vector<1x128xf32>
      %79 = math.exp %78 : vector<1x128xf32>
      %cst_53 = arith.constant 1.000000e+00 : f32
      %80 = vector.broadcast %cst_53 : f32 to vector<1x128xf32>
      %81 = arith.addf %80, %79 : vector<1x128xf32>
      %82 = arith.divf %80, %81 : vector<1x128xf32>
      %83 = vector.extract_strided_slice %75 {offsets = [0, 128], sizes = [1, 128], strides = [1, 1]} : vector<1x512xf32> to vector<1x128xf32>
      %84 = arith.negf %83 : vector<1x128xf32>
      %85 = math.exp %84 : vector<1x128xf32>
      %cst_54 = arith.constant 1.000000e+00 : f32
      %86 = vector.broadcast %cst_54 : f32 to vector<1x128xf32>
      %87 = arith.addf %86, %85 : vector<1x128xf32>
      %88 = arith.divf %86, %87 : vector<1x128xf32>
      %89 = vector.extract_strided_slice %75 {offsets = [0, 256], sizes = [1, 128], strides = [1, 1]} : vector<1x512xf32> to vector<1x128xf32>
      %90 = math.tanh %89 : vector<1x128xf32>
      %91 = vector.extract_strided_slice %75 {offsets = [0, 384], sizes = [1, 128], strides = [1, 1]} : vector<1x512xf32> to vector<1x128xf32>
      %92 = arith.negf %91 : vector<1x128xf32>
      %93 = math.exp %92 : vector<1x128xf32>
      %cst_55 = arith.constant 1.000000e+00 : f32
      %94 = vector.broadcast %cst_55 : f32 to vector<1x128xf32>
      %95 = arith.addf %94, %93 : vector<1x128xf32>
      %96 = arith.divf %94, %95 : vector<1x128xf32>
      %97 = arith.mulf %88, %76 : vector<1x128xf32>
      %98 = arith.mulf %82, %90 : vector<1x128xf32>
      %99 = arith.addf %97, %98 : vector<1x128xf32>
      %100 = math.tanh %99 : vector<1x128xf32>
      %101 = arith.mulf %96, %100 : vector<1x128xf32>
      %102 = arith.truncf %101 : vector<1x128xf32> to vector<1x128xbf16>
      %c0_56 = arith.constant 0 : index
      %c0_57 = arith.constant 0 : index
      %103 = vector.load %arg19[%c0_56, %c0_57] : memref<128x4xbf16, #tpu.memory_space<vmem>>, vector<128x4xbf16>
      %cst_58 = arith.constant dense<0.000000e+00> : vector<1x4xf32>
      %104 = tpu.matmul %102, %103, %cst_58 {dimension_numbers = #tpu.dot_dimension_numbers<[1], [0], [0], [1], [0, 0, 1, 1], [], []>} : vector<1x128xbf16>, vector<128x4xbf16>, vector<1x4xf32> -> vector<1x4xf32>
      %c0_59 = arith.constant 0 : index
      %c0_60 = arith.constant 0 : index
      %105 = vector.load %arg20[%c0_59, %c0_60] : memref<1x4xf32, #tpu.memory_space<vmem>>, vector<1x4xf32>
      %106 = arith.addf %104, %105 : vector<1x4xf32>
      %c0_61 = arith.constant 0 : index
      %c0_62 = arith.constant 0 : index
      %107 = vector.load %arg23[%c0_61, %c0_62] : memref<1x4xf32, #tpu.memory_space<vmem>>, vector<1x4xf32>
      tpu.vector_store %arg23[%c0_61, %c0_62], %106 {strides = array<i32>} : memref<1x4xf32, #tpu.memory_space<vmem>>, vector<1x4xf32>,
      %c0_63 = arith.constant 0 : index
      %c0_64 = arith.constant 0 : index
      %108 = vector.load %arg21[%c0_63, %c0_64] : memref<128x1xbf16, #tpu.memory_space<vmem>>, vector<128x1xbf16>
      %cst_65 = arith.constant dense<0.000000e+00> : vector<1x1xf32>
      %109 = tpu.matmul %102, %108, %cst_65 {dimension_numbers = #tpu.dot_dimension_numbers<[1], [0], [0], [1], [0, 0, 1, 1], [], []>} : vector<1x128xbf16>, vector<128x1xbf16>, vector<1x1xf32> -> vector<1x1xf32>
      %c0_66 = arith.constant 0 : index
      %c0_67 = arith.constant 0 : index
      %110 = vector.load %arg22[%c0_66, %c0_67] : memref<1x1xf32, #tpu.memory_space<vmem>>, vector<1x1xf32>
      %111 = arith.addf %109, %110 : vector<1x1xf32>
      %c0_68 = arith.constant 0 : index
      %c0_69 = arith.constant 0 : index
      %112 = vector.load %arg24[%c0_68, %c0_69] : memref<1x1xf32, #tpu.memory_space<vmem>>, vector<1x1xf32>
      tpu.vector_store %arg24[%c0_68, %c0_69], %111 {strides = array<i32>} : memref<1x1xf32, #tpu.memory_space<vmem>>, vector<1x1xf32>,
      %c0_70 = arith.constant 0 : index
      %c0_71 = arith.constant 0 : index
      %113 = vector.load %arg25[%c0_70, %c0_71] : memref<1x32xf32, #tpu.memory_space<vmem>>, vector<1x32xf32>
      tpu.vector_store %arg25[%c0_70, %c0_71], %57 {strides = array<i32>} : memref<1x32xf32, #tpu.memory_space<vmem>>, vector<1x32xf32>,
      %c0_72 = arith.constant 0 : index
      %c0_73 = arith.constant 0 : index
      %114 = vector.load %arg26[%c0_72, %c0_73] : memref<1x32xf32, #tpu.memory_space<vmem>>, vector<1x32xf32>
      tpu.vector_store %arg26[%c0_72, %c0_73], %55 {strides = array<i32>} : memref<1x32xf32, #tpu.memory_space<vmem>>, vector<1x32xf32>,
      %c0_74 = arith.constant 0 : index
      %c0_75 = arith.constant 0 : index
      %115 = vector.load %arg27[%c0_74, %c0_75] : memref<1x128xf32, #tpu.memory_space<vmem>>, vector<1x128xf32>
      tpu.vector_store %arg27[%c0_74, %c0_75], %101 {strides = array<i32>} : memref<1x128xf32, #tpu.memory_space<vmem>>, vector<1x128xf32>,
      %c0_76 = arith.constant 0 : index
      %c0_77 = arith.constant 0 : index
      %116 = vector.load %arg28[%c0_76, %c0_77] : memref<1x128xf32, #tpu.memory_space<vmem>>, vector<1x128xf32>
      tpu.vector_store %arg28[%c0_76, %c0_77], %99 {strides = array<i32>} : memref<1x128xf32, #tpu.memory_space<vmem>>, vector<1x128xf32>,
    } else {
    }
    return
  }
  func.func @transform_0(%arg0: i32) -> (i32, i32) {
    %c0_i32 = arith.constant 0 : i32
    %c0_i32_0 = arith.constant 0 : i32
    return %c0_i32, %arg0 : i32, i32
  }
  func.func @transform_1(%arg0: i32) -> (i32, i32) {
    %c0_i32 = arith.constant 0 : i32
    %c0_i32_0 = arith.constant 0 : i32
    return %arg0, %c0_i32 : i32, i32
  }
  func.func @transform_2(%arg0: i32) -> (i32, i32) {
    %c0_i32 = arith.constant 0 : i32
    %c0_i32_0 = arith.constant 0 : i32
    %c0_i32_1 = arith.constant 0 : i32
    return %c0_i32, %c0_i32_0 : i32, i32
  }
  func.func @transform_3(%arg0: i32) -> (i32, i32) {
    %c0_i32 = arith.constant 0 : i32
    %c0_i32_0 = arith.constant 0 : i32
    %c0_i32_1 = arith.constant 0 : i32
    return %c0_i32, %c0_i32_0 : i32, i32
  }
  func.func @transform_4(%arg0: i32) -> (i32, i32) {
    %c0_i32 = arith.constant 0 : i32
    %c0_i32_0 = arith.constant 0 : i32
    %c0_i32_1 = arith.constant 0 : i32
    return %c0_i32, %c0_i32_0 : i32, i32
  }
  func.func @transform_5(%arg0: i32) -> (i32, i32) {
    %c0_i32 = arith.constant 0 : i32
    %c0_i32_0 = arith.constant 0 : i32
    %c0_i32_1 = arith.constant 0 : i32
    return %c0_i32, %c0_i32_0 : i32, i32
  }
  func.func @transform_6(%arg0: i32) -> (i32, i32) {
    %c0_i32 = arith.constant 0 : i32
    %c0_i32_0 = arith.constant 0 : i32
    %c0_i32_1 = arith.constant 0 : i32
    return %c0_i32, %c0_i32_0 : i32, i32
  }
  func.func @transform_7(%arg0: i32) -> (i32, i32) {
    %c0_i32 = arith.constant 0 : i32
    %c0_i32_0 = arith.constant 0 : i32
    %c0_i32_1 = arith.constant 0 : i32
    return %c0_i32, %c0_i32_0 : i32, i32
  }
  func.func @transform_8(%arg0: i32) -> (i32, i32) {
    %c0_i32 = arith.constant 0 : i32
    %c0_i32_0 = arith.constant 0 : i32
    %c0_i32_1 = arith.constant 0 : i32
    return %c0_i32, %c0_i32_0 : i32, i32
  }
  func.func @transform_9(%arg0: i32) -> (i32, i32) {
    %c0_i32 = arith.constant 0 : i32
    %c0_i32_0 = arith.constant 0 : i32
    %c0_i32_1 = arith.constant 0 : i32
    return %c0_i32, %c0_i32_0 : i32, i32
  }
  func.func @transform_10(%arg0: i32) -> (i32, i32) {
    %c0_i32 = arith.constant 0 : i32
    %c0_i32_0 = arith.constant 0 : i32
    %c0_i32_1 = arith.constant 0 : i32
    return %c0_i32, %c0_i32_0 : i32, i32
  }
  func.func @transform_11(%arg0: i32) -> (i32, i32) {
    %c0_i32 = arith.constant 0 : i32
    %c0_i32_0 = arith.constant 0 : i32
    %c0_i32_1 = arith.constant 0 : i32
    return %c0_i32, %c0_i32_0 : i32, i32
  }
  func.func @transform_12(%arg0: i32) -> (i32, i32) {
    %c0_i32 = arith.constant 0 : i32
    %c0_i32_0 = arith.constant 0 : i32
    %c0_i32_1 = arith.constant 0 : i32
    return %c0_i32, %c0_i32_0 : i32, i32
  }
  func.func @transform_13(%arg0: i32) -> (i32, i32) {
    %c0_i32 = arith.constant 0 : i32
    %c0_i32_0 = arith.constant 0 : i32
    %c0_i32_1 = arith.constant 0 : i32
    return %c0_i32, %c0_i32_0 : i32, i32
  }
  func.func @transform_14(%arg0: i32) -> (i32, i32) {
    %c0_i32 = arith.constant 0 : i32
    %c0_i32_0 = arith.constant 0 : i32
    %c0_i32_1 = arith.constant 0 : i32
    return %c0_i32, %c0_i32_0 : i32, i32
  }
  func.func @transform_15(%arg0: i32) -> (i32, i32) {
    %c0_i32 = arith.constant 0 : i32
    %c0_i32_0 = arith.constant 0 : i32
    %c0_i32_1 = arith.constant 0 : i32
    return %c0_i32, %c0_i32_0 : i32, i32
  }
  func.func @transform_16(%arg0: i32) -> (i32, i32) {
    %c0_i32 = arith.constant 0 : i32
    %c0_i32_0 = arith.constant 0 : i32
    %c0_i32_1 = arith.constant 0 : i32
    return %c0_i32, %c0_i32_0 : i32, i32
  }
  func.func @transform_17(%arg0: i32) -> (i32, i32) {
    %c0_i32 = arith.constant 0 : i32
    %c0_i32_0 = arith.constant 0 : i32
    %c0_i32_1 = arith.constant 0 : i32
    return %c0_i32, %c0_i32_0 : i32, i32
  }
  func.func @transform_18(%arg0: i32) -> (i32, i32) {
    %c0_i32 = arith.constant 0 : i32
    %c0_i32_0 = arith.constant 0 : i32
    %c0_i32_1 = arith.constant 0 : i32
    return %c0_i32, %c0_i32_0 : i32, i32
  }
  func.func @transform_19(%arg0: i32) -> (i32, i32) {
    %c0_i32 = arith.constant 0 : i32
    %c0_i32_0 = arith.constant 0 : i32
    %c0_i32_1 = arith.constant 0 : i32
    return %c0_i32, %c0_i32_0 : i32, i32
  }
  func.func @transform_20(%arg0: i32) -> (i32, i32) {
    %c0_i32 = arith.constant 0 : i32
    %c0_i32_0 = arith.constant 0 : i32
    %c0_i32_1 = arith.constant 0 : i32
    return %c0_i32, %c0_i32_0 : i32, i32
  }
  func.func @transform_21(%arg0: i32) -> (i32, i32) {
    %c0_i32 = arith.constant 0 : i32
    %c0_i32_0 = arith.constant 0 : i32
    %c0_i32_1 = arith.constant 0 : i32
    return %c0_i32, %c0_i32_0 : i32, i32
  }
  func.func @transform_22(%arg0: i32) -> (i32, i32) {
    %c0_i32 = arith.constant 0 : i32
    %c0_i32_0 = arith.constant 0 : i32
    %c0_i32_1 = arith.constant 0 : i32
    return %c0_i32, %c0_i32_0 : i32, i32
  }
  func.func @transform_23(%arg0: i32) -> (i32, i32) {
    %c0_i32 = arith.constant 0 : i32
    %c0_i32_0 = arith.constant 0 : i32
    %c0_i32_1 = arith.constant 0 : i32
    return %c0_i32, %c0_i32_0 : i32, i32
  }
  func.func @transform_24(%arg0: i32) -> (i32, i32) {
    %c0_i32 = arith.constant 0 : i32
    %c0_i32_0 = arith.constant 0 : i32
    %c0_i32_1 = arith.constant 0 : i32
    return %c0_i32, %c0_i32_0 : i32, i32
  }
  func.func @transform_25(%arg0: i32) -> (i32, i32) {
    %c0_i32 = arith.constant 0 : i32
    %c0_i32_0 = arith.constant 0 : i32
    %c0_i32_1 = arith.constant 0 : i32
    return %c0_i32, %c0_i32_0 : i32, i32
  }
  func.func @transform_26(%arg0: i32) -> (i32, i32) {
    %c0_i32 = arith.constant 0 : i32
    %c0_i32_0 = arith.constant 0 : i32
    %c0_i32_1 = arith.constant 0 : i32
    return %c0_i32, %c0_i32_0 : i32, i32
  }
  func.func @transform_27(%arg0: i32) -> (i32, i32) {
    %c0_i32 = arith.constant 0 : i32
    %c0_i32_0 = arith.constant 0 : i32
    %c0_i32_1 = arith.constant 0 : i32
    return %c0_i32, %c0_i32_0 : i32, i32
  }
}

</mosaic_0001>

<bundles_post_ra>
// kernel: a3c_stacked_lstm_forward.3
= control target key start
LH: loop header
LB: loop body
LE: loop exit
PB: predicated region body
PF: predicated region fallthrough
CT: control target
= control target key end

     0   :  { %v989_v3 = vmov 0   ;;  %vm614_vm0 = vcmask 523264   ;;  %s1350_s1 = inlined_call_operand.vmem [shape: bf16[192,1024], index: 1, kind: input, shape index: {}]   ;;  %s1351_s0 = inlined_call_operand.vmem [shape: bf16[16,192], index: 0, kind: input, shape index: {}]   ;;  %s1352_s2 = inlined_call_operand.vmem [shape: f32[16,1], index: 2, kind: input, shape index: {}]   ;;  %s1353_s3 = inlined_call_operand.vmem [shape: bf16[16,1024], index: 3, kind: output, shape index: {}]  }
   0x1   :  { %v73_v0 = vld [vmem:[%s1350_s1 + $0x1c0] sm:$0xff]  ;;  %v74_v2 = vld [vmem:[%s1350_s1 + $0x1c8] sm:$0xff]  ;;  %985 = vset.pattern.permute.xlu0 %v989_v3 }
   0x2   :  { %v77_v1 = vld [vmem:[%s1350_s1 + $0x1e0] sm:$0xff]  ;;  %v78_v5 = vld [vmem:[%s1350_s1 + $0x1e8] sm:$0xff] }
   0x3   :  { %v925_v4 = vcombine.high %v73_v0, %v77_v1  ;;  %v924_v6 = vcombine.low %v73_v0, %v77_v1  ;;  %v65_v7 = vld [vmem:[%s1350_s1 + $0x180] sm:$0xff]  ;;  %v927_v9 = vcombine.high %v74_v2, %v78_v5  ;;  %v926_v10 = vcombine.low %v74_v2, %v78_v5  ;;  %v66_v12 = vld [vmem:[%s1350_s1 + $0x188] sm:$0xff] }
   0x4   :  { %v69_v8 = vld [vmem:[%s1350_s1 + $0x1a0] sm:$0xff]  ;;  %v70_v13 = vld [vmem:[%s1350_s1 + $0x1a8] sm:$0xff] }
   0x5   :  { %v917_v11 = vcombine.high %v65_v7, %v69_v8  ;;  %v57_v14 = vld [vmem:[%s1350_s1 + $0x140] sm:$0xff]  ;;  %618 = vmatprep.subr.bf16.mxu0 %v925_v4  ;;  %v919_v15 = vcombine.high %v66_v12, %v70_v13  ;;  %v58_v17 = vld [vmem:[%s1350_s1 + $0x148] sm:$0xff]  ;;  %661 = vmatprep.subr.bf16.mxu1 %v927_v9  ;;  %v916_v19 = vcombine.low %v65_v7, %v69_v8 }
   0x6   :  { %v61_v16 = vld [vmem:[%s1350_s1 + $0x160] sm:$0xff]  ;;  %v62_v18 = vld [vmem:[%s1350_s1 + $0x168] sm:$0xff]  ;;  %619 = vmatpush1.bf16.msra.mxu0 %v924_v6  ;;  %662 = vmatpush1.bf16.msra.mxu1 %v926_v10  ;;  %v918_v20 = vcombine.low %v66_v12, %v70_v13 }
   0x7   :  { %620 = vmatprep.subr.bf16.mxu0 %v917_v11  ;;  %v909_v21 = vcombine.high %v57_v14, %v61_v16  ;;  %663 = vmatprep.subr.bf16.mxu1 %v919_v15  ;;  %v911_v22 = vcombine.high %v58_v17, %v62_v18  ;;  %v49_v23 = vld [vmem:[%s1350_s1 + $0x100] sm:$0xff]  ;;  %v50_v25 = vld [vmem:[%s1350_s1 + $0x108] sm:$0xff]  ;;  %v908_v27 = vcombine.low %v57_v14, %v61_v16 }
   0x8   :  { %v53_v24 = vld [vmem:[%s1350_s1 + $0x120] sm:$0xff]  ;;  %v54_v26 = vld [vmem:[%s1350_s1 + $0x128] sm:$0xff]  ;;  %v910_v28 = vcombine.low %v58_v17, %v62_v18 }
   0x9   :  { %v901_v29 = vcombine.high %v49_v23, %v53_v24  ;;  %v903_v30 = vcombine.high %v50_v25, %v54_v26  ;;  %v41_v31 = vld [vmem:[%s1350_s1 + $0xc0] sm:$0xff]  ;;  %v42_v33 = vld [vmem:[%s1350_s1 + $0xc8] sm:$0xff]  ;;  %v900_v35 = vcombine.low %v49_v23, %v53_v24  ;;  %v902_v36 = vcombine.low %v50_v25, %v54_v26 }
   0xa   :  { %621 = vmatpush1.bf16.msra.mxu0 %v916_v19  ;;  %664 = vmatpush1.bf16.msra.mxu1 %v918_v20  ;;  %v45_v32 = vld [vmem:[%s1350_s1 + $0xe0] sm:$0xff]  ;;  %v46_v34 = vld [vmem:[%s1350_s1 + $0xe8] sm:$0xff] }
   0xb   :  { %622 = vmatprep.subr.bf16.mxu0 %v909_v21  ;;  %665 = vmatprep.subr.bf16.mxu1 %v911_v22  ;;  %v893_v37 = vcombine.high %v41_v31, %v45_v32  ;;  %v895_v38 = vcombine.high %v42_v33, %v46_v34  ;;  %v33_v39 = vld [vmem:[%s1350_s1 + $0x80] sm:$0xff]  ;;  %v34_v41 = vld [vmem:[%s1350_s1 + $0x88] sm:$0xff]  ;;  %v892_v43 = vcombine.low %v41_v31, %v45_v32 }
   0xc   :  { %v37_v40 = vld [vmem:[%s1350_s1 + $0xa0] sm:$0xff]  ;;  %v38_v42 = vld [vmem:[%s1350_s1 + $0xa8] sm:$0xff]  ;;  %v894_v45 = vcombine.low %v42_v33, %v46_v34  ;;  %v75_v34 = vld [vmem:[%s1350_s1 + $0x1d0] sm:$0xff] }
   0xd   :  { %v1085_v44 = vld [vmem:[%s1351_s0 + $0x4] ss:$8 sps:$4 sm:$0xff]   ;;  %v885_v46 = vcombine.high %v33_v39, %v37_v40  ;;  %v887_v47 = vcombine.high %v34_v41, %v38_v42  ;;  %v884_v52 = vcombine.low %v33_v39, %v37_v40  ;;  %v886_v53 = vcombine.low %v34_v41, %v38_v42  ;;  %v67_v42 = vld [vmem:[%s1350_s1 + $0x190] sm:$0xff] }
   0xe   :  { %623 = vmatpush1.bf16.msra.mxu0 %v908_v27  ;;  %666 = vmatpush1.bf16.msra.mxu1 %v910_v28  ;;  %v25_v48 = vld [vmem:[%s1350_s1 + $0x40] sm:$0xff]  ;;  %v26_v50 = vld [vmem:[%s1350_s1 + $0x48] sm:$0xff] }
   0xf   :  { %624 = vmatprep.subr.bf16.mxu0 %v901_v29  ;;  %667 = vmatprep.subr.bf16.mxu1 %v903_v30  ;;  %v29_v49 = vld [vmem:[%s1350_s1 + $0x60] sm:$0xff]  ;;  %v30_v51 = vld [vmem:[%s1350_s1 + $0x68] sm:$0xff] }
  0x10   :  { %964 = vmatprep.mubr.msk.bf16.mxu0 %vm614_vm0, %v1085_v44  ;;  %965 = vmatprep.mubr.msk.bf16.mxu1 %vm614_vm0, %v1085_v44  ;;  %v877_v54 = vcombine.high %v25_v48, %v29_v49  ;;  %v879_v55 = vcombine.high %v26_v50, %v30_v51  ;;  %v17_v56 = vld [vmem:[%s1350_s1] sm:$0xff]  ;;  %v18_v58 = vld [vmem:[%s1350_s1 + $0x8] sm:$0xff]  ;;  %v876_v60 = vcombine.low %v25_v48, %v29_v49 }
  0x11   :  { %v21_v57 = vld [vmem:[%s1350_s1 + $0x20] sm:$0xff]  ;;  %v22_v59 = vld [vmem:[%s1350_s1 + $0x28] sm:$0xff]  ;;  %v878_v61 = vcombine.low %v26_v50, %v30_v51 }
  0x12   :  { %625 = vmatpush1.bf16.msra.mxu0 %v900_v35  ;;  %668 = vmatpush1.bf16.msra.mxu1 %v902_v36  ;;  %v869_v62 = vcombine.high %v17_v56, %v21_v57  ;;  %v871_v63 = vcombine.high %v18_v58, %v22_v59  ;;  %v105_v0 = vld [vmem:[%s1350_s1 + $0x2c0] sm:$0xff]  ;;  %v106_v2 = vld [vmem:[%s1350_s1 + $0x2c8] sm:$0xff]  ;;  %v868_v4 = vcombine.low %v17_v56, %v21_v57  ;;  %v79_v35 = vld [vmem:[%s1350_s1 + $0x1f0] sm:$0xff] }
  0x13   :  { %626 = vmatprep.subr.bf16.mxu0 %v893_v37  ;;  %669 = vmatprep.subr.bf16.mxu1 %v895_v38  ;;  %v109_v1 = vld [vmem:[%s1350_s1 + $0x2e0] sm:$0xff]  ;;  %v110_v3 = vld [vmem:[%s1350_s1 + $0x2e8] sm:$0xff]  ;;  %v870_v5 = vcombine.low %v18_v58, %v22_v59  ;;  %v76_v36 = vld [vmem:[%s1350_s1 + $0x1d8] sm:$0xff]  ;;  %v929_v40 = vcombine.high %v75_v34, %v79_v35  ;;  %v928_v48 = vcombine.low %v75_v34, %v79_v35 }
  0x14   :  { %v957_v6 = vcombine.high %v105_v0, %v109_v1  ;;  %v959_v7 = vcombine.high %v106_v2, %v110_v3  ;;  %v97_v8 = vld [vmem:[%s1350_s1 + $0x280] sm:$0xff]  ;;  %v98_v10 = vld [vmem:[%s1350_s1 + $0x288] sm:$0xff]  ;;  %v956_v12 = vcombine.low %v105_v0, %v109_v1  ;;  %v958_v13 = vcombine.low %v106_v2, %v110_v3  ;;  %v80_v37 = vld [vmem:[%s1350_s1 + $0x1f8] sm:$0xff] }
  0x15   :  { %v101_v9 = vld [vmem:[%s1350_s1 + $0x2a0] sm:$0xff]  ;;  %v102_v11 = vld [vmem:[%s1350_s1 + $0x2a8] sm:$0xff]  ;;  %v931_v41 = vcombine.high %v76_v36, %v80_v37  ;;  %v930_v49 = vcombine.low %v76_v36, %v80_v37  ;;  %v107_v35 = vld [vmem:[%s1350_s1 + $0x2d0] sm:$0xff] }
  0x16   :  { %627 = vmatpush1.bf16.msra.mxu0 %v892_v43  ;;  %670 = vmatpush1.bf16.msra.mxu1 %v894_v45  ;;  %v949_v14 = vcombine.high %v97_v8, %v101_v9  ;;  %v113_v15 = vld [vmem:[%s1352_s2] sm:$0xff]  ;;  %v951_v16 = vcombine.high %v98_v10, %v102_v11  ;;  %v90_v19 = vld [vmem:[%s1350_s1 + $0x248] sm:$0xff]  ;;  %v948_v22 = vcombine.low %v97_v8, %v101_v9  ;;  %v71_v43 = vld [vmem:[%s1350_s1 + $0x1b0] sm:$0xff] }
  0x17   :  { %628 = vmatprep.subr.bf16.mxu0 %v885_v46  ;;  %671 = vmatprep.subr.bf16.mxu1 %v887_v47  ;;  %v89_v17 = vld [vmem:[%s1350_s1 + $0x240] sm:$0xff]  ;;  %v94_v20 = vld [vmem:[%s1350_s1 + $0x268] sm:$0xff]  ;;  %v950_v23 = vcombine.low %v98_v10, %v102_v11  ;;  %v68_v46 = vld [vmem:[%s1350_s1 + $0x198] sm:$0xff]  ;;  %v921_v50 = vcombine.high %v67_v42, %v71_v43  ;;  %v920_v56 = vcombine.low %v67_v42, %v71_v43 }
  0x18   :  { %v93_v18 = vld [vmem:[%s1350_s1 + $0x260] sm:$0xff]  ;;  %117 = vperm.xlu0 %985, %v113_v15   ;;  %v114_v21 = vld [vmem:[%s1352_s2 + $0x8] sm:$0xff]  ;;  %v943_v25 = vcombine.high %v90_v19, %v94_v20  ;;  %v942_v31 = vcombine.low %v90_v19, %v94_v20  ;;  %v72_v47 = vld [vmem:[%s1350_s1 + $0x1b8] sm:$0xff] }
  0x19   :  { %v941_v24 = vcombine.high %v89_v17, %v93_v18  ;;  %v81_v26 = vld [vmem:[%s1350_s1 + $0x200] sm:$0xff]  ;;  %v82_v28 = vld [vmem:[%s1350_s1 + $0x208] sm:$0xff]  ;;  %v940_v30 = vcombine.low %v89_v17, %v93_v18  ;;  %v923_v51 = vcombine.high %v68_v46, %v72_v47  ;;  %v922_v57 = vcombine.low %v68_v46, %v72_v47  ;;  %v35_v11 = vld [vmem:[%s1350_s1 + $0x90] sm:$0xff] }
  0x1a   :  { %629 = vmatpush1.bf16.msra.mxu0 %v884_v52  ;;  %672 = vmatpush1.bf16.msra.mxu1 %v886_v53  ;;  %v85_v27 = vld [vmem:[%s1350_s1 + $0x220] sm:$0xff]  ;;  %v86_v29 = vld [vmem:[%s1350_s1 + $0x228] sm:$0xff]  ;;  %v59_v52 = vld [vmem:[%s1350_s1 + $0x150] sm:$0xff] }
  0x1b   :  { %630 = vmatprep.subr.bf16.mxu0 %v877_v54  ;;  %673 = vmatprep.subr.bf16.mxu1 %v879_v55  ;;  %v933_v32 = vcombine.high %v81_v26, %v85_v27  ;;  %v935_v33 = vcombine.high %v82_v28, %v86_v29  ;;  %v932_v38 = vcombine.low %v81_v26, %v85_v27  ;;  %v1190_v45 = vld [vmem:[%s1351_s0] ss:$8 sps:$4 sm:$0xff]   ;;  %v63_v53 = vld [vmem:[%s1350_s1 + $0x170] sm:$0xff]  ;;  %v60_v54 = vld [vmem:[%s1350_s1 + $0x158] sm:$0xff] }
  0x1c   :  { %122 = vperm.xlu0 %985, %v114_v21   ;;  %v934_v39 = vcombine.low %v82_v28, %v86_v29  ;;  %v64_v55 = vld [vmem:[%s1350_s1 + $0x178] sm:$0xff]  ;;  %v913_v58 = vcombine.high %v59_v52, %v63_v53  ;;  %v912_v0 = vcombine.low %v59_v52, %v63_v53  ;;  %v27_v19 = vld [vmem:[%s1350_s1 + $0x50] sm:$0xff] }
  0x1d   :  { %v915_v59 = vcombine.high %v60_v54, %v64_v55  ;;  %v914_v1 = vcombine.low %v60_v54, %v64_v55  ;;  %v31_v20 = vld [vmem:[%s1350_s1 + $0x70] sm:$0xff]  ;;  %v28_v21 = vld [vmem:[%s1350_s1 + $0x58] sm:$0xff] }
  0x1e   :  { %631 = vmatpush1.bf16.msra.mxu0 %v876_v60  ;;  %674 = vmatpush1.bf16.msra.mxu1 %v878_v61  ;;  %v51_v60 = vld [vmem:[%s1350_s1 + $0x110] sm:$0xff]  ;;  %v20_v29 = vld [vmem:[%s1350_s1 + $0x18] sm:$0xff] }
  0x1f   :  { %632 = vmatprep.subr.bf16.mxu0 %v869_v62  ;;  %675 = vmatprep.subr.bf16.mxu1 %v871_v63  ;;  %v55_v61 = vld [vmem:[%s1350_s1 + $0x130] sm:$0xff]  ;;  %v52_v62 = vld [vmem:[%s1350_s1 + $0x118] sm:$0xff] }
  0x20   :  { %v56_v63 = vld [vmem:[%s1350_s1 + $0x138] sm:$0xff]  ;;  %v905_v2 = vcombine.high %v51_v60, %v55_v61  ;;  %v19_v27 = vld [vmem:[%s1350_s1 + $0x10] sm:$0xff] }
  0x21   :  { %v907_v3 = vcombine.high %v52_v62, %v56_v63  ;;  %v906_v8 = vcombine.low %v52_v62, %v56_v63  ;;  %v23_v28 = vld [vmem:[%s1350_s1 + $0x30] sm:$0xff]  ;;  %v108_v37 = vld [vmem:[%s1350_s1 + $0x2d8] sm:$0xff] }
  0x22   :  { %633 = vmatpush1.bf16.msra.mxu0 %v868_v4  ;;  %676 = vmatpush1.bf16.msra.mxu1 %v870_v5  ;;  %v43_v4 = vld [vmem:[%s1350_s1 + $0xd0] sm:$0xff]  ;;  %v100_v47 = vld [vmem:[%s1350_s1 + $0x298] sm:$0xff] }
  0x23   :  { %642 = vmatprep.subr.bf16.mxu0 %v957_v6  ;;  %685 = vmatprep.subr.bf16.mxu1 %v959_v7  ;;  %v47_v5 = vld [vmem:[%s1350_s1 + $0xf0] sm:$0xff]  ;;  %v48_v6 = vld [vmem:[%s1350_s1 + $0xf8] sm:$0xff]  ;;  %v904_v7 = vcombine.low %v51_v60, %v55_v61 }
  0x24   :  { %v897_v9 = vcombine.high %v43_v4, %v47_v5  ;;  %v896_v15 = vcombine.low %v43_v4, %v47_v5  ;;  %v111_v36 = vld [vmem:[%s1350_s1 + $0x2f0] sm:$0xff]  ;;  %v92_v55 = vld [vmem:[%s1350_s1 + $0x258] sm:$0xff] }
  0x25   :  { %v99_v43 = vld [vmem:[%s1350_s1 + $0x290] sm:$0xff]  ;;  %v84_v63 = vld [vmem:[%s1350_s1 + $0x218] sm:$0xff] }
  0x26   :  { %643 = vmatpush2.bf16.msra.mxu0 %v956_v12  ;;  %686 = vmatpush2.bf16.msra.mxu1 %v958_v13  ;;  %v39_v12 = vld [vmem:[%s1350_s1 + $0xb0] sm:$0xff]  ;;  %v36_v13 = vld [vmem:[%s1350_s1 + $0x98] sm:$0xff] }
  0x27   :  { %644 = vmatprep.subr.bf16.mxu0 %v949_v14  ;;  %687 = vmatprep.subr.bf16.mxu1 %v951_v16  ;;  %v40_v14 = vld [vmem:[%s1350_s1 + $0xb8] sm:$0xff]  ;;  %v889_v17 = vcombine.high %v35_v11, %v39_v12  ;;  %v103_v46 = vld [vmem:[%s1350_s1 + $0x2b0] sm:$0xff] }
  0x28   :  { %v891_v18 = vcombine.high %v36_v13, %v40_v14  ;;  %v91_v53 = vld [vmem:[%s1350_s1 + $0x250] sm:$0xff] }
  0x29   :  { %v95_v54 = vld [vmem:[%s1350_s1 + $0x270] sm:$0xff] }
  0x2a   :  { %645 = vmatpush2.bf16.msra.mxu0 %v948_v22  ;;  %688 = vmatpush2.bf16.msra.mxu1 %v950_v23  ;;  %v32_v22 = vld [vmem:[%s1350_s1 + $0x78] sm:$0xff]  ;;  %v888_v23 = vcombine.low %v35_v11, %v39_v12  ;;  %v83_v61 = vld [vmem:[%s1350_s1 + $0x210] sm:$0xff] }
  0x2b   :  { %646 = vmatprep.subr.bf16.mxu0 %v941_v24  ;;  %689 = vmatprep.subr.bf16.mxu1 %v943_v25  ;;  %v890_v24 = vcombine.low %v36_v13, %v40_v14  ;;  %v881_v25 = vcombine.high %v27_v19, %v31_v20  ;;  %v883_v26 = vcombine.high %v28_v21, %v32_v22  ;;  %v87_v62 = vld [vmem:[%s1350_s1 + $0x230] sm:$0xff] }
  0x2c   :  { %v936_v5 = vcombine.low %v83_v61, %v87_v62 }
  0x2e   :  { %647 = vmatpush2.bf16.msra.mxu0 %v940_v30  ;;  %690 = vmatpush2.bf16.msra.mxu1 %v942_v31  ;;  %v24_v30 = vld [vmem:[%s1350_s1 + $0x38] sm:$0xff]  ;;  %v880_v31 = vcombine.low %v27_v19, %v31_v20 }
  0x2f   :  { %648 = vmatprep.subr.bf16.mxu0 %v933_v32  ;;  %691 = vmatprep.subr.bf16.mxu1 %v935_v33  ;;  %v882_v32 = vcombine.low %v28_v21, %v32_v22  ;;  %v873_v33 = vcombine.high %v19_v27, %v23_v28  ;;  %v875_v34 = vcombine.high %v20_v29, %v24_v30 }
  0x32   :  { %649 = vmatpush2.bf16.msra.mxu0 %v932_v38  ;;  %692 = vmatpush2.bf16.msra.mxu1 %v934_v39  ;;  %v112_v38 = vld [vmem:[%s1350_s1 + $0x2f8] sm:$0xff]  ;;  %v872_v39 = vcombine.low %v19_v27, %v23_v28 }
  0x33   :  { %704 = vmatprep.subr.bf16.mxu0 %v929_v40  ;;  %747 = vmatprep.subr.bf16.mxu1 %v931_v41  ;;  %v874_v40 = vcombine.low %v20_v29, %v24_v30  ;;  %v961_v41 = vcombine.high %v107_v35, %v111_v36  ;;  %v963_v42 = vcombine.high %v108_v37, %v112_v38 }
  0x35   :  { %651 = vmatmul.mubr.bf16.vlgmr.msra.gmra.mxu0 %v1190_v45  ;;  %694 = vmatmul.mubr.bf16.vlgmr.msra.gmra.mxu1 %v1190_v45 }
  0x36   :  { %705 = vmatpush1.bf16.msra.mxu0 %v928_v48  ;;  %748 = vmatpush1.bf16.msra.mxu1 %v930_v49  ;;  %v104_v48 = vld [vmem:[%s1350_s1 + $0x2b8] sm:$0xff]  ;;  %v960_v49 = vcombine.low %v107_v35, %v111_v36 }
  0x37   :  { %706 = vmatprep.subr.bf16.mxu0 %v921_v50  ;;  %749 = vmatprep.subr.bf16.mxu1 %v923_v51  ;;  %v962_v50 = vcombine.low %v108_v37, %v112_v38  ;;  %v953_v51 = vcombine.high %v99_v43, %v103_v46  ;;  %v955_v52 = vcombine.high %v100_v47, %v104_v48 }
  0x38   :  { %966 = vmatprep.mubr.msk.bf16.mxu0 %vm614_vm0, %v1085_v44  ;;  %967 = vmatprep.mubr.msk.bf16.mxu1 %vm614_vm0, %v1085_v44  ;;  %v44_v44 = vld [vmem:[%s1350_s1 + $0xd8] sm:$0xff] }
  0x39   :  { %v899_v10 = vcombine.high %v44_v44, %v48_v6  ;;  %v898_v16 = vcombine.low %v44_v44, %v48_v6 }
  0x3a   :  { %707 = vmatpush1.bf16.msra.mxu0 %v920_v56  ;;  %750 = vmatpush1.bf16.msra.mxu1 %v922_v57  ;;  %v96_v56 = vld [vmem:[%s1350_s1 + $0x278] sm:$0xff]  ;;  %v952_v57 = vcombine.low %v99_v43, %v103_v46 }
  0x3b   :  { %708 = vmatprep.subr.bf16.mxu0 %v913_v58  ;;  %751 = vmatprep.subr.bf16.mxu1 %v915_v59  ;;  %v954_v58 = vcombine.low %v100_v47, %v104_v48  ;;  %v945_v59 = vcombine.high %v91_v53, %v95_v54  ;;  %v947_v60 = vcombine.high %v92_v55, %v96_v56 }
  0x3e   :  { %709 = vmatpush1.bf16.msra.mxu0 %v912_v0  ;;  %752 = vmatpush1.bf16.msra.mxu1 %v914_v1  ;;  %v88_v0 = vld [vmem:[%s1350_s1 + $0x238] sm:$0xff]  ;;  %v944_v1 = vcombine.low %v91_v53, %v95_v54 }
  0x3f   :  { %710 = vmatprep.subr.bf16.mxu0 %v905_v2  ;;  %753 = vmatprep.subr.bf16.mxu1 %v907_v3  ;;  %v946_v2 = vcombine.low %v92_v55, %v96_v56  ;;  %v937_v3 = vcombine.high %v83_v61, %v87_v62  ;;  %v939_v4 = vcombine.high %v84_v63, %v88_v0 }
  0x40   :  { %v938_v44 = vcombine.low %v84_v63, %v88_v0 }
  0x42   :  { %711 = vmatpush1.bf16.msra.mxu0 %v904_v7  ;;  %754 = vmatpush1.bf16.msra.mxu1 %v906_v8 }
  0x43   :  { %712 = vmatprep.subr.bf16.mxu0 %v897_v9  ;;  %755 = vmatprep.subr.bf16.mxu1 %v899_v10 }
  0x46   :  { %713 = vmatpush1.bf16.msra.mxu0 %v896_v15  ;;  %756 = vmatpush1.bf16.msra.mxu1 %v898_v16 }
  0x47   :  { %714 = vmatprep.subr.bf16.mxu0 %v889_v17  ;;  %757 = vmatprep.subr.bf16.mxu1 %v891_v18 }
  0x4a   :  { %715 = vmatpush1.bf16.msra.mxu0 %v888_v23  ;;  %758 = vmatpush1.bf16.msra.mxu1 %v890_v24 }
  0x4b   :  { %716 = vmatprep.subr.bf16.mxu0 %v881_v25  ;;  %759 = vmatprep.subr.bf16.mxu1 %v883_v26 }
  0x4e   :  { %717 = vmatpush1.bf16.msra.mxu0 %v880_v31  ;;  %760 = vmatpush1.bf16.msra.mxu1 %v882_v32 }
  0x4f   :  { %718 = vmatprep.subr.bf16.mxu0 %v873_v33  ;;  %761 = vmatprep.subr.bf16.mxu1 %v875_v34 }
  0x52   :  { %719 = vmatpush1.bf16.msra.mxu0 %v872_v39  ;;  %762 = vmatpush1.bf16.msra.mxu1 %v874_v40 }
  0x53   :  { %728 = vmatprep.subr.bf16.mxu0 %v961_v41  ;;  %771 = vmatprep.subr.bf16.mxu1 %v963_v42 }
  0x56   :  { %729 = vmatpush2.bf16.msra.mxu0 %v960_v49  ;;  %772 = vmatpush2.bf16.msra.mxu1 %v962_v50 }
  0x57   :  { %730 = vmatprep.subr.bf16.mxu0 %v953_v51  ;;  %773 = vmatprep.subr.bf16.mxu1 %v955_v52 }
  0x5a   :  { %731 = vmatpush2.bf16.msra.mxu0 %v952_v57  ;;  %774 = vmatpush2.bf16.msra.mxu1 %v954_v58 }
  0x5b   :  { %732 = vmatprep.subr.bf16.mxu0 %v945_v59  ;;  %775 = vmatprep.subr.bf16.mxu1 %v947_v60 }
  0x5e   :  { %733 = vmatpush2.bf16.msra.mxu0 %v944_v1  ;;  %776 = vmatpush2.bf16.msra.mxu1 %v946_v2 }
  0x5f   :  { %734 = vmatprep.subr.bf16.mxu0 %v937_v3  ;;  %777 = vmatprep.subr.bf16.mxu1 %v939_v4 }
  0x62   :  { %735 = vmatpush2.bf16.msra.mxu0 %v936_v5  ;;  %778 = vmatpush2.bf16.msra.mxu1 %v938_v44 }
  0x65   :  { %737 = vmatmul.mubr.bf16.vlgmr.msra.gmra.mxu0 %v1190_v45  ;;  %780 = vmatmul.mubr.bf16.vlgmr.msra.gmra.mxu1 %v1190_v45 }
  0x93   :  { %v118_v6 = vpop.permute.xlu0 %117 }
  0x97   :  { %v123_v12 = vpop.permute.xlu0 %122 }
  0xf5   :  { %v652_v7 = vpop.f32.mrf.mxu0  ;;  %v695_v9 = vpop.f32.mrf.mxu1 }
  0xf6   :  { %v653_v8 = vadd.f32 %v652_v7, %v118_v6  ;;  %v696_v10 = vadd.f32 %v695_v9, %v118_v6 }
  0xf7   :  { %v654_v11 = vpop.f32.mrf.mxu0  ;;  %v697_v15 = vpop.f32.mrf.mxu1 }
  0xf8   :  { %v790_v13 = vmax.f32 %v653_v8, 0.0  ;;  %v655_v14 = vadd.f32 %v654_v11, %v118_v6  ;;  %v792_v16 = vmax.f32 %v696_v10, 0.0  ;;  %v698_v17 = vadd.f32 %v697_v15, %v118_v6 }
  0xf9   :  { %v656_v18 = vpop.f32.mrf.mxu0  ;;  %v699_v21 = vpop.f32.mrf.mxu1 }
  0xfa   :  { %v791_v19 = vmax.f32 %v655_v14, 0.0  ;;  %v657_v20 = vadd.f32 %v656_v18, %v123_v12  ;;  %v793_v22 = vmax.f32 %v698_v17, 0.0  ;;  %v700_v23 = vadd.f32 %v699_v21, %v123_v12 }
  0xfb   :  { %v658_v24 = vpop.f32.mrf.mxu0  ;;  %v701_v26 = vpop.f32.mrf.mxu1 }
  0xfc   :  { %v976_v45 = vpack.c.bf16 %v791_v19, %v790_v13  ;;  %v659_v25 = vadd.f32 %v658_v24, %v123_v12  ;;  %v977_v27 = vpack.c.bf16 %v793_v22, %v792_v16  ;;  %v702_v28 = vadd.f32 %v701_v26, %v123_v12 }
  0xfd   :  { %v798_v29 = vmax.f32 %v657_v20, 0.0  ;;  %v800_v31 = vmax.f32 %v700_v23, 0.0 }
  0xfe   :  { %854 = vst [vmem:[%s1353_s3] sm:$0xff] %v976_v45  ;;  %v799_v30 = vmax.f32 %v659_v25, 0.0  ;;  %855 = vst [vmem:[%s1353_s3 + $0x8] sm:$0xff] %v977_v27  ;;  %v801_v32 = vmax.f32 %v702_v28, 0.0 }
 0x100   :  { %v980_v33 = vpack.c.bf16 %v799_v30, %v798_v29  ;;  %v981_v34 = vpack.c.bf16 %v801_v32, %v800_v31 }
 0x102   :  { %858 = vst [vmem:[%s1353_s3 + $0x20] sm:$0xff] %v980_v33  ;;  %859 = vst [vmem:[%s1353_s3 + $0x28] sm:$0xff] %v981_v34 }
 0x125   :  { %v738_v35 = vpop.f32.mrf.mxu0  ;;  %v781_v37 = vpop.f32.mrf.mxu1 }
 0x126   :  { %v739_v36 = vadd.f32 %v738_v35, %v118_v6  ;;  %v782_v38 = vadd.f32 %v781_v37, %v118_v6 }
 0x127   :  { %v740_v39 = vpop.f32.mrf.mxu0  ;;  %v783_v41 = vpop.f32.mrf.mxu1 }
 0x128   :  { %v741_v40 = vadd.f32 %v740_v39, %v118_v6  ;;  %v784_v42 = vadd.f32 %v783_v41, %v118_v6  ;;  %v794_v46 = vmax.f32 %v739_v36, 0.0  ;;  %v796_v50 = vmax.f32 %v782_v38, 0.0 }
 0x129   :  { %v742_v43 = vpop.f32.mrf.mxu0  ;;  %v785_v49 = vpop.f32.mrf.mxu1 }
 0x12a   :  { %v795_v47 = vmax.f32 %v741_v40, 0.0  ;;  %v743_v48 = vadd.f32 %v742_v43, %v123_v12  ;;  %v797_v51 = vmax.f32 %v784_v42, 0.0  ;;  %v786_v52 = vadd.f32 %v785_v49, %v123_v12 }
 0x12b   :  { %v744_v53 = vpop.f32.mrf.mxu0  ;;  %v787_v56 = vpop.f32.mrf.mxu1 }
 0x12c   :  { %v978_v54 = vpack.c.bf16 %v795_v47, %v794_v46  ;;  %v745_v55 = vadd.f32 %v744_v53, %v123_v12  ;;  %v979_v57 = vpack.c.bf16 %v797_v51, %v796_v50  ;;  %v788_v58 = vadd.f32 %v787_v56, %v123_v12 }
 0x12d   :  { %v802_v59 = vmax.f32 %v743_v48, 0.0  ;;  %v804_v61 = vmax.f32 %v786_v52, 0.0 }
 0x12e   :  { %856 = vst [vmem:[%s1353_s3 + $0x10] sm:$0xff] %v978_v54  ;;  %v803_v60 = vmax.f32 %v745_v55, 0.0  ;;  %857 = vst [vmem:[%s1353_s3 + $0x18] sm:$0xff] %v979_v57  ;;  %v805_v62 = vmax.f32 %v788_v58, 0.0 }
 0x130   :  { %v982_v63 = vpack.c.bf16 %v803_v60, %v802_v59  ;;  %v983_v0 = vpack.c.bf16 %v805_v62, %v804_v61 }
 0x132   :  { %860 = vst [vmem:[%s1353_s3 + $0x30] sm:$0xff] %v982_v63  ;;  %861 = vst [vmem:[%s1353_s3 + $0x38] sm:$0xff] %v983_v0 }

// kernel: a3c_stacked_lstm_forward.4
= control target key start
LH: loop header
LB: loop body
LE: loop exit
PB: predicated region body
PF: predicated region fallthrough
CT: control target
= control target key end

     0   :  { %v483_v1 = vmov 0   ;;  %vm339_vm0 = vcmask 1043456   ;;  %vm340_vm1 = vcmask 793604   ;;  %s648_s1 = inlined_call_operand.vmem [shape: bf16[256,225], index: 1, kind: input, shape index: {}]   ;;  %s649_s0 = inlined_call_operand.vmem [shape: bf16[32,256], index: 0, kind: input, shape index: {}]   ;;  %s650_s2 = inlined_call_operand.vmem [shape: f32[32,1], index: 2, kind: input, shape index: {}]   ;;  %s651_s3 = inlined_call_operand.vmem [shape: bf16[32,225], index: 3, kind: output, shape index: {}]  }
   0x1   :  { %v429_v0 = vld [vmem:[%s648_s1 + $0x74] ss:$8 sps:$4 sm:$0xff]   ;;  %428 = vset.pattern.permute.xlu1 %v483_v1  ;;  %427 = vset.pattern.permute.xlu0 %v483_v1  ;;  %v431_v2 = vld [vmem:[%s648_s1 + $0x70] ss:$8 sps:$4 sm:$0xff]   ;;  %v432_v3 = vld [vmem:[%s648_s1 + $0x64] ss:$8 sps:$4 sm:$0xff]  }
   0x2   :  { %254 = vmatprep.subr.bf16.mxu0 %v429_v0  ;;  %394 = vmatprep.subr.bf16.mxu1 %v429_v0  ;;  %v434_v4 = vld [vmem:[%s648_s1 + $0x60] ss:$8 sps:$4 sm:$0xff]   ;;  %v435_v5 = vld [vmem:[%s648_s1 + $0x54] ss:$8 sps:$4 sm:$0xff]   ;;  %v437_v6 = vld [vmem:[%s648_s1 + $0x50] ss:$8 sps:$4 sm:$0xff]  }
   0x3   :  { %255 = vmatpush1.bf16.msra.mxu0 %v431_v2  ;;  %410 = vmatpush1.bf16.msra.mxu1 %v431_v2  ;;  %v438_v7 = vld [vmem:[%s648_s1 + $0x44] ss:$8 sps:$4 sm:$0xff]   ;;  %v440_v8 = vld [vmem:[%s648_s1 + $0x40] ss:$8 sps:$4 sm:$0xff]   ;;  %v441_v9 = vld [vmem:[%s648_s1 + $0x34] ss:$8 sps:$4 sm:$0xff]  }
   0x4   :  { %256 = vmatprep.subr.bf16.mxu0 %v432_v3  ;;  %395 = vmatprep.subr.bf16.mxu1 %v432_v3  ;;  %v443_v10 = vld [vmem:[%s648_s1 + $0x30] ss:$8 sps:$4 sm:$0xff]   ;;  %v444_v11 = vld [vmem:[%s648_s1 + $0x24] ss:$8 sps:$4 sm:$0xff]   ;;  %v446_v12 = vld [vmem:[%s648_s1 + $0x20] ss:$8 sps:$4 sm:$0xff]  }
   0x5   :  { %v447_v13 = vld [vmem:[%s648_s1 + $0x14] ss:$8 sps:$4 sm:$0xff]   ;;  %v479_v14 = vld [vmem:[%s649_s0 + $0x4] ss:$8 sps:$4 sm:$0xff]   ;;  %v449_v15 = vld [vmem:[%s648_s1 + $0x10] ss:$8 sps:$4 sm:$0xff]  }
   0x6   :  { %v482_v16 = vld [vmem:[%s649_s0 + $0x14] ss:$8 sps:$4 sm:$0xff]   ;;  %v450_v17 = vld [vmem:[%s648_s1 + $0x4] ss:$8 sps:$4 sm:$0xff]   ;;  %286 = vmatprep.mubr.bf16.mxu0 %v479_v14  ;;  %v452_v20 = vld [vmem:[%s648_s1] ss:$8 sps:$4 sm:$0xff]  }
   0x7   :  { %257 = vmatpush1.bf16.msra.mxu0 %v434_v4  ;;  %411 = vmatpush1.bf16.msra.mxu1 %v434_v4  ;;  %v52_v18 = vld [vmem:[%s650_s2 + $0x10] sm:$0xff]  ;;  %v50_v19 = vld [vmem:[%s650_s2] sm:$0xff]  ;;  %v53_v21 = vld [vmem:[%s650_s2 + $0x18] sm:$0xff] }
   0x8   :  { %258 = vmatprep.subr.bf16.mxu0 %v435_v5  ;;  %396 = vmatprep.subr.bf16.mxu1 %v435_v5  ;;  %v51_v22 = vld [vmem:[%s650_s2 + $0x8] sm:$0xff]  ;;  %v453_v23 = vld [vmem:[%s648_s1 + $0xf4] ss:$8 sps:$4 sm:$0xff]   ;;  %v455_v24 = vld [vmem:[%s648_s1 + $0xf0] ss:$8 sps:$4 sm:$0xff]  }
   0x9   :  { %296 = vmatprep.mubr.bf16.mxu1 %v482_v16  ;;  %66 = vperm.xlu1 %428, %v52_v18   ;;  %v456_v25 = vld [vmem:[%s648_s1 + $0xe4] ss:$8 sps:$4 sm:$0xff]   ;;  %v458_v26 = vld [vmem:[%s648_s1 + $0xe0] ss:$8 sps:$4 sm:$0xff]   ;;  %v459_v27 = vld [vmem:[%s648_s1 + $0xd4] ss:$8 sps:$4 sm:$0xff]  }
   0xa   :  { %56 = vperm.xlu0 %427, %v50_v19   ;;  %v461_v28 = vld [vmem:[%s648_s1 + $0xd0] ss:$8 sps:$4 sm:$0xff]   ;;  %v462_v29 = vld [vmem:[%s648_s1 + $0xc4] ss:$8 sps:$4 sm:$0xff]   ;;  %v464_v30 = vld [vmem:[%s648_s1 + $0xc0] ss:$8 sps:$4 sm:$0xff]  }
   0xb   :  { %259 = vmatpush1.bf16.msra.mxu0 %v437_v6  ;;  %412 = vmatpush1.bf16.msra.mxu1 %v437_v6  ;;  %v465_v31 = vld [vmem:[%s648_s1 + $0xb4] ss:$8 sps:$4 sm:$0xff]   ;;  %v467_v32 = vld [vmem:[%s648_s1 + $0xb0] ss:$8 sps:$4 sm:$0xff]   ;;  %v468_v33 = vld [vmem:[%s648_s1 + $0xa4] ss:$8 sps:$4 sm:$0xff]  }
   0xc   :  { %260 = vmatprep.subr.bf16.mxu0 %v438_v7  ;;  %397 = vmatprep.subr.bf16.mxu1 %v438_v7  ;;  %v470_v34 = vld [vmem:[%s648_s1 + $0xa0] ss:$8 sps:$4 sm:$0xff]   ;;  %v471_v35 = vld [vmem:[%s648_s1 + $0x94] ss:$8 sps:$4 sm:$0xff]   ;;  %v473_v36 = vld [vmem:[%s648_s1 + $0x90] ss:$8 sps:$4 sm:$0xff]  }
   0xd   :  { %71 = vperm.xlu1 %428, %v53_v21   ;;  %v474_v37 = vld [vmem:[%s648_s1 + $0x84] ss:$8 sps:$4 sm:$0xff]   ;;  %v476_v38 = vld [vmem:[%s648_s1 + $0x80] ss:$8 sps:$4 sm:$0xff]   ;;  %v480_v40 = vld [vmem:[%s649_s0 + $0x10] ss:$8 sps:$4 sm:$0xff]  }
   0xe   :  { %61 = vperm.xlu0 %427, %v51_v22   ;;  %v477_v39 = vld [vmem:[%s649_s0] ss:$8 sps:$4 sm:$0xff]   ;;  %vm624_vm2 = vmor %vm340_vm1, %vm339_vm0 }
   0xf   :  { %261 = vmatpush1.bf16.msra.mxu0 %v440_v8  ;;  %413 = vmatpush1.bf16.msra.mxu1 %v440_v8 }
  0x10   :  { %262 = vmatprep.subr.bf16.mxu0 %v441_v9  ;;  %398 = vmatprep.subr.bf16.mxu1 %v441_v9 }
  0x13   :  { %263 = vmatpush1.bf16.msra.mxu0 %v443_v10  ;;  %414 = vmatpush1.bf16.msra.mxu1 %v443_v10 }
  0x14   :  { %264 = vmatprep.subr.bf16.mxu0 %v444_v11  ;;  %399 = vmatprep.subr.bf16.mxu1 %v444_v11 }
  0x17   :  { %265 = vmatpush1.bf16.msra.mxu0 %v446_v12  ;;  %415 = vmatpush1.bf16.msra.mxu1 %v446_v12 }
  0x18   :  { %266 = vmatprep.subr.bf16.mxu0 %v447_v13  ;;  %400 = vmatprep.subr.bf16.mxu1 %v447_v13 }
  0x1b   :  { %267 = vmatpush1.bf16.msra.mxu0 %v449_v15  ;;  %416 = vmatpush1.bf16.msra.mxu1 %v449_v15 }
  0x1c   :  { %268 = vmatprep.subr.bf16.mxu0 %v450_v17  ;;  %401 = vmatprep.subr.bf16.mxu1 %v450_v17 }
  0x1f   :  { %269 = vmatpush1.bf16.msra.mxu0 %v452_v20  ;;  %417 = vmatpush1.bf16.msra.mxu1 %v452_v20 }
  0x20   :  { %270 = vmatprep.subr.bf16.mxu0 %v453_v23  ;;  %402 = vmatprep.subr.bf16.mxu1 %v453_v23 }
  0x23   :  { %271 = vmatpush2.bf16.msra.mxu0 %v455_v24  ;;  %418 = vmatpush2.bf16.msra.mxu1 %v455_v24 }
  0x24   :  { %272 = vmatprep.subr.bf16.mxu0 %v456_v25  ;;  %403 = vmatprep.subr.bf16.mxu1 %v456_v25 }
  0x27   :  { %273 = vmatpush2.bf16.msra.mxu0 %v458_v26  ;;  %419 = vmatpush2.bf16.msra.mxu1 %v458_v26 }
  0x28   :  { %274 = vmatprep.subr.bf16.mxu0 %v459_v27  ;;  %404 = vmatprep.subr.bf16.mxu1 %v459_v27 }
  0x2b   :  { %275 = vmatpush2.bf16.msra.mxu0 %v461_v28  ;;  %420 = vmatpush2.bf16.msra.mxu1 %v461_v28 }
  0x2c   :  { %276 = vmatprep.subr.bf16.mxu0 %v462_v29  ;;  %405 = vmatprep.subr.bf16.mxu1 %v462_v29 }
  0x2f   :  { %277 = vmatpush2.bf16.msra.mxu0 %v464_v30  ;;  %421 = vmatpush2.bf16.msra.mxu1 %v464_v30 }
  0x30   :  { %278 = vmatprep.subr.bf16.mxu0 %v465_v31  ;;  %406 = vmatprep.subr.bf16.mxu1 %v465_v31 }
  0x33   :  { %279 = vmatpush2.bf16.msra.mxu0 %v467_v32  ;;  %422 = vmatpush2.bf16.msra.mxu1 %v467_v32 }
  0x34   :  { %280 = vmatprep.subr.bf16.mxu0 %v468_v33  ;;  %407 = vmatprep.subr.bf16.mxu1 %v468_v33 }
  0x37   :  { %281 = vmatpush2.bf16.msra.mxu0 %v470_v34  ;;  %423 = vmatpush2.bf16.msra.mxu1 %v470_v34 }
  0x38   :  { %282 = vmatprep.subr.bf16.mxu0 %v471_v35  ;;  %408 = vmatprep.subr.bf16.mxu1 %v471_v35 }
  0x3b   :  { %283 = vmatpush2.bf16.msra.mxu0 %v473_v36  ;;  %424 = vmatpush2.bf16.msra.mxu1 %v473_v36 }
  0x3c   :  { %284 = vmatprep.subr.bf16.mxu0 %v474_v37  ;;  %409 = vmatprep.subr.bf16.mxu1 %v474_v37 }
  0x3f   :  { %285 = vmatpush2.bf16.msra.mxu0 %v476_v38  ;;  %425 = vmatpush2.bf16.msra.mxu1 %v476_v38 }
  0x42   :  { %287 = vmatmul.mubr.bf16.vlgmr.msra.gmra.mxu0 %v477_v39  ;;  %297 = vmatmul.mubr.bf16.vlgmr.msra.gmra.mxu1 %v480_v40 }
  0x84   :  { %v67_v41 = vpop.permute.xlu1 %66 }
  0x85   :  { %v57_v42 = vpop.permute.xlu0 %56 }
  0x88   :  { %v72_v55 = vpop.permute.xlu1 %71 }
  0x89   :  { %v62_v56 = vpop.permute.xlu0 %61 }
 0x102   :  { %v288_v43 = vpop.f32.mrf.mxu0  ;;  %v298_v44 = vpop.f32.mrf.mxu1 }
 0x103   :  { %v289_v45 = vadd.f32 %v288_v43, %v57_v42  ;;  %v299_v46 = vadd.f32 %v298_v44, %v67_v41 }
 0x104   :  { %v290_v47 = vpop.f32.mrf.mxu0  ;;  %v300_v48 = vpop.f32.mrf.mxu1 }
 0x105   :  { %v291_v49 = vadd.f32 %v290_v47, %v57_v42  ;;  %v301_v50 = vadd.f32 %v300_v48, %v67_v41  ;;  %v307_v53 = vmax.f32 %v289_v45, 0.0  ;;  %v311_v54 = vmax.f32 %v299_v46, 0.0 }
 0x106   :  { %v292_v51 = vpop.f32.mrf.mxu0  ;;  %v302_v52 = vpop.f32.mrf.mxu1 }
 0x107   :  { %v308_v57 = vmax.f32 %v291_v49, 0.0  ;;  %v312_v58 = vmax.f32 %v301_v50, 0.0  ;;  %v293_v60 = vadd.f32 %v292_v51, %v62_v56  ;;  %v303_v61 = vadd.f32 %v302_v52, %v72_v55 }
 0x108   :  { %v294_v62 = vpop.f32.mrf.mxu0  ;;  %v304_v63 = vpop.f32.mrf.mxu1 }
 0x109   :  { %v390_v0 = vpack.c.bf16 %v308_v57, %v307_v53  ;;  %v392_v1 = vpack.c.bf16 %v312_v58, %v311_v54  ;;  %v295_v2 = vadd.f32 %v294_v62, %v62_v56  ;;  %v305_v3 = vadd.f32 %v304_v63, %v72_v55 }
 0x10a   :  { %v309_v4 = vmax.f32 %v293_v60, 0.0  ;;  %v313_v5 = vmax.f32 %v303_v61, 0.0 }
 0x10b   :  { %342 = vst.msk [vmem:[%s651_s3] sm:$0xff] %vm624_vm2, %v390_v0  ;;  %344 = vst.msk [vmem:[%s651_s3 + $0x10] sm:$0xff] %vm624_vm2, %v392_v1  ;;  %v310_v6 = vmax.f32 %v295_v2, 0.0  ;;  %v314_v7 = vmax.f32 %v305_v3, 0.0 }
 0x10d   :  { %v391_v8 = vpack.c.bf16 %v310_v6, %v309_v4  ;;  %v393_v9 = vpack.c.bf16 %v314_v7, %v313_v5 }
 0x10f   :  { %343 = vst.msk [vmem:[%s651_s3 + $0x8] sm:$0xff] %vm624_vm2, %v391_v8  ;;  %345 = vst.msk [vmem:[%s651_s3 + $0x18] sm:$0xff] %vm624_vm2, %v393_v9 }

// kernel: a3c_stacked_lstm_forward.5
= control target key start
LH: loop header
LB: loop body
LE: loop exit
PB: predicated region body
PF: predicated region fallthrough
CT: control target
= control target key end

     0   :  { %s6870_s0 = inlined_call_operand.vmem [shape: bf16[1,7680], index: 0, kind: input, shape index: {}]   ;;  %s6871_s1 = inlined_call_operand.vmem [shape: bf16[7680,256], index: 1, kind: input, shape index: {}]   ;;  %s6872_s2 = inlined_call_operand.vmem [shape: f32[1,256], index: 2, kind: input, shape index: {}]   ;;  %s6873_s3 = inlined_call_operand.<no memory space> [shape: f32[1,1], index: 3, kind: input, shape index: {}]   ;;  %s6874_s4 = inlined_call_operand.vmem [shape: f32[1,4], index: 4, kind: input, shape index: {}]   ;;  %s6875_s5 = inlined_call_operand.vmem [shape: f32[1,32], index: 5, kind: input, shape index: {}, may-alias: {5,6}]   ;;  %s6876_s6 = inlined_call_operand.vmem [shape: f32[1,32], index: 6, kind: input, shape index: {}, may-alias: {5,6}]   ;;  %s6877_s7 = inlined_call_operand.vmem [shape: f32[1,128], index: 7, kind: input, shape index: {}, may-alias: {7,8}]   ;;  %s6878_s8 = inlined_call_operand.vmem [shape: f32[1,128], index: 8, kind: input, shape index: {}, may-alias: {7,8}]   ;;  %s6879_s9 = inlined_call_operand.vmem [shape: bf16[256,128], index: 9, kind: input, shape index: {}]   ;;  %s6880_s10 = inlined_call_operand.vmem [shape: f32[1,128], index: 10, kind: input, shape index: {}]   ;;  %s6881_s11 = inlined_call_operand.vmem [shape: bf16[32,128], index: 11, kind: input, shape index: {}]   ;;  %s6882_s12 = inlined_call_operand.vmem [shape: f32[1,128], index: 12, kind: input, shape index: {}]   ;;  %s6883_s13 = inlined_call_operand.vmem [shape: bf16[256,512], index: 13, kind: input, shape index: {}]   ;;  %s6884_s14 = inlined_call_operand.vmem [shape: bf16[32,512], index: 14, kind: input, shape index: {}]   ;;  %s6885_s15 = inlined_call_operand.vmem [shape: bf16[4,512], index: 15, kind: input, shape index: {}]   ;;  %s6886_s16 = inlined_call_operand.vmem [shape: bf16[128,512], index: 16, kind: input, shape index: {}]   ;;  %s6887_s17 = inlined_call_operand.vmem [shape: f32[1,512], index: 17, kind: input, shape index: {}]   ;;  %s6888_s18 = inlined_call_operand.vmem [shape: bf16[128,4], index: 18, kind: input, shape index: {}]   ;;  %s6889_s19 = inlined_call_operand.vmem [shape: f32[1,4], index: 19, kind: input, shape index: {}]   ;;  %s6890_s20 = inlined_call_operand.vmem [shape: bf16[128,1], index: 20, kind: input, shape index: {}]   ;;  %s6891_s22 = inlined_call_operand.hbm [shape: f32[1,4], index: 22, kind: output, shape index: {0}]   ;;  %s6892_s23 = inlined_call_operand.hbm [shape: f32[1,1], index: 23, kind: output, shape index: {1}]   ;;  %s6893_s24 = inlined_call_operand.hbm [shape: f32[1,32], index: 24, kind: output, shape index: {2}]   ;;  %s6894_s25 = inlined_call_operand.hbm [shape: f32[1,32], index: 25, kind: output, shape index: {3}]   ;;  %s6895_s26 = inlined_call_operand.hbm [shape: f32[1,128], index: 26, kind: output, shape index: {4}]   ;;  %s6896_s27 = inlined_call_operand.hbm [shape: f32[1,128], index: 27, kind: output, shape index: {5}]   ;;  %s6897_s21 = inlined_call_operand.<no memory space> [shape: f32[1,1], index: 21, kind: input, shape index: {}]  }
   0x1   :  { %6900 = sst [smem:[#allocation19_spill]] %s6870_s0  ;;  %v35_v1 = vstv %s6897_s21 }
   0x2   :  { %6901 = sst [smem:[#allocation20_spill]] %s6871_s1  ;;  %36 = vst [vmem:[#allocation4] sm:$0x1] %v35_v1 }
   0x3   :  { %6902 = sst [smem:[#allocation21_spill]] %s6872_s2 }
   0x4   :  { %6903 = sst [smem:[#allocation22_spill]] %s6873_s3 }
   0x5   :  { %6904 = sst [smem:[#allocation23_spill]] %s6874_s4 }
   0x6   :  { %6905 = sst [smem:[#allocation24_spill]] %s6875_s5 }
   0x7   :  { %6906 = sst [smem:[#allocation25_spill]] %s6876_s6 }
   0x8   :  { %6907 = sst [smem:[#allocation26_spill]] %s6877_s7 }
   0x9   :  { %6908 = sst [smem:[#allocation27_spill]] %s6878_s8 }
   0xa   :  { %6909 = sst [smem:[#allocation28_spill]] %s6879_s9 }
   0xb   :  { %6910 = sst [smem:[#allocation29_spill]] %s6880_s10 }
   0xc   :  { %6911 = sst [smem:[#allocation30_spill]] %s6881_s11 }
   0xd   :  { %s6912_s8 = sld [smem:[#allocation22_spill]] }
  0x13   :  { %v33_v0 = vstv %s6912_s8 }
  0x14   :  { %34 = vst [vmem:[#allocation3] sm:$0x1] %v33_v0 }
  0x15   :  { %37 = vsyncpa [#allocation6], 0 }
  0x16   :  { %38 = vsyncpa [#allocation8], 0 }
  0x17   :  { %39 = vsyncpa [#allocation11], 0 }
  0x18   :  { %40 = vsyncpa [#allocation14], 0  ;;  %s5961_s5 = smov 0  }
  0x19 LB: > { %s5967_s28 = sadd.s32 4294967295, %s5797_s5   ;;  %p4492_p0 = scmp.ge.s32.totalorder %s5797_s5, 1  ;;  %s5797_s5 = sphi %s5961_s5, %s46_s5  }
  0x1a   : > { %p738_p1 = scmp.lt.s32.totalorder %s5797_s5, 5 }
  0x1c   : > { %p739_p2 = pnand %p4492_p0, %p738_p1 }
  0x1d   : > { %s810_s21 = smul.u32 (!%p739_p2), 15, %s5967_s28  ;;  %s6913_s1 = sld [smem:[#allocation19_spill]] (!%p739_p2) }
  0x1e   : > { %742 = sbr.rel (%p739_p2) target bundleno = 1877 (0x755), region = 108  ;;  %s6914_s7 = sld [smem:[#allocation20_spill]] (!%p739_p2) }
  0x1f   : > { %s815_s0 = smul.u32 (!%p739_p2), 240, %s5967_s28  ;;  %p811_p3 = scmp.lt.s32.totalorder (!%p739_p2), %s810_s21, 59 }
  0x20   : > { %p4495_p5 = scmp.ne.s32.totalorder (!%p739_p2), %s5967_s28, 0 }
  0x21   : > { %p816_p4 = scmp.lt.s32.totalorder (!%p739_p2), %s815_s0, 959 }
  0x23   : > { %s6925_s21 = smov (!%p811_p3, %s810_s21), 59  ;;  %s6927_s0 = smov (!%p816_p4, %s815_s0), 959 }
  0x24   : > { %s5976_s6 = scalar_lea.vmem %s6913_s1, %s6925_s21  ;;  %s4901_s11 = sshll.u32 %s6927_s0, 3 }
  0x25   : > { %s5981_s4 = scalar_lea.vmem %s6914_s7, %s4901_s11  ;;  %826 = sbr.rel (%p4495_p5) target bundleno = 46 (0x2e), region = 112 }
  0x2a   : > { %v827_v2 = vlaneseq  ;;  %v5799_v3 = vmov 0.0  }
  0x2c   : > { %vm829_vm0 = vcmp.lt.s32.totalorder %v827_v2, 256 }
  0x2d   : > { %831 = vst.msk [vmem:[#allocation2] sm:$0x3] %vm829_vm0, %v5799_v3 }
  0x2e PF: > { %v5053_v4 = vld [vmem:[%s5981_s4 + $0x74] ss:$8 sps:$4 sm:$0xff]   ;;  %v5057_v6 = vld [vmem:[%s5981_s4 + $0x70] ss:$8 sps:$4 sm:$0xff]   ;;  %v5059_v8 = vld [vmem:[%s5981_s4 + $0x64] ss:$8 sps:$4 sm:$0xff]   ;;  %v1081_v42 = vlaneseq }
  0x2f   : > { %v5055_v5 = vld [vmem:[%s5981_s4 + $0x174] ss:$8 sps:$4 sm:$0xff]   ;;  %2389 = vmatprep.subr.bf16.mxu0 %v5053_v4  ;;  %v5058_v7 = vld [vmem:[%s5981_s4 + $0x170] ss:$8 sps:$4 sm:$0xff]   ;;  %v5061_v9 = vld [vmem:[%s5981_s4 + $0x164] ss:$8 sps:$4 sm:$0xff]  }
  0x30   : > { %2430 = vmatprep.subr.bf16.mxu1 %v5055_v5  ;;  %2390 = vmatpush1.bf16.msra.mxu0 %v5057_v6  ;;  %v5063_v10 = vld [vmem:[%s5981_s4 + $0x60] ss:$8 sps:$4 sm:$0xff]   ;;  %v5065_v12 = vld [vmem:[%s5981_s4 + $0x54] ss:$8 sps:$4 sm:$0xff]   ;;  %v5069_v14 = vld [vmem:[%s5981_s4 + $0x50] ss:$8 sps:$4 sm:$0xff]  }
  0x31   : > { %2431 = vmatpush1.bf16.msra.mxu1 %v5058_v7  ;;  %2391 = vmatprep.subr.bf16.mxu0 %v5059_v8  ;;  %v5064_v11 = vld [vmem:[%s5981_s4 + $0x160] ss:$8 sps:$4 sm:$0xff]   ;;  %v5067_v13 = vld [vmem:[%s5981_s4 + $0x154] ss:$8 sps:$4 sm:$0xff]   ;;  %v5070_v15 = vld [vmem:[%s5981_s4 + $0x150] ss:$8 sps:$4 sm:$0xff]  }
  0x32   : > { %2432 = vmatprep.subr.bf16.mxu1 %v5061_v9  ;;  %v5071_v16 = vld [vmem:[%s5981_s4 + $0x44] ss:$8 sps:$4 sm:$0xff]   ;;  %v5075_v18 = vld [vmem:[%s5981_s4 + $0x40] ss:$8 sps:$4 sm:$0xff]   ;;  %v5077_v20 = vld [vmem:[%s5981_s4 + $0x34] ss:$8 sps:$4 sm:$0xff]  }
  0x33   : > { %v5073_v17 = vld [vmem:[%s5981_s4 + $0x144] ss:$8 sps:$4 sm:$0xff]   ;;  %v5076_v19 = vld [vmem:[%s5981_s4 + $0x140] ss:$8 sps:$4 sm:$0xff]   ;;  %v5079_v21 = vld [vmem:[%s5981_s4 + $0x134] ss:$8 sps:$4 sm:$0xff]  }
  0x34   : > { %2392 = vmatpush1.bf16.msra.mxu0 %v5063_v10  ;;  %v5081_v22 = vld [vmem:[%s5981_s4 + $0x30] ss:$8 sps:$4 sm:$0xff]   ;;  %v5083_v24 = vld [vmem:[%s5981_s4 + $0x24] ss:$8 sps:$4 sm:$0xff]   ;;  %v5087_v26 = vld [vmem:[%s5981_s4 + $0x20] ss:$8 sps:$4 sm:$0xff]  }
  0x35   : > { %2433 = vmatpush1.bf16.msra.mxu1 %v5064_v11  ;;  %2393 = vmatprep.subr.bf16.mxu0 %v5065_v12  ;;  %v5082_v23 = vld [vmem:[%s5981_s4 + $0x130] ss:$8 sps:$4 sm:$0xff]   ;;  %v5085_v25 = vld [vmem:[%s5981_s4 + $0x124] ss:$8 sps:$4 sm:$0xff]   ;;  %v5088_v27 = vld [vmem:[%s5981_s4 + $0x120] ss:$8 sps:$4 sm:$0xff]  }
  0x36   : > { %2434 = vmatprep.subr.bf16.mxu1 %v5067_v13  ;;  %v5089_v28 = vld [vmem:[%s5981_s4 + $0x14] ss:$8 sps:$4 sm:$0xff]   ;;  %v5093_v30 = vld [vmem:[%s5981_s4 + $0x10] ss:$8 sps:$4 sm:$0xff]   ;;  %v5095_v32 = vld [vmem:[%s5981_s4 + $0x4] ss:$8 sps:$4 sm:$0xff]  }
  0x37   : > { %v5091_v29 = vld [vmem:[%s5981_s4 + $0x114] ss:$8 sps:$4 sm:$0xff]   ;;  %v5094_v31 = vld [vmem:[%s5981_s4 + $0x110] ss:$8 sps:$4 sm:$0xff]   ;;  %v5097_v33 = vld [vmem:[%s5981_s4 + $0x104] ss:$8 sps:$4 sm:$0xff]  }
  0x38   : > { %2394 = vmatpush1.bf16.msra.mxu0 %v5069_v14  ;;  %v5099_v34 = vld [vmem:[%s5981_s4] ss:$8 sps:$4 sm:$0xff]   ;;  %v5101_v36 = vld [vmem:[%s5981_s4 + $0xf4] ss:$8 sps:$4 sm:$0xff]   ;;  %v5105_v38 = vld [vmem:[%s5981_s4 + $0xf0] ss:$8 sps:$4 sm:$0xff]  }
  0x39   : > { %2435 = vmatpush1.bf16.msra.mxu1 %v5070_v15  ;;  %2395 = vmatprep.subr.bf16.mxu0 %v5071_v16  ;;  %v5100_v35 = vld [vmem:[%s5981_s4 + $0x100] ss:$8 sps:$4 sm:$0xff]   ;;  %v5103_v37 = vld [vmem:[%s5981_s4 + $0x1f4] ss:$8 sps:$4 sm:$0xff]   ;;  %v5106_v39 = vld [vmem:[%s5981_s4 + $0x1f0] ss:$8 sps:$4 sm:$0xff]  }
  0x3a   : > { %2436 = vmatprep.subr.bf16.mxu1 %v5073_v17  ;;  %v5800_v40 = vmov 1966171168   ;;  %v5107_v43 = vld [vmem:[%s5981_s4 + $0xe4] ss:$8 sps:$4 sm:$0xff]   ;;  %v5111_v45 = vld [vmem:[%s5981_s4 + $0xe0] ss:$8 sps:$4 sm:$0xff]  }
  0x3b   : > { %v1079_v41 = vunpack.c.l.s4 %v5800_v40  ;;  %v5109_v44 = vld [vmem:[%s5981_s4 + $0x1e4] ss:$8 sps:$4 sm:$0xff]   ;;  %v6024_v47 = vshrl.u32 %v1081_v42, 7  ;;  %v5112_v48 = vld [vmem:[%s5981_s4 + $0x1e0] ss:$8 sps:$4 sm:$0xff]   ;;  %vm2738_vm1 = vcmp.lt.s32.totalorder %v1081_v42, 256 }
  0x3c   : > { %2396 = vmatpush1.bf16.msra.mxu0 %v5075_v18  ;;  %v5113_v49 = vld [vmem:[%s5981_s4 + $0xd4] ss:$8 sps:$4 sm:$0xff]   ;;  %v5117_v51 = vld [vmem:[%s5981_s4 + $0xd0] ss:$8 sps:$4 sm:$0xff]   ;;  %v5119_v54 = vld [vmem:[%s5981_s4 + $0xc4] ss:$8 sps:$4 sm:$0xff]  }
  0x3d   : > { %2437 = vmatpush1.bf16.msra.mxu1 %v5076_v19  ;;  %2397 = vmatprep.subr.bf16.mxu0 %v5077_v20  ;;  %v1080_v46 = vunpack.c.0.s8 %v1079_v41  ;;  %v5115_v50 = vld [vmem:[%s5981_s4 + $0x1d4] ss:$8 sps:$4 sm:$0xff]   ;;  %v5118_v52 = vld [vmem:[%s5981_s4 + $0x1d0] ss:$8 sps:$4 sm:$0xff]   ;;  %v5121_v55 = vld [vmem:[%s5981_s4 + $0x1c4] ss:$8 sps:$4 sm:$0xff]  }
  0x3e   : > { %2438 = vmatprep.subr.bf16.mxu1 %v5079_v21  ;;  %v833_v56 = vld [vmem:[%s5976_s6] sm:$0xff]  ;;  %v5125_v60 = vld [vmem:[%s5981_s4 + $0xb4] ss:$8 sps:$4 sm:$0xff]   ;;  %v5129_v63 = vld [vmem:[%s5981_s4 + $0xb0] ss:$8 sps:$4 sm:$0xff]   ;;  %p4736_p6 = scmp.ne.s32.totalorder %s5967_s28, 3 }
  0x3f   : > { %v6032_v53 = vsub.s32 %v1080_v46, %v6024_v47  ;;  %v5123_v57 = vld [vmem:[%s5981_s4 + $0xc0] ss:$8 sps:$4 sm:$0xff]   ;;  %v5127_v61 = vld [vmem:[%s5981_s4 + $0x1b4] ss:$8 sps:$4 sm:$0xff]   ;;  %v5130_v1 = vld [vmem:[%s5981_s4 + $0x1b0] ss:$8 sps:$4 sm:$0xff]   ;;  %v1077_v5 = vcombine.high %v833_v56, %v833_v56 }
  0x40   : > { %2398 = vmatpush1.bf16.msra.mxu0 %v5081_v22  ;;  %v5124_v59 = vld [vmem:[%s5981_s4 + $0x1c0] ss:$8 sps:$4 sm:$0xff]   ;;  %v5131_v2 = vld [vmem:[%s5981_s4 + $0xa4] ss:$8 sps:$4 sm:$0xff]   ;;  %v5137_v8 = vld [vmem:[%s5981_s4 + $0x94] ss:$8 sps:$4 sm:$0xff]  }
  0x41   : > { %2439 = vmatpush1.bf16.msra.mxu1 %v5082_v23  ;;  %2399 = vmatprep.subr.bf16.mxu0 %v5083_v24  ;;  %v1084_v58 = vrot.slane %v833_v56, %v6032_v53  ;;  %v5133_v3 = vld [vmem:[%s5981_s4 + $0x1a4] ss:$8 sps:$4 sm:$0xff]   ;;  %v5135_v6 = vld [vmem:[%s5981_s4 + $0xa0] ss:$8 sps:$4 sm:$0xff]   ;;  %v5139_v9 = vld [vmem:[%s5981_s4 + $0x194] ss:$8 sps:$4 sm:$0xff]   ;;  %v6052_v10 = vrot.slane %v1077_v5, %v6032_v53 }
  0x42   : > { %2440 = vmatprep.subr.bf16.mxu1 %v5085_v25  ;;  %v5136_v7 = vld [vmem:[%s5981_s4 + $0x1a0] ss:$8 sps:$4 sm:$0xff]   ;;  %v5141_v11 = vld [vmem:[%s5981_s4 + $0x90] ss:$8 sps:$4 sm:$0xff]   ;;  %v5143_v13 = vld [vmem:[%s5981_s4 + $0x84] ss:$8 sps:$4 sm:$0xff]  }
  0x43   : > { %v1092_v62 = vcombine.high %v1084_v58, %v1084_v58  ;;  %v5142_v12 = vld [vmem:[%s5981_s4 + $0x190] ss:$8 sps:$4 sm:$0xff]   ;;  %v5145_v14 = vld [vmem:[%s5981_s4 + $0x184] ss:$8 sps:$4 sm:$0xff]   ;;  %v1093_v15 = vcombine.high %v6052_v10, %v6052_v10  ;;  %v5147_v16 = vld [vmem:[%s5981_s4 + $0x80] ss:$8 sps:$4 sm:$0xff]   ;;  %v1100_v17 = vrot.slane %v1084_v58, %v6032_v53 }
  0x44   : > { %2400 = vmatpush1.bf16.msra.mxu0 %v5087_v26  ;;  %v5148_v18 = vld [vmem:[%s5981_s4 + $0x180] ss:$8 sps:$4 sm:$0xff]   ;;  %v5152_v19 = vld [vmem:[%s5981_s4 + $0x274] ss:$8 sps:$4 sm:$0xff]   ;;  %v5150_v23 = vld [vmem:[%s5981_s4 + $0x270] ss:$8 sps:$4 sm:$0xff]  }
  0x45   : > { %2441 = vmatpush1.bf16.msra.mxu1 %v5088_v27  ;;  %2401 = vmatprep.subr.bf16.mxu0 %v5089_v28  ;;  %v1114_v0 = vrot.slane %v1092_v62, %v6032_v53  ;;  %v5155_v20 = vld [vmem:[%s5981_s4 + $0x374] ss:$8 sps:$4 sm:$0xff]   ;;  %v1121_v21 = vrot.slane %v1093_v15, %v6032_v53  ;;  %v1122_v22 = vcombine.high %v1100_v17, %v1100_v17  ;;  %v5153_v24 = vld [vmem:[%s5981_s4 + $0x370] ss:$8 sps:$4 sm:$0xff]   ;;  %v5158_v25 = vld [vmem:[%s5981_s4 + $0x264] ss:$8 sps:$4 sm:$0xff]  }
  0x46   : > { %2442 = vmatprep.subr.bf16.mxu1 %v5091_v29  ;;  %v5161_v26 = vld [vmem:[%s5981_s4 + $0x364] ss:$8 sps:$4 sm:$0xff]   ;;  %v5156_v28 = vld [vmem:[%s5981_s4 + $0x260] ss:$8 sps:$4 sm:$0xff]   ;;  %v5174_v40 = vld [vmem:[%s5981_s4 + $0x230] ss:$8 sps:$4 sm:$0xff]  }
  0x47   : > { %v1124_v4 = vcombine.high %v1114_v0, %v1114_v0  ;;  %2421 = vmatprep.mubr.bf16.mxu0 %v1114_v0  ;;  %v1125_v27 = vcombine.high %v1121_v21, %v1121_v21  ;;  %v5159_v29 = vld [vmem:[%s5981_s4 + $0x360] ss:$8 sps:$4 sm:$0xff]   ;;  %v5177_v41 = vld [vmem:[%s5981_s4 + $0x330] ss:$8 sps:$4 sm:$0xff]   ;;  %v5203_v58 = vld [vmem:[%s5981_s4 + $0x3f4] ss:$8 sps:$4 sm:$0xff]  }
  0x48   : > { %2402 = vmatpush1.bf16.msra.mxu0 %v5093_v30  ;;  %v5164_v30 = vld [vmem:[%s5981_s4 + $0x254] ss:$8 sps:$4 sm:$0xff]   ;;  %v5183_v46 = vld [vmem:[%s5981_s4 + $0x320] ss:$8 sps:$4 sm:$0xff]   ;;  %v5209_v62 = vld [vmem:[%s5981_s4 + $0x3e4] ss:$8 sps:$4 sm:$0xff]  }
  0x49   : > { %2443 = vmatpush1.bf16.msra.mxu1 %v5094_v31  ;;  %2403 = vmatprep.subr.bf16.mxu0 %v5095_v32  ;;  %v5167_v31 = vld [vmem:[%s5981_s4 + $0x354] ss:$8 sps:$4 sm:$0xff]   ;;  %v5162_v32 = vld [vmem:[%s5981_s4 + $0x250] ss:$8 sps:$4 sm:$0xff]   ;;  %v5195_v56 = vld [vmem:[%s5981_s4 + $0x300] ss:$8 sps:$4 sm:$0xff]  }
  0x4a   : > { %2444 = vmatprep.subr.bf16.mxu1 %v5097_v33  ;;  %2462 = vmatprep.mubr.bf16.mxu1 %v1124_v4  ;;  %v5165_v33 = vld [vmem:[%s5981_s4 + $0x350] ss:$8 sps:$4 sm:$0xff]   ;;  %v5207_v0 = vld [vmem:[%s5981_s4 + $0x3e0] ss:$8 sps:$4 sm:$0xff]   ;;  %v5218_v5 = vld [vmem:[%s5981_s4 + $0x2c4] ss:$8 sps:$4 sm:$0xff]  }
  0x4b   : > { %v5213_v4 = vld [vmem:[%s5981_s4 + $0x3d0] ss:$8 sps:$4 sm:$0xff]   ;;  %v5233_v15 = vld [vmem:[%s5981_s4 + $0x3a4] ss:$8 sps:$4 sm:$0xff]   ;;  %s6915_s9 = sld [smem:[#allocation28_spill]] (!%p4736_p6)  ;;  %s5805_s10 = smov (!%p4736_p6), 32  }
  0x4c   : > { %2404 = vmatpush1.bf16.msra.mxu0 %v5099_v34  ;;  %v5170_v34 = vld [vmem:[%s5981_s4 + $0x244] ss:$8 sps:$4 sm:$0xff]   ;;  %s6917_s11 = sld [smem:[#allocation24_spill]] (!%p4736_p6)  ;;  %s5806_s21 = smov (!%p4736_p6), 64  }
  0x4d   : > { %2445 = vmatpush1.bf16.msra.mxu1 %v5100_v35  ;;  %2405 = vmatprep.subr.bf16.mxu0 %v5101_v36  ;;  %v5173_v35 = vld [vmem:[%s5981_s4 + $0x344] ss:$8 sps:$4 sm:$0xff]   ;;  %v5168_v36 = vld [vmem:[%s5981_s4 + $0x240] ss:$8 sps:$4 sm:$0xff]   ;;  %s6918_s7 = sld [smem:[#allocation21_spill]] (!%p4736_p6) }
  0x4e   : > { %2446 = vmatprep.subr.bf16.mxu1 %v5103_v37  ;;  %v5171_v37 = vld [vmem:[%s5981_s4 + $0x340] ss:$8 sps:$4 sm:$0xff]   ;;  %s6919_s30 = sld [smem:[#allocation25_spill]] (!%p4736_p6) }
  0x4f   : > { %s6921_s8 = sld [smem:[#allocation26_spill]] (!%p4736_p6) }
  0x50   : > { %2406 = vmatpush2.bf16.msra.mxu0 %v5105_v38  ;;  %v5176_v38 = vld [vmem:[%s5981_s4 + $0x234] ss:$8 sps:$4 sm:$0xff]   ;;  %s6922_s0 = sld [smem:[#allocation23_spill]] (!%p4736_p6) }
  0x51   : > { %2447 = vmatpush2.bf16.msra.mxu1 %v5106_v39  ;;  %2407 = vmatprep.subr.bf16.mxu0 %v5107_v43  ;;  %v5179_v39 = vld [vmem:[%s5981_s4 + $0x334] ss:$8 sps:$4 sm:$0xff]   ;;  %v5182_v43 = vld [vmem:[%s5981_s4 + $0x224] ss:$8 sps:$4 sm:$0xff]  }
  0x52   : > { %2448 = vmatprep.subr.bf16.mxu1 %v5109_v44  ;;  %v5185_v44 = vld [vmem:[%s5981_s4 + $0x324] ss:$8 sps:$4 sm:$0xff]  }
  0x54   : > { %2408 = vmatpush2.bf16.msra.mxu0 %v5111_v45  ;;  %v5180_v45 = vld [vmem:[%s5981_s4 + $0x220] ss:$8 sps:$4 sm:$0xff]  }
  0x55   : > { %2449 = vmatpush2.bf16.msra.mxu1 %v5112_v48  ;;  %2409 = vmatprep.subr.bf16.mxu0 %v5113_v49  ;;  %v5188_v48 = vld [vmem:[%s5981_s4 + $0x214] ss:$8 sps:$4 sm:$0xff]  }
  0x56   : > { %2450 = vmatprep.subr.bf16.mxu1 %v5115_v50  ;;  %v5191_v49 = vld [vmem:[%s5981_s4 + $0x314] ss:$8 sps:$4 sm:$0xff]   ;;  %v5186_v50 = vld [vmem:[%s5981_s4 + $0x210] ss:$8 sps:$4 sm:$0xff]  }
  0x58   : > { %2410 = vmatpush2.bf16.msra.mxu0 %v5117_v51  ;;  %v5189_v51 = vld [vmem:[%s5981_s4 + $0x310] ss:$8 sps:$4 sm:$0xff]  }
  0x59   : > { %2451 = vmatpush2.bf16.msra.mxu1 %v5118_v52  ;;  %2411 = vmatprep.subr.bf16.mxu0 %v5119_v54  ;;  %v5194_v52 = vld [vmem:[%s5981_s4 + $0x204] ss:$8 sps:$4 sm:$0xff]  }
  0x5a   : > { %2452 = vmatprep.subr.bf16.mxu1 %v5121_v55  ;;  %v5197_v54 = vld [vmem:[%s5981_s4 + $0x304] ss:$8 sps:$4 sm:$0xff]   ;;  %v5192_v55 = vld [vmem:[%s5981_s4 + $0x200] ss:$8 sps:$4 sm:$0xff]  }
  0x5c   : > { %2412 = vmatpush2.bf16.msra.mxu0 %v5123_v57  ;;  %v5200_v57 = vld [vmem:[%s5981_s4 + $0x2f4] ss:$8 sps:$4 sm:$0xff]  }
  0x5d   : > { %2453 = vmatpush2.bf16.msra.mxu1 %v5124_v59  ;;  %2413 = vmatprep.subr.bf16.mxu0 %v5125_v60  ;;  %v5198_v59 = vld [vmem:[%s5981_s4 + $0x2f0] ss:$8 sps:$4 sm:$0xff]  }
  0x5e   : > { %2454 = vmatprep.subr.bf16.mxu1 %v5127_v61  ;;  %v5201_v60 = vld [vmem:[%s5981_s4 + $0x3f0] ss:$8 sps:$4 sm:$0xff]   ;;  %v5206_v61 = vld [vmem:[%s5981_s4 + $0x2e4] ss:$8 sps:$4 sm:$0xff]  }
  0x60   : > { %2414 = vmatpush2.bf16.msra.mxu0 %v5129_v63  ;;  %v5204_v63 = vld [vmem:[%s5981_s4 + $0x2e0] ss:$8 sps:$4 sm:$0xff]  }
  0x61   : > { %2455 = vmatpush2.bf16.msra.mxu1 %v5130_v1  ;;  %2415 = vmatprep.subr.bf16.mxu0 %v5131_v2  ;;  %v5212_v1 = vld [vmem:[%s5981_s4 + $0x2d4] ss:$8 sps:$4 sm:$0xff]  }
  0x62   : > { %2456 = vmatprep.subr.bf16.mxu1 %v5133_v3  ;;  %v5215_v2 = vld [vmem:[%s5981_s4 + $0x3d4] ss:$8 sps:$4 sm:$0xff]   ;;  %v5210_v3 = vld [vmem:[%s5981_s4 + $0x2d0] ss:$8 sps:$4 sm:$0xff]  }
  0x64   : > { %2416 = vmatpush2.bf16.msra.mxu0 %v5135_v6  ;;  %v5221_v6 = vld [vmem:[%s5981_s4 + $0x3c4] ss:$8 sps:$4 sm:$0xff]  }
  0x65   : > { %2457 = vmatpush2.bf16.msra.mxu1 %v5136_v7  ;;  %2417 = vmatprep.subr.bf16.mxu0 %v5137_v8  ;;  %v5216_v7 = vld [vmem:[%s5981_s4 + $0x2c0] ss:$8 sps:$4 sm:$0xff]  }
  0x66   : > { %2458 = vmatprep.subr.bf16.mxu1 %v5139_v9  ;;  %v5219_v8 = vld [vmem:[%s5981_s4 + $0x3c0] ss:$8 sps:$4 sm:$0xff]   ;;  %v5224_v9 = vld [vmem:[%s5981_s4 + $0x2b4] ss:$8 sps:$4 sm:$0xff]  }
  0x68   : > { %2418 = vmatpush2.bf16.msra.mxu0 %v5141_v11  ;;  %v5227_v11 = vld [vmem:[%s5981_s4 + $0x3b4] ss:$8 sps:$4 sm:$0xff]  }
  0x69   : > { %2459 = vmatpush2.bf16.msra.mxu1 %v5142_v12  ;;  %2419 = vmatprep.subr.bf16.mxu0 %v5143_v13  ;;  %v5222_v12 = vld [vmem:[%s5981_s4 + $0x2b0] ss:$8 sps:$4 sm:$0xff]  }
  0x6a   : > { %2460 = vmatprep.subr.bf16.mxu1 %v5145_v14  ;;  %v5225_v13 = vld [vmem:[%s5981_s4 + $0x3b0] ss:$8 sps:$4 sm:$0xff]   ;;  %v5230_v14 = vld [vmem:[%s5981_s4 + $0x2a4] ss:$8 sps:$4 sm:$0xff]  }
  0x6c   : > { %2420 = vmatpush2.bf16.msra.mxu0 %v5147_v16  ;;  %v5228_v16 = vld [vmem:[%s5981_s4 + $0x2a0] ss:$8 sps:$4 sm:$0xff]  }
  0x6d   : > { %2461 = vmatpush2.bf16.msra.mxu1 %v5148_v18  ;;  %2471 = vmatprep.subr.bf16.mxu0 %v5152_v19  ;;  %v5236_v18 = vld [vmem:[%s5981_s4 + $0x294] ss:$8 sps:$4 sm:$0xff]  }
  0x6e   : > { %2512 = vmatprep.subr.bf16.mxu1 %v5155_v20  ;;  %v5239_v19 = vld [vmem:[%s5981_s4 + $0x394] ss:$8 sps:$4 sm:$0xff]   ;;  %v5234_v20 = vld [vmem:[%s5981_s4 + $0x290] ss:$8 sps:$4 sm:$0xff]  }
  0x6f   : > { %2422 = vmatmul.mubr.bf16.vlgmr.msra.gmra.mxu0 %v1100_v17  ;;  %v5231_v17 = vld [vmem:[%s5981_s4 + $0x3a0] ss:$8 sps:$4 sm:$0xff]  }
  0x70   : > { %2463 = vmatmul.mubr.bf16.vlgmr.msra.gmra.mxu1 %v1122_v22  ;;  %2472 = vmatpush1.bf16.msra.mxu0 %v5150_v23  ;;  %v5242_v22 = vld [vmem:[%s5981_s4 + $0x284] ss:$8 sps:$4 sm:$0xff]  }
  0x71   : > { %2513 = vmatpush1.bf16.msra.mxu1 %v5153_v24  ;;  %2473 = vmatprep.subr.bf16.mxu0 %v5158_v25  ;;  %v5245_v23 = vld [vmem:[%s5981_s4 + $0x384] ss:$8 sps:$4 sm:$0xff]   ;;  %v5240_v24 = vld [vmem:[%s5981_s4 + $0x280] ss:$8 sps:$4 sm:$0xff]   ;;  %v1107_v25 = vrot.slane %v6052_v10, %v6032_v53 }
  0x72   : > { %2514 = vmatprep.subr.bf16.mxu1 %v5161_v26  ;;  %2503 = vmatprep.mubr.bf16.mxu0 %v1121_v21  ;;  %v5237_v21 = vld [vmem:[%s5981_s4 + $0x390] ss:$8 sps:$4 sm:$0xff]   ;;  %v5243_v26 = vld [vmem:[%s5981_s4 + $0x380] ss:$8 sps:$4 sm:$0xff]   ;;  %v5254_v10 = vld [vmem:[%s5981_s4 + $0x464] ss:$8 sps:$4 sm:$0xff]  }
  0x73   : > { %2544 = vmatprep.mubr.bf16.mxu1 %v1125_v27  ;;  %v5248_v27 = vld [vmem:[%s5981_s4 + $0x474] ss:$8 sps:$4 sm:$0xff]  }
  0x74   : > { %2474 = vmatpush1.bf16.msra.mxu0 %v5156_v28  ;;  %v5251_v28 = vld [vmem:[%s5981_s4 + $0x574] ss:$8 sps:$4 sm:$0xff]  }
  0x75   : > { %2515 = vmatpush1.bf16.msra.mxu1 %v5159_v29  ;;  %2475 = vmatprep.subr.bf16.mxu0 %v5164_v30  ;;  %v5246_v29 = vld [vmem:[%s5981_s4 + $0x470] ss:$8 sps:$4 sm:$0xff]   ;;  %v1123_v30 = vcombine.high %v1107_v25, %v1107_v25 }
  0x76   : > { %2516 = vmatprep.subr.bf16.mxu1 %v5167_v31  ;;  %v5249_v31 = vld [vmem:[%s5981_s4 + $0x570] ss:$8 sps:$4 sm:$0xff]  }
  0x78   : > { %2476 = vmatpush1.bf16.msra.mxu0 %v5162_v32  ;;  %v6135_v32 = vld [vmem:[%s5976_s6 + $0x8] sm:$0x7f]  ;;  %s6916_s6 = sld [smem:[#allocation30_spill]] (!%p4736_p6) }
  0x79   : > { %2517 = vmatpush1.bf16.msra.mxu1 %v5165_v33  ;;  %2477 = vmatprep.subr.bf16.mxu0 %v5170_v34  ;;  %v5257_v33 = vld [vmem:[%s5981_s4 + $0x564] ss:$8 sps:$4 sm:$0xff]   ;;  %v6141_v34 = vrot.slane %v6135_v32, %v6032_v53 }
  0x7a   : > { %2518 = vmatprep.subr.bf16.mxu1 %v5173_v35 }
  0x7b   : > { %v1141_v35 = vcombine.high %v6141_v34, %v6141_v34 }
  0x7c   : > { %2478 = vmatpush1.bf16.msra.mxu0 %v5168_v36  ;;  %v5252_v36 = vld [vmem:[%s5981_s4 + $0x460] ss:$8 sps:$4 sm:$0xff]  }
  0x7d   : > { %2519 = vmatpush1.bf16.msra.mxu1 %v5171_v37  ;;  %2479 = vmatprep.subr.bf16.mxu0 %v5176_v38  ;;  %v5255_v37 = vld [vmem:[%s5981_s4 + $0x560] ss:$8 sps:$4 sm:$0xff]   ;;  %v5260_v38 = vld [vmem:[%s5981_s4 + $0x454] ss:$8 sps:$4 sm:$0xff]  }
  0x7e   : > { %2520 = vmatprep.subr.bf16.mxu1 %v5179_v39  ;;  %v5263_v39 = vld [vmem:[%s5981_s4 + $0x554] ss:$8 sps:$4 sm:$0xff]  }
  0x80   : > { %2480 = vmatpush1.bf16.msra.mxu0 %v5174_v40  ;;  %v1163_v40 = vrot.slane %v1141_v35, %v6032_v53  ;;  %v5341_v35 = vld [vmem:[%s5981_s4 + $0x584] ss:$8 sps:$4 sm:$0xff]  }
  0x81   : > { %2521 = vmatpush1.bf16.msra.mxu1 %v5177_v41  ;;  %2481 = vmatprep.subr.bf16.mxu0 %v5182_v43  ;;  %v5258_v43 = vld [vmem:[%s5981_s4 + $0x450] ss:$8 sps:$4 sm:$0xff]  }
  0x82   : > { %2522 = vmatprep.subr.bf16.mxu1 %v5185_v44  ;;  %v1173_v41 = vcombine.high %v1163_v40, %v1163_v40  ;;  %v5261_v44 = vld [vmem:[%s5981_s4 + $0x550] ss:$8 sps:$4 sm:$0xff]  }
  0x84   : > { %2482 = vmatpush1.bf16.msra.mxu0 %v5180_v45  ;;  %v5266_v45 = vld [vmem:[%s5981_s4 + $0x444] ss:$8 sps:$4 sm:$0xff]  }
  0x85   : > { %2523 = vmatpush1.bf16.msra.mxu1 %v5183_v46  ;;  %2483 = vmatprep.subr.bf16.mxu0 %v5188_v48  ;;  %v5269_v46 = vld [vmem:[%s5981_s4 + $0x544] ss:$8 sps:$4 sm:$0xff]   ;;  %v5264_v48 = vld [vmem:[%s5981_s4 + $0x440] ss:$8 sps:$4 sm:$0xff]  }
  0x86   : > { %2524 = vmatprep.subr.bf16.mxu1 %v5191_v49  ;;  %v5267_v49 = vld [vmem:[%s5981_s4 + $0x540] ss:$8 sps:$4 sm:$0xff]  }
  0x88   : > { %2484 = vmatpush1.bf16.msra.mxu0 %v5186_v50  ;;  %v5272_v50 = vld [vmem:[%s5981_s4 + $0x434] ss:$8 sps:$4 sm:$0xff]  }
  0x89   : > { %2525 = vmatpush1.bf16.msra.mxu1 %v5189_v51  ;;  %2485 = vmatprep.subr.bf16.mxu0 %v5194_v52  ;;  %v5275_v51 = vld [vmem:[%s5981_s4 + $0x534] ss:$8 sps:$4 sm:$0xff]   ;;  %v5270_v52 = vld [vmem:[%s5981_s4 + $0x430] ss:$8 sps:$4 sm:$0xff]  }
  0x8a   : > { %2526 = vmatprep.subr.bf16.mxu1 %v5197_v54  ;;  %v5273_v54 = vld [vmem:[%s5981_s4 + $0x530] ss:$8 sps:$4 sm:$0xff]  }
  0x8c   : > { %2486 = vmatpush1.bf16.msra.mxu0 %v5192_v55  ;;  %v5278_v55 = vld [vmem:[%s5981_s4 + $0x424] ss:$8 sps:$4 sm:$0xff]  }
  0x8d   : > { %2527 = vmatpush1.bf16.msra.mxu1 %v5195_v56  ;;  %2487 = vmatprep.subr.bf16.mxu0 %v5200_v57  ;;  %v5281_v56 = vld [vmem:[%s5981_s4 + $0x524] ss:$8 sps:$4 sm:$0xff]   ;;  %v5276_v57 = vld [vmem:[%s5981_s4 + $0x420] ss:$8 sps:$4 sm:$0xff]  }
  0x8e   : > { %2528 = vmatprep.subr.bf16.mxu1 %v5203_v58  ;;  %v5279_v58 = vld [vmem:[%s5981_s4 + $0x520] ss:$8 sps:$4 sm:$0xff]  }
  0x90   : > { %2488 = vmatpush2.bf16.msra.mxu0 %v5198_v59  ;;  %v5284_v59 = vld [vmem:[%s5981_s4 + $0x414] ss:$8 sps:$4 sm:$0xff]  }
  0x91   : > { %2529 = vmatpush2.bf16.msra.mxu1 %v5201_v60  ;;  %2489 = vmatprep.subr.bf16.mxu0 %v5206_v61  ;;  %v5287_v60 = vld [vmem:[%s5981_s4 + $0x514] ss:$8 sps:$4 sm:$0xff]   ;;  %v5282_v61 = vld [vmem:[%s5981_s4 + $0x410] ss:$8 sps:$4 sm:$0xff]  }
  0x92   : > { %2530 = vmatprep.subr.bf16.mxu1 %v5209_v62  ;;  %v5285_v62 = vld [vmem:[%s5981_s4 + $0x510] ss:$8 sps:$4 sm:$0xff]  }
  0x94   : > { %2490 = vmatpush2.bf16.msra.mxu0 %v5204_v63  ;;  %v5290_v63 = vld [vmem:[%s5981_s4 + $0x404] ss:$8 sps:$4 sm:$0xff]  }
  0x95   : > { %2531 = vmatpush2.bf16.msra.mxu1 %v5207_v0  ;;  %2491 = vmatprep.subr.bf16.mxu0 %v5212_v1  ;;  %v5293_v0 = vld [vmem:[%s5981_s4 + $0x504] ss:$8 sps:$4 sm:$0xff]   ;;  %v5288_v1 = vld [vmem:[%s5981_s4 + $0x400] ss:$8 sps:$4 sm:$0xff]  }
  0x96   : > { %2532 = vmatprep.subr.bf16.mxu1 %v5215_v2  ;;  %v5291_v2 = vld [vmem:[%s5981_s4 + $0x500] ss:$8 sps:$4 sm:$0xff]  }
  0x98   : > { %2492 = vmatpush2.bf16.msra.mxu0 %v5210_v3  ;;  %v5296_v3 = vld [vmem:[%s5981_s4 + $0x4f4] ss:$8 sps:$4 sm:$0xff]  }
  0x99   : > { %2533 = vmatpush2.bf16.msra.mxu1 %v5213_v4  ;;  %2493 = vmatprep.subr.bf16.mxu0 %v5218_v5  ;;  %v5299_v4 = vld [vmem:[%s5981_s4 + $0x5f4] ss:$8 sps:$4 sm:$0xff]   ;;  %v5294_v5 = vld [vmem:[%s5981_s4 + $0x4f0] ss:$8 sps:$4 sm:$0xff]  }
  0x9a   : > { %2534 = vmatprep.subr.bf16.mxu1 %v5221_v6  ;;  %v5297_v6 = vld [vmem:[%s5981_s4 + $0x5f0] ss:$8 sps:$4 sm:$0xff]  }
  0x9c   : > { %2494 = vmatpush2.bf16.msra.mxu0 %v5216_v7  ;;  %v5302_v7 = vld [vmem:[%s5981_s4 + $0x4e4] ss:$8 sps:$4 sm:$0xff]  }
  0x9d   : > { %2535 = vmatpush2.bf16.msra.mxu1 %v5219_v8  ;;  %2495 = vmatprep.subr.bf16.mxu0 %v5224_v9  ;;  %v5305_v8 = vld [vmem:[%s5981_s4 + $0x5e4] ss:$8 sps:$4 sm:$0xff]   ;;  %v5300_v9 = vld [vmem:[%s5981_s4 + $0x4e0] ss:$8 sps:$4 sm:$0xff]  }
  0x9e   : > { %2536 = vmatprep.subr.bf16.mxu1 %v5227_v11  ;;  %v5303_v11 = vld [vmem:[%s5981_s4 + $0x5e0] ss:$8 sps:$4 sm:$0xff]  }
  0xa0   : > { %2496 = vmatpush2.bf16.msra.mxu0 %v5222_v12  ;;  %v5308_v12 = vld [vmem:[%s5981_s4 + $0x4d4] ss:$8 sps:$4 sm:$0xff]  }
  0xa1   : > { %2537 = vmatpush2.bf16.msra.mxu1 %v5225_v13  ;;  %2497 = vmatprep.subr.bf16.mxu0 %v5230_v14  ;;  %v5311_v13 = vld [vmem:[%s5981_s4 + $0x5d4] ss:$8 sps:$4 sm:$0xff]   ;;  %v5306_v14 = vld [vmem:[%s5981_s4 + $0x4d0] ss:$8 sps:$4 sm:$0xff]  }
  0xa2   : > { %2538 = vmatprep.subr.bf16.mxu1 %v5233_v15  ;;  %v5309_v15 = vld [vmem:[%s5981_s4 + $0x5d0] ss:$8 sps:$4 sm:$0xff]  }
  0xa4   : > { %2498 = vmatpush2.bf16.msra.mxu0 %v5228_v16  ;;  %v5314_v16 = vld [vmem:[%s5981_s4 + $0x4c4] ss:$8 sps:$4 sm:$0xff]  }
  0xa5   : > { %2539 = vmatpush2.bf16.msra.mxu1 %v5231_v17  ;;  %2499 = vmatprep.subr.bf16.mxu0 %v5236_v18  ;;  %v5317_v17 = vld [vmem:[%s5981_s4 + $0x5c4] ss:$8 sps:$4 sm:$0xff]   ;;  %v5312_v18 = vld [vmem:[%s5981_s4 + $0x4c0] ss:$8 sps:$4 sm:$0xff]  }
  0xa6   : > { %2540 = vmatprep.subr.bf16.mxu1 %v5239_v19  ;;  %v5315_v19 = vld [vmem:[%s5981_s4 + $0x5c0] ss:$8 sps:$4 sm:$0xff]  }
  0xa8   : > { %2500 = vmatpush2.bf16.msra.mxu0 %v5234_v20  ;;  %v5320_v20 = vld [vmem:[%s5981_s4 + $0x4b4] ss:$8 sps:$4 sm:$0xff]  }
  0xa9   : > { %2541 = vmatpush2.bf16.msra.mxu1 %v5237_v21  ;;  %2501 = vmatprep.subr.bf16.mxu0 %v5242_v22  ;;  %v5323_v21 = vld [vmem:[%s5981_s4 + $0x5b4] ss:$8 sps:$4 sm:$0xff]   ;;  %v5318_v22 = vld [vmem:[%s5981_s4 + $0x4b0] ss:$8 sps:$4 sm:$0xff]  }
  0xaa   : > { %2542 = vmatprep.subr.bf16.mxu1 %v5245_v23  ;;  %v5321_v23 = vld [vmem:[%s5981_s4 + $0x5b0] ss:$8 sps:$4 sm:$0xff]  }
  0xac   : > { %2502 = vmatpush2.bf16.msra.mxu0 %v5240_v24  ;;  %v5326_v24 = vld [vmem:[%s5981_s4 + $0x4a4] ss:$8 sps:$4 sm:$0xff]  }
  0xad   : > { %2543 = vmatpush2.bf16.msra.mxu1 %v5243_v26  ;;  %2553 = vmatprep.subr.bf16.mxu0 %v5248_v27  ;;  %v5324_v26 = vld [vmem:[%s5981_s4 + $0x4a0] ss:$8 sps:$4 sm:$0xff]  }
  0xae   : > { %2594 = vmatprep.subr.bf16.mxu1 %v5251_v28  ;;  %v5327_v27 = vld [vmem:[%s5981_s4 + $0x5a0] ss:$8 sps:$4 sm:$0xff]   ;;  %v5332_v28 = vld [vmem:[%s5981_s4 + $0x494] ss:$8 sps:$4 sm:$0xff]  }
  0xaf   : > { %2504 = vmatmul.mubr.bf16.vlgmr.msra.gmra.mxu0 %v1107_v25  ;;  %v5329_v25 = vld [vmem:[%s5981_s4 + $0x5a4] ss:$8 sps:$4 sm:$0xff]  }
  0xb0   : > { %2545 = vmatmul.mubr.bf16.vlgmr.msra.gmra.mxu1 %v1123_v30  ;;  %2554 = vmatpush1.bf16.msra.mxu0 %v5246_v29  ;;  %v5335_v29 = vld [vmem:[%s5981_s4 + $0x594] ss:$8 sps:$4 sm:$0xff]   ;;  %v5330_v30 = vld [vmem:[%s5981_s4 + $0x490] ss:$8 sps:$4 sm:$0xff]  }
  0xb1   : > { %2595 = vmatpush1.bf16.msra.mxu1 %v5249_v31  ;;  %2555 = vmatprep.subr.bf16.mxu0 %v5254_v10  ;;  %v5333_v31 = vld [vmem:[%s5981_s4 + $0x590] ss:$8 sps:$4 sm:$0xff]   ;;  %v1126_v10 = vcombine.high %v6135_v32, %v6135_v32  ;;  %v5345_v32 = vld [vmem:[%s5981_s4 + $0x674] ss:$8 sps:$4 sm:$0xff]  }
  0xb2   : > { %2596 = vmatprep.subr.bf16.mxu1 %v5257_v33  ;;  %2585 = vmatprep.mubr.bf16.mxu0 %v1163_v40  ;;  %v5338_v33 = vld [vmem:[%s5981_s4 + $0x484] ss:$8 sps:$4 sm:$0xff]   ;;  %v5369_v40 = vld [vmem:[%s5981_s4 + $0x774] ss:$8 sps:$4 sm:$0xff]  }
  0xb3   : > { %2626 = vmatprep.mubr.bf16.mxu1 %v1173_v41 }
  0xb4   : > { %2556 = vmatpush1.bf16.msra.mxu0 %v5252_v36  ;;  %v1149_v36 = vrot.slane %v6141_v34, %v6032_v53  ;;  %v5343_v34 = vld [vmem:[%s5981_s4 + $0x670] ss:$8 sps:$4 sm:$0xff]  }
  0xb5   : > { %2597 = vmatpush1.bf16.msra.mxu1 %v5255_v37  ;;  %2557 = vmatprep.subr.bf16.mxu0 %v5260_v38  ;;  %v5336_v37 = vld [vmem:[%s5981_s4 + $0x480] ss:$8 sps:$4 sm:$0xff]  }
  0xb6   : > { %2598 = vmatprep.subr.bf16.mxu1 %v5263_v39  ;;  %v5339_v38 = vld [vmem:[%s5981_s4 + $0x580] ss:$8 sps:$4 sm:$0xff]   ;;  %v6209_v39 = vrot.slane %v1126_v10, %v6032_v53 }
  0xb8   : > { %2558 = vmatpush1.bf16.msra.mxu0 %v5258_v43  ;;  %v1142_v41 = vcombine.high %v6209_v39, %v6209_v39  ;;  %v1171_v43 = vcombine.high %v1149_v36, %v1149_v36 }
  0xb9   : > { %2599 = vmatpush1.bf16.msra.mxu1 %v5261_v44  ;;  %2559 = vmatprep.subr.bf16.mxu0 %v5266_v45  ;;  %v5367_v44 = vld [vmem:[%s5981_s4 + $0x770] ss:$8 sps:$4 sm:$0xff]   ;;  %v5348_v45 = vld [vmem:[%s5981_s4 + $0x664] ss:$8 sps:$4 sm:$0xff]  }
  0xba   : > { %2600 = vmatprep.subr.bf16.mxu1 %v5269_v46  ;;  %v5375_v46 = vld [vmem:[%s5981_s4 + $0x764] ss:$8 sps:$4 sm:$0xff]  }
  0xbc   : > { %2560 = vmatpush1.bf16.msra.mxu0 %v5264_v48  ;;  %v1170_v48 = vrot.slane %v1142_v41, %v6032_v53 }
  0xbd   : > { %2601 = vmatpush1.bf16.msra.mxu1 %v5267_v49  ;;  %2561 = vmatprep.subr.bf16.mxu0 %v5272_v50  ;;  %v5346_v49 = vld [vmem:[%s5981_s4 + $0x660] ss:$8 sps:$4 sm:$0xff]  }
  0xbe   : > { %2602 = vmatprep.subr.bf16.mxu1 %v5275_v51  ;;  %v5373_v50 = vld [vmem:[%s5981_s4 + $0x760] ss:$8 sps:$4 sm:$0xff]   ;;  %v5351_v51 = vld [vmem:[%s5981_s4 + $0x654] ss:$8 sps:$4 sm:$0xff]  }
  0xc0   : > { %2562 = vmatpush1.bf16.msra.mxu0 %v5270_v52  ;;  %v5381_v52 = vld [vmem:[%s5981_s4 + $0x754] ss:$8 sps:$4 sm:$0xff]  }
  0xc1   : > { %2603 = vmatpush1.bf16.msra.mxu1 %v5273_v54  ;;  %2563 = vmatprep.subr.bf16.mxu0 %v5278_v55  ;;  %v5801_v54 = vmov 0   ;;  %v5349_v55 = vld [vmem:[%s5981_s4 + $0x650] ss:$8 sps:$4 sm:$0xff]  }
  0xc2   : > { %2604 = vmatprep.subr.bf16.mxu1 %v5281_v56  ;;  %v5379_v56 = vld [vmem:[%s5981_s4 + $0x750] ss:$8 sps:$4 sm:$0xff]  }
  0xc4   : > { %2564 = vmatpush1.bf16.msra.mxu0 %v5276_v57  ;;  %v5354_v57 = vld [vmem:[%s5981_s4 + $0x644] ss:$8 sps:$4 sm:$0xff]  }
  0xc5   : > { %2605 = vmatpush1.bf16.msra.mxu1 %v5279_v58  ;;  %2565 = vmatprep.subr.bf16.mxu0 %v5284_v59  ;;  %v5387_v58 = vld [vmem:[%s5981_s4 + $0x744] ss:$8 sps:$4 sm:$0xff]   ;;  %v5352_v59 = vld [vmem:[%s5981_s4 + $0x640] ss:$8 sps:$4 sm:$0xff]  }
  0xc6   : > { %2606 = vmatprep.subr.bf16.mxu1 %v5287_v60  ;;  %v5385_v60 = vld [vmem:[%s5981_s4 + $0x740] ss:$8 sps:$4 sm:$0xff]  }
  0xc8   : > { %2566 = vmatpush1.bf16.msra.mxu0 %v5282_v61  ;;  %v5357_v61 = vld [vmem:[%s5981_s4 + $0x634] ss:$8 sps:$4 sm:$0xff]  }
  0xc9   : > { %2607 = vmatpush1.bf16.msra.mxu1 %v5285_v62  ;;  %2567 = vmatprep.subr.bf16.mxu0 %v5290_v63  ;;  %v5393_v62 = vld [vmem:[%s5981_s4 + $0x734] ss:$8 sps:$4 sm:$0xff]   ;;  %v5355_v63 = vld [vmem:[%s5981_s4 + $0x630] ss:$8 sps:$4 sm:$0xff]  }
  0xca   : > { %2608 = vmatprep.subr.bf16.mxu1 %v5293_v0  ;;  %v5391_v0 = vld [vmem:[%s5981_s4 + $0x730] ss:$8 sps:$4 sm:$0xff]  }
  0xcc   : > { %2568 = vmatpush1.bf16.msra.mxu0 %v5288_v1  ;;  %v5360_v1 = vld [vmem:[%s5981_s4 + $0x624] ss:$8 sps:$4 sm:$0xff]  }
  0xcd   : > { %2609 = vmatpush1.bf16.msra.mxu1 %v5291_v2  ;;  %2569 = vmatprep.subr.bf16.mxu0 %v5296_v3  ;;  %v5399_v2 = vld [vmem:[%s5981_s4 + $0x724] ss:$8 sps:$4 sm:$0xff]   ;;  %v5358_v3 = vld [vmem:[%s5981_s4 + $0x620] ss:$8 sps:$4 sm:$0xff]  }
  0xce   : > { %2610 = vmatprep.subr.bf16.mxu1 %v5299_v4  ;;  %v5397_v4 = vld [vmem:[%s5981_s4 + $0x720] ss:$8 sps:$4 sm:$0xff]  }
  0xd0   : > { %2570 = vmatpush2.bf16.msra.mxu0 %v5294_v5  ;;  %v5363_v5 = vld [vmem:[%s5981_s4 + $0x614] ss:$8 sps:$4 sm:$0xff]  }
  0xd1   : > { %2611 = vmatpush2.bf16.msra.mxu1 %v5297_v6  ;;  %2571 = vmatprep.subr.bf16.mxu0 %v5302_v7  ;;  %v5405_v6 = vld [vmem:[%s5981_s4 + $0x714] ss:$8 sps:$4 sm:$0xff]   ;;  %v5361_v7 = vld [vmem:[%s5981_s4 + $0x610] ss:$8 sps:$4 sm:$0xff]  }
  0xd2   : > { %2612 = vmatprep.subr.bf16.mxu1 %v5305_v8  ;;  %v5403_v8 = vld [vmem:[%s5981_s4 + $0x710] ss:$8 sps:$4 sm:$0xff]  }
  0xd4   : > { %2572 = vmatpush2.bf16.msra.mxu0 %v5300_v9  ;;  %v5366_v9 = vld [vmem:[%s5981_s4 + $0x604] ss:$8 sps:$4 sm:$0xff]  }
  0xd5   : > { %2613 = vmatpush2.bf16.msra.mxu1 %v5303_v11  ;;  %2573 = vmatprep.subr.bf16.mxu0 %v5308_v12  ;;  %v5411_v11 = vld [vmem:[%s5981_s4 + $0x704] ss:$8 sps:$4 sm:$0xff]   ;;  %v1156_v12 = vrot.slane %v6209_v39, %v6032_v53 }
  0xd6   : > { %2614 = vmatprep.subr.bf16.mxu1 %v5311_v13  ;;  %v5364_v13 = vld [vmem:[%s5981_s4 + $0x600] ss:$8 sps:$4 sm:$0xff]  }
  0xd8   : > { %2574 = vmatpush2.bf16.msra.mxu0 %v5306_v14  ;;  %v5409_v14 = vld [vmem:[%s5981_s4 + $0x700] ss:$8 sps:$4 sm:$0xff]  }
  0xd9   : > { %2615 = vmatpush2.bf16.msra.mxu1 %v5309_v15  ;;  %2575 = vmatprep.subr.bf16.mxu0 %v5314_v16  ;;  %v5372_v15 = vld [vmem:[%s5981_s4 + $0x6f4] ss:$8 sps:$4 sm:$0xff]   ;;  %v1172_v16 = vcombine.high %v1156_v12, %v1156_v12 }
  0xda   : > { %2616 = vmatprep.subr.bf16.mxu1 %v5317_v17  ;;  %v5370_v17 = vld [vmem:[%s5981_s4 + $0x6f0] ss:$8 sps:$4 sm:$0xff]  }
  0xdc   : > { %2576 = vmatpush2.bf16.msra.mxu0 %v5312_v18  ;;  %v5378_v18 = vld [vmem:[%s5981_s4 + $0x6e4] ss:$8 sps:$4 sm:$0xff]  }
  0xdd   : > { %2617 = vmatpush2.bf16.msra.mxu1 %v5315_v19  ;;  %2577 = vmatprep.subr.bf16.mxu0 %v5320_v20  ;;  %v5376_v19 = vld [vmem:[%s5981_s4 + $0x6e0] ss:$8 sps:$4 sm:$0xff]   ;;  %v5384_v20 = vld [vmem:[%s5981_s4 + $0x6d4] ss:$8 sps:$4 sm:$0xff]  }
  0xde   : > { %2618 = vmatprep.subr.bf16.mxu1 %v5323_v21  ;;  %v5382_v21 = vld [vmem:[%s5981_s4 + $0x6d0] ss:$8 sps:$4 sm:$0xff]  }
  0xe0   : > { %2578 = vmatpush2.bf16.msra.mxu0 %v5318_v22  ;;  %v5390_v22 = vld [vmem:[%s5981_s4 + $0x6c4] ss:$8 sps:$4 sm:$0xff]  }
  0xe1   : > { %2619 = vmatpush2.bf16.msra.mxu1 %v5321_v23  ;;  %2579 = vmatprep.subr.bf16.mxu0 %v5326_v24  ;;  %v5388_v23 = vld [vmem:[%s5981_s4 + $0x6c0] ss:$8 sps:$4 sm:$0xff]   ;;  %v5396_v24 = vld [vmem:[%s5981_s4 + $0x6b4] ss:$8 sps:$4 sm:$0xff]  }
  0xe2   : > { %2620 = vmatprep.subr.bf16.mxu1 %v5329_v25  ;;  %v5394_v25 = vld [vmem:[%s5981_s4 + $0x6b0] ss:$8 sps:$4 sm:$0xff]  }
  0xe4   : > { %2580 = vmatpush2.bf16.msra.mxu0 %v5324_v26  ;;  %v5402_v26 = vld [vmem:[%s5981_s4 + $0x6a4] ss:$8 sps:$4 sm:$0xff]  }
  0xe5   : > { %2621 = vmatpush2.bf16.msra.mxu1 %v5327_v27  ;;  %2581 = vmatprep.subr.bf16.mxu0 %v5332_v28  ;;  %v5400_v27 = vld [vmem:[%s5981_s4 + $0x6a0] ss:$8 sps:$4 sm:$0xff]   ;;  %v5408_v28 = vld [vmem:[%s5981_s4 + $0x694] ss:$8 sps:$4 sm:$0xff]  }
  0xe6   : > { %2622 = vmatprep.subr.bf16.mxu1 %v5335_v29  ;;  %v5406_v29 = vld [vmem:[%s5981_s4 + $0x690] ss:$8 sps:$4 sm:$0xff]  }
  0xe8   : > { %2582 = vmatpush2.bf16.msra.mxu0 %v5330_v30  ;;  %v5414_v30 = vld [vmem:[%s5981_s4 + $0x684] ss:$8 sps:$4 sm:$0xff]  }
  0xe9   : > { %2623 = vmatpush2.bf16.msra.mxu1 %v5333_v31  ;;  %2583 = vmatprep.subr.bf16.mxu0 %v5338_v33  ;;  %v5412_v31 = vld [vmem:[%s5981_s4 + $0x680] ss:$8 sps:$4 sm:$0xff]   ;;  %s6920_s4 = sld [smem:[#allocation29_spill]] (!%p4736_p6) }
  0xea   : > { %2624 = vmatprep.subr.bf16.mxu1 %v5341_v35 }
  0xec   : > { %2584 = vmatpush2.bf16.msra.mxu0 %v5336_v37 }
  0xed   : > { %2625 = vmatpush2.bf16.msra.mxu1 %v5339_v38  ;;  %2635 = vmatprep.subr.bf16.mxu0 %v5345_v32 }
  0xee   : > { %2676 = vmatprep.subr.bf16.mxu1 %v5369_v40 }
  0xef   : > { %2586 = vmatmul.mubr.bf16.vlgmr.msra.gmra.mxu0 %v1149_v36 }
  0xf0   : > { %2627 = vmatmul.mubr.bf16.vlgmr.msra.gmra.mxu1 %v1171_v43  ;;  %2636 = vmatpush1.bf16.msra.mxu0 %v5343_v34 }
  0xf1   : > { %2677 = vmatpush1.bf16.msra.mxu1 %v5367_v44  ;;  %2637 = vmatprep.subr.bf16.mxu0 %v5348_v45 }
  0xf2   : > { %2678 = vmatprep.subr.bf16.mxu1 %v5375_v46  ;;  %2708 = vmatprep.mubr.bf16.mxu1 %v5801_v54 }
  0xf3   : > { %2667 = vmatprep.mubr.bf16.mxu0 %v1170_v48 }
  0xf4   : > { %2638 = vmatpush1.bf16.msra.mxu0 %v5346_v49 }
  0xf5   : > { %2679 = vmatpush1.bf16.msra.mxu1 %v5373_v50  ;;  %2639 = vmatprep.subr.bf16.mxu0 %v5351_v51 }
  0xf6   : > { %2680 = vmatprep.subr.bf16.mxu1 %v5381_v52 }
  0xf8   : > { %2640 = vmatpush1.bf16.msra.mxu0 %v5349_v55 }
  0xf9   : > { %2681 = vmatpush1.bf16.msra.mxu1 %v5379_v56  ;;  %2641 = vmatprep.subr.bf16.mxu0 %v5354_v57 }
  0xfa   : > { %2682 = vmatprep.subr.bf16.mxu1 %v5387_v58 }
  0xfc   : > { %2642 = vmatpush1.bf16.msra.mxu0 %v5352_v59 }
  0xfd   : > { %2683 = vmatpush1.bf16.msra.mxu1 %v5385_v60  ;;  %2643 = vmatprep.subr.bf16.mxu0 %v5357_v61 }
  0xfe   : > { %2684 = vmatprep.subr.bf16.mxu1 %v5393_v62 }
 0x100   : > { %2644 = vmatpush1.bf16.msra.mxu0 %v5355_v63 }
 0x101   : > { %2685 = vmatpush1.bf16.msra.mxu1 %v5391_v0  ;;  %2645 = vmatprep.subr.bf16.mxu0 %v5360_v1 }
 0x102   : > { %2686 = vmatprep.subr.bf16.mxu1 %v5399_v2 }
 0x104   : > { %2646 = vmatpush1.bf16.msra.mxu0 %v5358_v3 }
 0x105   : > { %2687 = vmatpush1.bf16.msra.mxu1 %v5397_v4  ;;  %2647 = vmatprep.subr.bf16.mxu0 %v5363_v5 }
 0x106   : > { %2688 = vmatprep.subr.bf16.mxu1 %v5405_v6 }
 0x108   : > { %2648 = vmatpush1.bf16.msra.mxu0 %v5361_v7 }
 0x109   : > { %2689 = vmatpush1.bf16.msra.mxu1 %v5403_v8  ;;  %2649 = vmatprep.subr.bf16.mxu0 %v5366_v9 }
 0x10a   : > { %2690 = vmatprep.subr.bf16.mxu1 %v5411_v11 }
 0x10c   : > { %2650 = vmatpush1.bf16.msra.mxu0 %v5364_v13 }
 0x10d   : > { %2691 = vmatpush1.bf16.msra.mxu1 %v5409_v14  ;;  %2651 = vmatprep.subr.bf16.mxu0 %v5372_v15 }
 0x110   : > { %2709 = vmatmul.mubr.bf16.vlgmr.msra.gmra.mxu1 %v1172_v16  ;;  %2652 = vmatpush2.bf16.msra.mxu0 %v5370_v17 }
 0x111   : > { %2653 = vmatprep.subr.bf16.mxu0 %v5378_v18 }
 0x114   : > { %2654 = vmatpush2.bf16.msra.mxu0 %v5376_v19  ;;  %v832_v19 = vld [vmem:[#allocation2] sm:$0x3] }
 0x115   : > { %2655 = vmatprep.subr.bf16.mxu0 %v5384_v20 }
 0x118   : > { %2656 = vmatpush2.bf16.msra.mxu0 %v5382_v21 }
 0x119   : > { %2657 = vmatprep.subr.bf16.mxu0 %v5390_v22 }
 0x11c   : > { %2658 = vmatpush2.bf16.msra.mxu0 %v5388_v23 }
 0x11d   : > { %2659 = vmatprep.subr.bf16.mxu0 %v5396_v24 }
 0x120   : > { %2660 = vmatpush2.bf16.msra.mxu0 %v5394_v25 }
 0x121   : > { %2661 = vmatprep.subr.bf16.mxu0 %v5402_v26 }
 0x124   : > { %2662 = vmatpush2.bf16.msra.mxu0 %v5400_v27 }
 0x125   : > { %2663 = vmatprep.subr.bf16.mxu0 %v5408_v28 }
 0x128   : > { %2664 = vmatpush2.bf16.msra.mxu0 %v5406_v29 }
 0x129   : > { %2665 = vmatprep.subr.bf16.mxu0 %v5414_v30 }
 0x12c   : > { %2666 = vmatpush2.bf16.msra.mxu0 %v5412_v31 }
 0x12f   : > { %v2423_v10 = vpop.f32.mrf.mxu0  ;;  %2668 = vmatmul.mubr.bf16.vlgmr.msra.gmra.mxu0 %v1156_v12 }
 0x130   : > { %v2464_v33 = vpop.f32.mrf.mxu1 }
 0x131   : > { %v2465_v35 = vadd.f32 %v2464_v33, %v2423_v10  ;;  %v2425_v36 = vpop.f32.mrf.mxu0 }
 0x132   : > { %v2466_v37 = vpop.f32.mrf.mxu1 }
 0x133   : > { %v2467_v38 = vadd.f32 %v2466_v37, %v2425_v36  ;;  %v2427_v39 = vpop.f32.mrf.mxu0 }
 0x134   : > { %v2468_v32 = vpop.f32.mrf.mxu1 }
 0x135   : > { %v2428_v40 = vpop.f32.mrf.mxu0 }
 0x136   : > { %v2469_v41 = vpop.f32.mrf.mxu1 }
 0x16f   : > { %v2505_v43 = vpop.f32.mrf.mxu0 }
 0x170   : > { %v2546_v34 = vpop.f32.mrf.mxu1  ;;  %v2506_v44 = vadd.f32 %v2505_v43, %v2465_v35 }
 0x171   : > { %v2507_v45 = vpop.f32.mrf.mxu0 }
 0x172   : > { %v2548_v46 = vpop.f32.mrf.mxu1  ;;  %v2508_v48 = vadd.f32 %v2507_v45, %v2467_v38  ;;  %v2547_v49 = vadd.f32 %v2546_v34, %v2506_v44 }
 0x173   : > { %v2509_v50 = vpop.f32.mrf.mxu0 }
 0x174   : > { %v2550_v51 = vpop.f32.mrf.mxu1  ;;  %v2549_v52 = vadd.f32 %v2548_v46, %v2508_v48 }
 0x175   : > { %v2510_v54 = vpop.f32.mrf.mxu0 }
 0x176   : > { %v2551_v55 = vpop.f32.mrf.mxu1 }
 0x1af   : > { %v2587_v56 = vpop.f32.mrf.mxu0 }
 0x1b0   : > { %v2628_v57 = vpop.f32.mrf.mxu1  ;;  %v2588_v58 = vadd.f32 %v2587_v56, %v2547_v49 }
 0x1b1   : > { %v2589_v59 = vpop.f32.mrf.mxu0 }
 0x1b2   : > { %v2630_v60 = vpop.f32.mrf.mxu1  ;;  %v2629_v61 = vadd.f32 %v2628_v57, %v2588_v58  ;;  %v2590_v6 = vadd.f32 %v2589_v59, %v2549_v52 }
 0x1b3   : > { %v2591_v62 = vpop.f32.mrf.mxu0 }
 0x1b4   : > { %v2632_v63 = vpop.f32.mrf.mxu1  ;;  %v2631_v8 = vadd.f32 %v2630_v60, %v2590_v6 }
 0x1b5   : > { %v2592_v0 = vpop.f32.mrf.mxu0 }
 0x1b6   : > { %v2633_v1 = vpop.f32.mrf.mxu1 }
 0x1d0   : > { %v2710_v2 = vpop.f32.mrf.mxu1 }
 0x1d2   : > { %v2712_v3 = vpop.f32.mrf.mxu1 }
 0x1d4   : > { %v2714_v4 = vpop.f32.mrf.mxu1 }
 0x1d6   : > { %v2715_v5 = vpop.f32.mrf.mxu1 }
 0x1ef   : > { %v2669_v7 = vpop.f32.mrf.mxu0 }
 0x1f0   : > { %v2670_v9 = vadd.f32 %v2669_v7, %v2629_v61 }
 0x1f1   : > { %v2671_v11 = vpop.f32.mrf.mxu0 }
 0x1f2   : > { %v2672_v12 = vadd.f32 %v2671_v11, %v2631_v8  ;;  %v2711_v14 = vadd.f32 %v2710_v2, %v2670_v9 }
 0x1f3   : > { %v2673_v13 = vpop.f32.mrf.mxu0 }
 0x1f4   : > { %v2713_v15 = vadd.f32 %v2712_v3, %v2672_v12 }
 0x1f5   : > { %v2674_v16 = vpop.f32.mrf.mxu0 }
 0x1f6   : > { %v2719_v17 = vcombine.low %v2711_v14, %v2713_v15 }
 0x1f8   : > { %v2726_v18 = vrot.slane %v2719_v17, %v6032_v53 }
 0x1fa   : > { %v2733_v20 = vrot.slane %v2726_v18, %v6032_v53  ;;  %2744 = sbr.rel (%p4736_p6) target bundleno = 1797 (0x705), region = 116 }
 0x1fc   : > { %v2735_v21 = vadd.f32 %v2733_v20, %v832_v19 }
 0x1fe   : > { %2740 = vst.msk [vmem:[#allocation2] sm:$0x3] %vm2738_vm1, %v2735_v21 }
 0x1ff   : > { %v5416_v22 = vld [vmem:[%s6915_s9 + $0x78] sm:$0xff]   ;;  %v5802_v24 = vmov 0.0   ;;  %v5418_v42 = vld [vmem:[%s6915_s9 + $0x70] sm:$0xff]   ;;  %vm5803_vm2 = vmmov 0   ;;  %v5420_v25 = vld [vmem:[%s6915_s9 + $0x68] sm:$0xff]   ;;  %v5804_v26 = vmov 0  }
 0x200   : > { %v5417_v23 = vld [vmem:[%s6915_s9 + $0x38] sm:$0xff]   ;;  %4945 = vmatprep.subr.bf16.mxu0 %v5802_v24  ;;  %4905 = vmatprep.subr.bf16.mxu1 %v5416_v22  ;;  %v5419_v53 = vld [vmem:[%s6915_s9 + $0x30] sm:$0xff]   ;;  %v5421_v27 = vld [vmem:[%s6915_s9 + $0x28] sm:$0xff]   ;;  %vm2812_vm3 = vcmask 261120   ;;  %v2756_v43 = vsub.s32 1, %v6024_v47  ;;  %v6337_v49 = vsub.s32 0, %v6024_v47 }
 0x201   : > { %4949 = vmatprep.mubr.msk.bf16.mxu0 %vm5803_vm2, %v5802_v24  ;;  %4906 = vmatpush3.bf16.msra.mxu1 %v5417_v23  ;;  %v5422_v28 = vld [vmem:[%s6915_s9 + $0x60] sm:$0xff]   ;;  %v5424_v30 = vld [vmem:[%s6915_s9 + $0x58] sm:$0xff]   ;;  %v5428_v31 = vld [vmem:[%s6916_s6 + $0x8] sm:$0xff]   ;;  %vm4317_vm4 = vcmask 253952   ;;  %vm3668_vm5 = vcmask 1041408   ;;  %vm3664_vm6 = vcmask 31744  }
 0x202   : > { %4907 = vmatprep.subr.bf16.mxu1 %v5418_v42  ;;  %5415 = vset.pattern.permute.xlu0 %v5804_v26  ;;  %v5423_v29 = vld [vmem:[%s6915_s9 + $0x20] sm:$0xff]   ;;  %v5425_v10 = vld [vmem:[%s6915_s9 + $0x18] sm:$0xff]   ;;  %v5426_v35 = vld [vmem:[%s6915_s9 + $0x50] sm:$0xff]   ;;  %vm4204_vm7 = vcmask 24576   ;;  %vm4311_vm8 = vcmask 0  }
 0x203   : > { %4946 = vmatpush3.bf16.msra.mxu0 %v5428_v31  ;;  %v5431_v33 = vld [vmem:[%s6916_s6] sm:$0xff]   ;;  %v5427_v36 = vld [vmem:[%s6915_s9 + $0x10] sm:$0xff]   ;;  %v5429_v37 = vld [vmem:[%s6915_s9 + $0x48] sm:$0xff]  }
 0x204   : > { %4947 = vmatprep.subr.bf16.mxu0 %v5802_v24  ;;  %v2794_v38 = vld [vmem:[%s6917_s11] sm:$0x1]  ;;  %v2992_v34 = vld [vmem:[#allocation3] sm:$0x1]  ;;  %v5430_v45 = vld [vmem:[%s6915_s9 + $0x8] sm:$0xff]  }
 0x205   : > { %4908 = vmatpush3.bf16.msra.mxu1 %v5419_v53  ;;  %v2745_v39 = vld [vmem:[#allocation2] sm:$0x3]  ;;  %v2795_v40 = vpack.c.bf16 %v2794_v38, %v2794_v38  ;;  %2996 = vperm.xlu0 %5415, %v2992_v34   ;;  %v5434_v21 = vld [vmem:[%s6883_s13 + $0xe8] ss:$16 sps:$4 sm:$0xff]   ;;  %v5436_v22 = vld [vmem:[%s6883_s13 + $0xec] ss:$16 sps:$4 sm:$0xff]  }
 0x206   : > { %4909 = vmatprep.subr.bf16.mxu1 %v5420_v25  ;;  %v2746_v32 = vld [vmem:[%s6918_s7] sm:$0x3]  ;;  %v5439_v23 = vld [vmem:[%s6883_s13 + $0xcc] ss:$16 sps:$4 sm:$0xff]   ;;  %v5437_v42 = vld [vmem:[%s6883_s13 + $0xc8] ss:$16 sps:$4 sm:$0xff]  }
 0x207   : > { %4948 = vmatpush3.bf16.msra.mxu0 %v5431_v33  ;;  %v2747_v41 = vadd.f32 %v2746_v32, %v2745_v39  ;;  %v4757_v44 = vld [vmem:[%s6919_s30] ss:$0 sm:$0xff]  ;;  %v5442_v25 = vld [vmem:[%s6883_s13 + $0xac] ss:$16 sps:$4 sm:$0xff]   ;;  %v5478_v31 = vld [vmem:[%s6884_s14 + $0x4] ss:$16 sps:$4 sm:$0xff]  }
 0x208   : > { %3020 = vrot.lane.b32.xlu1 %v4757_v44, %s5805_s10  ;;  %v5432_v48 = vld [vmem:[%s6915_s9 + $0x40] sm:$0xff]   ;;  %v5449_v38 = vld [vmem:[%s6883_s13 + $0x48] ss:$16 sps:$4 sm:$0xff]   ;;  %v5454_v39 = vld [vmem:[%s6883_s13 + $0x2c] ss:$16 sps:$4 sm:$0xff]  }
 0x209   : > { %4910 = vmatpush3.bf16.msra.mxu1 %v5421_v27  ;;  %v2748_v46 = vmax.f32 %v2747_v41, 0.0  ;;  %v5433_v51 = vld [vmem:[%s6915_s9] sm:$0xff]   ;;  %v5440_v27 = vld [vmem:[%s6883_s13 + $0xa8] ss:$16 sps:$4 sm:$0xff]   ;;  %v5460_v34 = vld [vmem:[%s6883_s13 + $0x1ec] ss:$16 sps:$4 sm:$0xff]  }
 0x20a   : > { %4911 = vmatprep.subr.bf16.mxu1 %v5422_v28  ;;  %4950 = vmatmul.mubr.msk.bf16.vlgmr.msra.gmra.mxu0 %vm2812_vm3, %v2795_v40  ;;  %v2993_v63 = vld [vmem:[%s6920_s4] sm:$0x1]  ;;  %v5445_v28 = vld [vmem:[%s6883_s13 + $0x8c] ss:$16 sps:$4 sm:$0xff]   ;;  %v5452_v32 = vld [vmem:[%s6883_s13 + $0x28] ss:$16 sps:$4 sm:$0xff]  }
 0x20b   : > { %3191 = vmatprep.mubr.bf16.mxu0 %v5804_v26  ;;  %v2757_v50 = vrot.slane %v2748_v46, %v2756_v43  ;;  %v2753_v54 = vrot.slane %v2748_v46, %v6337_v49  ;;  %v3005_v5 = vld [vmem:[%s6882_s12] sm:$0x1]  ;;  %v5457_v40 = vld [vmem:[%s6883_s13 + $0xc] ss:$16 sps:$4 sm:$0xff]   ;;  %v5455_v41 = vld [vmem:[%s6883_s13 + $0x8] ss:$16 sps:$4 sm:$0xff]  }
 0x20c   : > { %v5476_v33 = vld [vmem:[%s6884_s14] ss:$16 sps:$4 sm:$0xff]   ;;  %v5458_v44 = vld [vmem:[%s6883_s13 + $0x1e8] ss:$16 sps:$4 sm:$0xff]  }
 0x20d   : > { %4912 = vmatpush3.bf16.msra.mxu1 %v5423_v29  ;;  %v6345_v52 = vpack.c.bf16 %v2757_v50, %v2757_v50  ;;  %v6349_v55 = vpack.c.bf16 %v2753_v54, %v2753_v54  ;;  %v5470_v29 = vld [vmem:[%s6884_s14 + $0x20] ss:$16 sps:$4 sm:$0xff]   ;;  %v5461_v46 = vld [vmem:[%s6883_s13 + $0x1c8] ss:$16 sps:$4 sm:$0xff]  }
 0x20e   : > { %4913 = vmatprep.subr.bf16.mxu1 %v5424_v30  ;;  %v5472_v30 = vld [vmem:[%s6884_s14 + $0x24] ss:$16 sps:$4 sm:$0xff]   ;;  %v5464_v50 = vld [vmem:[%s6883_s13 + $0x1a8] ss:$16 sps:$4 sm:$0xff]  }
 0x20f   : > { %2984 = vmatprep.mubr.bf16.mxu1 %v6345_v52  ;;  %3171 = vmatprep.subr.bf16.mxu0 %v5472_v30  ;;  %v5467_v54 = vld [vmem:[%s6883_s13 + $0x188] ss:$16 sps:$4 sm:$0xff]   ;;  %v5494_v30 = vld [vmem:[%s6883_s13 + $0xe0] ss:$16 sps:$4 sm:$0xff]  }
 0x210   : > { %3172 = vmatpush1.bf16.msra.mxu0 %v5470_v29 }
 0x211   : > { %4914 = vmatpush3.bf16.msra.mxu1 %v5425_v10  ;;  %v5443_v10 = vld [vmem:[%s6883_s13 + $0x88] ss:$16 sps:$4 sm:$0xff]   ;;  %3173 = vmatprep.subr.bf16.mxu0 %v5478_v31  ;;  %v5499_v31 = vld [vmem:[%s6883_s13 + $0xc4] ss:$16 sps:$4 sm:$0xff]  }
 0x212   : > { %4915 = vmatprep.subr.bf16.mxu1 %v5426_v35  ;;  %v5448_v35 = vld [vmem:[%s6883_s13 + $0x6c] ss:$16 sps:$4 sm:$0xff]  }
 0x214   : > { %3174 = vmatpush1.bf16.msra.mxu0 %v5476_v33  ;;  %v5502_v33 = vld [vmem:[%s6883_s13 + $0xa4] ss:$16 sps:$4 sm:$0xff]  }
 0x215   : > { %4916 = vmatpush3.bf16.msra.mxu1 %v5427_v36  ;;  %v5446_v36 = vld [vmem:[%s6883_s13 + $0x68] ss:$16 sps:$4 sm:$0xff]  }
 0x216   : > { %4917 = vmatprep.subr.bf16.mxu1 %v5429_v37  ;;  %v5451_v37 = vld [vmem:[%s6883_s13 + $0x4c] ss:$16 sps:$4 sm:$0xff]  }
 0x219   : > { %4918 = vmatpush3.bf16.msra.mxu1 %v5430_v45  ;;  %v5463_v45 = vld [vmem:[%s6883_s13 + $0x1cc] ss:$16 sps:$4 sm:$0xff]  }
 0x21a   : > { %4919 = vmatprep.subr.bf16.mxu1 %v5432_v48  ;;  %v5466_v48 = vld [vmem:[%s6883_s13 + $0x1ac] ss:$16 sps:$4 sm:$0xff]  }
 0x21d   : > { %4920 = vmatpush3.bf16.msra.mxu1 %v5433_v51  ;;  %v5469_v51 = vld [vmem:[%s6883_s13 + $0x18c] ss:$16 sps:$4 sm:$0xff]  }
 0x21e   : > { %3602 = vmatprep.subr.bf16.mxu1 %v5436_v22 }
 0x220   : > { %2985 = vmatmul.mubr.bf16.vlgmr.msra.gmra.mxu1 %v6349_v55 }
 0x221   : > { %3634 = vmatprep.mubr.bf16.mxu1 %v6345_v52  ;;  %3603 = vmatpush1.bf16.msra.mxu1 %v5434_v21  ;;  %v3767_v21 = vld [vmem:[%s6921_s8] sm:$0x1]  ;;  %s6923_s8 = sld [smem:[#allocation27_spill]] }
 0x222   : > { %3604 = vmatprep.subr.bf16.mxu1 %v5439_v23  ;;  %v6536_v22 = vpack.c.bf16 %v3767_v21, %v3767_v21  ;;  %v5567_v21 = vld [vmem:[%s6886_s16 + $0xe8] ss:$16 sps:$4 sm:$0xff]  }
 0x225   : > { %3605 = vmatpush1.bf16.msra.mxu1 %v5437_v42  ;;  %v5482_v42 = vld [vmem:[%s6884_s14 + $0x28] ss:$16 sps:$4 sm:$0xff]  }
 0x226   : > { %3606 = vmatprep.subr.bf16.mxu1 %v5442_v25 }
 0x229   : > { %3607 = vmatpush1.bf16.msra.mxu1 %v5440_v27  ;;  %v5488_v27 = vld [vmem:[%s6884_s14 + $0x8] ss:$16 sps:$4 sm:$0xff]  }
 0x22a   : > { %3608 = vmatprep.subr.bf16.mxu1 %v5445_v28  ;;  %v5496_v28 = vld [vmem:[%s6883_s13 + $0xe4] ss:$16 sps:$4 sm:$0xff]  }
 0x22d   : > { %3609 = vmatpush1.bf16.msra.mxu1 %v5443_v10  ;;  %v5497_v10 = vld [vmem:[%s6883_s13 + $0xc0] ss:$16 sps:$4 sm:$0xff]  }
 0x22e   : > { %3610 = vmatprep.subr.bf16.mxu1 %v5448_v35  ;;  %v5500_v35 = vld [vmem:[%s6883_s13 + $0xa0] ss:$16 sps:$4 sm:$0xff]  }
 0x231   : > { %3611 = vmatpush1.bf16.msra.mxu1 %v5446_v36  ;;  %v5505_v36 = vld [vmem:[%s6883_s13 + $0x84] ss:$16 sps:$4 sm:$0xff]  }
 0x232   : > { %3612 = vmatprep.subr.bf16.mxu1 %v5451_v37  ;;  %v5508_v37 = vld [vmem:[%s6883_s13 + $0x64] ss:$16 sps:$4 sm:$0xff]  }
 0x235   : > { %3613 = vmatpush1.bf16.msra.mxu1 %v5449_v38  ;;  %v5506_v38 = vld [vmem:[%s6883_s13 + $0x60] ss:$16 sps:$4 sm:$0xff]  }
 0x236   : > { %3614 = vmatprep.subr.bf16.mxu1 %v5454_v39  ;;  %v5511_v39 = vld [vmem:[%s6883_s13 + $0x44] ss:$16 sps:$4 sm:$0xff]  }
 0x239   : > { %3615 = vmatpush1.bf16.msra.mxu1 %v5452_v32  ;;  %v5509_v32 = vld [vmem:[%s6883_s13 + $0x40] ss:$16 sps:$4 sm:$0xff]  }
 0x23a   : > { %3616 = vmatprep.subr.bf16.mxu1 %v5457_v40  ;;  %v5514_v40 = vld [vmem:[%s6883_s13 + $0x24] ss:$16 sps:$4 sm:$0xff]  }
 0x23d   : > { %3617 = vmatpush1.bf16.msra.mxu1 %v5455_v41  ;;  %v5512_v41 = vld [vmem:[%s6883_s13 + $0x20] ss:$16 sps:$4 sm:$0xff]  }
 0x23e   : > { %3618 = vmatprep.subr.bf16.mxu1 %v5460_v34  ;;  %v5517_v34 = vld [vmem:[%s6883_s13 + $0x4] ss:$16 sps:$4 sm:$0xff]  }
 0x241   : > { %3619 = vmatpush2.bf16.msra.mxu1 %v5458_v44  ;;  %v5515_v44 = vld [vmem:[%s6883_s13] ss:$16 sps:$4 sm:$0xff]  }
 0x242   : > { %3620 = vmatprep.subr.bf16.mxu1 %v5463_v45  ;;  %v5520_v45 = vld [vmem:[%s6883_s13 + $0x1e4] ss:$16 sps:$4 sm:$0xff]  }
 0x245   : > { %3621 = vmatpush2.bf16.msra.mxu1 %v5461_v46  ;;  %v5518_v46 = vld [vmem:[%s6883_s13 + $0x1e0] ss:$16 sps:$4 sm:$0xff]  }
 0x246   : > { %3622 = vmatprep.subr.bf16.mxu1 %v5466_v48  ;;  %v5523_v48 = vld [vmem:[%s6883_s13 + $0x1c4] ss:$16 sps:$4 sm:$0xff]  }
 0x249   : > { %3623 = vmatpush2.bf16.msra.mxu1 %v5464_v50  ;;  %v5521_v50 = vld [vmem:[%s6883_s13 + $0x1c0] ss:$16 sps:$4 sm:$0xff]  }
 0x24a   : > { %3624 = vmatprep.subr.bf16.mxu1 %v5469_v51  ;;  %v5526_v51 = vld [vmem:[%s6883_s13 + $0x1a4] ss:$16 sps:$4 sm:$0xff]  }
 0x24d   : > { %3625 = vmatpush2.bf16.msra.mxu1 %v5467_v54  ;;  %v5524_v54 = vld [vmem:[%s6883_s13 + $0x1a0] ss:$16 sps:$4 sm:$0xff]  }
 0x27a   : > { %v3021_v17 = vpop.permute.xlu1 %3020 }
 0x280   : > { %v2997_v60 = vpop.permute.xlu0 %2996 }
 0x281   : > { %v3002_v61 = vrot.slane %v2997_v60, %v6337_v49  ;;  %v5484_v60 = vld [vmem:[%s6884_s14 + $0x2c] ss:$16 sps:$4 sm:$0xff]  }
 0x282   : > { %3212 = vmatprep.subr.bf16.mxu0 %v5484_v60 }
 0x283   : > { %v3003_v1 = vmul.f32 %v3002_v61, %v2993_v63  ;;  %v5487_v61 = vld [vmem:[%s6883_s13 + $0x12c] ss:$16 sps:$4 sm:$0xff]  }
 0x284   : > { %v5493_v63 = vld [vmem:[%s6883_s13 + $0x10c] ss:$16 sps:$4 sm:$0xff]  }
 0x2ca   : > { %v2850_v56 = vpop.f32.mrf.mxu0 }
 0x2cc   : > { %v4951_v57 = vpop.f32.mrf.mxu0 }
 0x2cd   : > { %v5473_v57 = vld [vmem:[%s6883_s13 + $0x168] ss:$16 sps:$4 sm:$0xff]  }
 0x2ce   : > { %v2853_v58 = vpop.f32.mrf.mxu0 }
 0x2cf   : > { %v5481_v58 = vld [vmem:[%s6883_s13 + $0x14c] ss:$16 sps:$4 sm:$0xff]  }
 0x2d0   : > { %v4952_v59 = vpop.f32.mrf.mxu0 }
 0x2d1   : > { %v5479_v59 = vld [vmem:[%s6883_s13 + $0x148] ss:$16 sps:$4 sm:$0xff]  }
 0x2e0   : > { %v4921_v62 = vpop.f32.mrf.mxu1 }
 0x2e2   : > { %v4922_v0 = vpop.f32.mrf.mxu1 }
 0x2e3   : > { %v4923_v2 = vadd.f32 %v4922_v0, %v4921_v62  ;;  %v5485_v62 = vld [vmem:[%s6883_s13 + $0x128] ss:$16 sps:$4 sm:$0xff]  }
 0x2e4   : > { %v4924_v3 = vpop.f32.mrf.mxu1  ;;  %v5491_v0 = vld [vmem:[%s6883_s13 + $0x108] ss:$16 sps:$4 sm:$0xff]  }
 0x2e5   : > { %v2987_v4 = vadd.f32 %v4923_v2, %v2850_v56  ;;  %v5475_v56 = vld [vmem:[%s6883_s13 + $0x16c] ss:$16 sps:$4 sm:$0xff]  }
 0x2e6   : > { %v4925_v6 = vpop.f32.mrf.mxu1  ;;  %3626 = vmatprep.subr.bf16.mxu1 %v5475_v56  ;;  %v5532_v56 = vld [vmem:[%s6883_s13 + $0x184] ss:$16 sps:$4 sm:$0xff]  }
 0x2e7   : > { %v3004_v7 = vadd.f32 %v3003_v1, %v2987_v4  ;;  %3627 = vmatpush2.bf16.msra.mxu1 %v5473_v57  ;;  %v5529_v4 = vld [vmem:[%s6886_s16 + $0xe4] ss:$16 sps:$4 sm:$0xff]   ;;  %v5530_v57 = vld [vmem:[%s6883_s13 + $0x180] ss:$16 sps:$4 sm:$0xff]  }
 0x2e8   : > { %3628 = vmatprep.subr.bf16.mxu1 %v5481_v58  ;;  %v5535_v6 = vld [vmem:[%s6886_s16 + $0xc4] ss:$16 sps:$4 sm:$0xff]  }
 0x2e9   : > { %v3006_v8 = vadd.f32 %v3005_v5, %v3004_v7  ;;  %v5527_v5 = vld [vmem:[%s6886_s16 + $0xe0] ss:$16 sps:$4 sm:$0xff]   ;;  %v5538_v58 = vld [vmem:[%s6883_s13 + $0x164] ss:$16 sps:$4 sm:$0xff]  }
 0x2ea   : > { %v5533_v7 = vld [vmem:[%s6886_s16 + $0xc0] ss:$16 sps:$4 sm:$0xff]  }
 0x2eb   : > { %5607 = vtanh.f32 %v3006_v8  ;;  %v4756_v11 = vmul.f32 -1.442695, %v3006_v8  ;;  %3629 = vmatpush2.bf16.msra.mxu1 %v5479_v59  ;;  %v5541_v8 = vld [vmem:[%s6886_s16 + $0xa4] ss:$16 sps:$4 sm:$0xff]   ;;  %v5808_v59 = vmov 1983009808  }
 0x2ec   : > { %3630 = vmatprep.subr.bf16.mxu1 %v5487_v61  ;;  %v3649_v60 = vunpack.c.l.s4 %v5808_v59  ;;  %v5536_v61 = vld [vmem:[%s6883_s13 + $0x160] ss:$16 sps:$4 sm:$0xff]  }
 0x2ed   : > { %5609 = vpow2.f32 %v4756_v11  ;;  %v5547_v11 = vld [vmem:[%s6886_s16 + $0x84] ss:$16 sps:$4 sm:$0xff]  }
 0x2ee   : > { %v5598_v59 = vld [vmem:[%s6890_s20 + $0x20] sm:$0xff]  }
 0x2ef   : > { %3631 = vmatpush2.bf16.msra.mxu1 %v5485_v62  ;;  %v5544_v62 = vld [vmem:[%s6883_s13 + $0x144] ss:$16 sps:$4 sm:$0xff]  }
 0x2f0   : > { %3632 = vmatprep.subr.bf16.mxu1 %v5493_v63  ;;  %v3650_v63 = vunpack.c.0.s8 %v3649_v60  ;;  %v5599_v60 = vld [vmem:[%s6888_s18 + $0x18] sm:$0xff]  }
 0x2f3   : > { %3633 = vmatpush2.bf16.msra.mxu1 %v5491_v0  ;;  %v5542_v0 = vld [vmem:[%s6883_s13 + $0x140] ss:$16 sps:$4 sm:$0xff]  }
 0x2f4   : > { %3961 = vmatprep.subr.bf16.mxu1 %v5529_v4  ;;  %v5548_v4 = vld [vmem:[%s6883_s13 + $0x120] ss:$16 sps:$4 sm:$0xff]  }
 0x2f6   : > { %3635 = vmatmul.mubr.bf16.vlgmr.msra.gmra.mxu1 %v6349_v55 }
 0x2f7   : > { %3993 = vmatprep.mubr.bf16.mxu1 %v5804_v26  ;;  %3962 = vmatpush1.bf16.msra.mxu1 %v5527_v5  ;;  %v5556_v5 = vld [vmem:[%s6883_s13 + $0x104] ss:$16 sps:$4 sm:$0xff]  }
 0x2f8   : > { %v5608_v9 = vpop.eup %5607  ;;  %3963 = vmatprep.subr.bf16.mxu1 %v5535_v6 }
 0x2f9   : > { %3025 = vrot.lane.b32.xlu0 %v5608_v9, %s5806_s21  ;;  %v5539_v9 = vld [vmem:[%s6886_s16 + $0xa0] ss:$16 sps:$4 sm:$0xff]  }
 0x2fa   : > { %v5610_v12 = vpop.eup %5609 }
 0x2fb   : > { %v3011_v13 = vadd.f32 1.0, %v5610_v12  ;;  %3964 = vmatpush1.bf16.msra.mxu1 %v5533_v7  ;;  %v5545_v12 = vld [vmem:[%s6886_s16 + $0x80] ss:$16 sps:$4 sm:$0xff]  }
 0x2fc   : > { %3965 = vmatprep.subr.bf16.mxu1 %v5541_v8  ;;  %v5554_v8 = vld [vmem:[%s6883_s13 + $0x100] ss:$16 sps:$4 sm:$0xff]  }
 0x2fd   : > { %5611 = vrcp.f32 %v3011_v13  ;;  %v5553_v13 = vld [vmem:[%s6886_s16 + $0x64] ss:$16 sps:$4 sm:$0xff]  }
 0x2ff   : > { %3966 = vmatpush1.bf16.msra.mxu1 %v5539_v9 }
 0x300   : > { %3967 = vmatprep.subr.bf16.mxu1 %v5547_v11 }
 0x303   : > { %3968 = vmatpush1.bf16.msra.mxu1 %v5545_v12 }
 0x304   : > { %3969 = vmatprep.subr.bf16.mxu1 %v5553_v13 }
 0x30a   : > { %v6360_v14 = vpop.eup %5611 }
 0x30b   : > { %v3023_v18 = vmul.f32 %v6360_v14, %v3021_v17  ;;  %v5562_v17 = vld [vmem:[%s6886_s16 + $0x24] ss:$16 sps:$4 sm:$0xff]  }
 0x36b   : > { %v3026_v15 = vpop.permute.xlu0 %3025 }
 0x36c   : > { %v3028_v16 = vmul.f32 %v6360_v14, %v3026_v15  ;;  %v5559_v15 = vld [vmem:[%s6886_s16 + $0x44] ss:$16 sps:$4 sm:$0xff]  }
 0x36e   : > { %3030 = vrot.lane.b32.xlu1 %v3028_v16, %s5805_s10  ;;  %v5557_v16 = vld [vmem:[%s6886_s16 + $0x40] ss:$16 sps:$4 sm:$0xff]  }
 0x3e0   : > { %v3031_v19 = vpop.permute.xlu1 %3030 }
 0x3e1   : > { %v6365_v20 = vadd.f32 %v3031_v19, %v3023_v18  ;;  %v5560_v18 = vld [vmem:[%s6886_s16 + $0x20] ss:$16 sps:$4 sm:$0xff]   ;;  %v5565_v19 = vld [vmem:[%s6886_s16 + $0x4] ss:$16 sps:$4 sm:$0xff]  }
 0x3e3   : > { %5613 = vtanh.f32 %v6365_v20 }
 0x3f0   : > { %v5614_v53 = vpop.eup %5613 }
 0x3f1   : > { %3036 = vrot.lane.b32.xlu0 %v5614_v53, %s5806_s21  ;;  %s5807_s21 = smov 96   ;;  %v5490_v53 = vld [vmem:[%s6884_s14 + $0xc] ss:$16 sps:$4 sm:$0xff]  }
 0x463   : > { %v3037_v1 = vpop.permute.xlu0 %3036 }
 0x464   : > { %v3039_v2 = vmul.f32 %v6360_v14, %v3037_v1  ;;  %v5551_v14 = vld [vmem:[%s6886_s16 + $0x60] ss:$16 sps:$4 sm:$0xff]   ;;  %v5550_v1 = vld [vmem:[%s6883_s13 + $0x124] ss:$16 sps:$4 sm:$0xff]  }
 0x465   : > { %3970 = vmatpush1.bf16.msra.mxu1 %v5551_v14  ;;  %v3643_v14 = vld [vmem:[%s6922_s0] sm:$0x1] }
 0x466   : > { %v3104_v3 = vpack.c.bf16 %v3039_v2, %v3039_v2  ;;  %4314 = vrot.lane.b32.xlu0 %v3039_v2, %s5805_s10  ;;  %3971 = vmatprep.subr.bf16.mxu1 %v5559_v15  ;;  %v3653_v2 = vsub.s32 %v3650_v63, %v6024_v47  ;;  %v6660_v15 = vpop.f32.mrf.mxu1  ;;  %v5602_v63 = vld [vmem:[%s6890_s20 + $0x10] sm:$0xff]  }
 0x468   : > { %3114 = vrot.lane.b32.xlu1 %v3104_v3, %s5805_s10  ;;  %v3645_v3 = vld [vmem:[%s6885_s15] sm:$0xff] }
 0x469   : > { %3972 = vmatpush1.bf16.msra.mxu1 %v5557_v16  ;;  %v3654_v6 = vrot.slane %v3645_v3, %v3653_v2  ;;  %v3647_v7 = vcombine.high %v3645_v3, %v3645_v3  ;;  %v6662_v16 = vpop.f32.mrf.mxu1  ;;  %v5606_v3 = vld [vmem:[%s6890_s20] sm:$0xff]  }
 0x46a   : > { %3973 = vmatprep.subr.bf16.mxu1 %v5562_v17  ;;  %v3644_v17 = vpack.c.bf16 %v3643_v14, %v3643_v14 }
 0x46b   : > { %v3662_v9 = vcombine.high %v3654_v6, %v3654_v6  ;;  %v3661_v11 = vrot.slane %v3647_v7, %v3653_v2  ;;  %v3670_v12 = vsel %vm3668_vm5, %v3654_v6, 0  ;;  %v5605_v2 = vld [vmem:[%s6888_s18] sm:$0xff]  }
 0x46c   : > { %4320 = vrot.lane.b32.xlu1 %v6365_v20, %s5807_s21  ;;  %v5563_v20 = vld [vmem:[%s6886_s16] ss:$16 sps:$4 sm:$0xff]  }
 0x46d   : > { %3974 = vmatpush1.bf16.msra.mxu1 %v5560_v18  ;;  %v3663_v13 = vcombine.high %v3661_v11, %v3661_v11  ;;  %v3640_v18 = vpop.f32.mrf.mxu1 }
 0x46e   : > { %3975 = vmatprep.subr.bf16.mxu1 %v5565_v19  ;;  %v3676_v19 = vsel %vm3668_vm5, %v3661_v11, 0 }
 0x471   : > { %3976 = vmatpush1.bf16.msra.mxu1 %v5563_v20  ;;  %v3641_v20 = vpop.f32.mrf.mxu1 }
 0x472   : > { %4953 = vmatprep.subr.bf16.mxu1 %v5802_v24 }
 0x474   : > { %3994 = vmatmul.mubr.bf16.vlgmr.msra.gmra.mxu1 %v6536_v22 }
 0x475   : > { %4969 = vmatprep.mubr.msk.bf16.mxu1 %vm5803_vm2, %v5802_v24 }
 0x4d8   : > { %v4315_v23 = vpop.permute.xlu0 %4314 }
 0x4d9   : > { %4318 = vst.msk [vmem:[#allocation9] sm:$0x1] %vm4317_vm4, %v4315_v23  ;;  %v5572_v23 = vld [vmem:[%s6886_s16 + $0xcc] ss:$16 sps:$4 sm:$0xff]  }
 0x4da   : > { %v3115_v25 = vpop.permute.xlu1 %3114 }
 0x4db   : > { %4766 = vmatmul.mubr.msk.bf16.vlgmr.msra.gmra.mxu0 %vm2812_vm3, %v3115_v25 }
 0x4dc   : > { %3213 = vmatpush1.bf16.msra.mxu0 %v5482_v42  ;;  %3232 = vmatprep.mubr.bf16.mxu0 %v5804_v26  ;;  %v5570_v42 = vld [vmem:[%s6886_s16 + $0xc8] ss:$16 sps:$4 sm:$0xff]  }
 0x4dd   : > { %3214 = vmatprep.subr.bf16.mxu0 %v5490_v53  ;;  %v5575_v53 = vld [vmem:[%s6886_s16 + $0xac] ss:$16 sps:$4 sm:$0xff]  }
 0x4de   : > { %v4321_v29 = vpop.permute.xlu1 %4320 }
 0x4df   : > { %4323 = vst.msk [vmem:[#allocation10] sm:$0x1] %vm4317_vm4, %v4321_v29  ;;  %v5579_v29 = vld [vmem:[%s6886_s16 + $0x68] ss:$16 sps:$4 sm:$0xff]  }
 0x4e0   : > { %3215 = vmatpush1.bf16.msra.mxu0 %v5488_v27  ;;  %v5578_v27 = vld [vmem:[%s6886_s16 + $0x8c] ss:$16 sps:$4 sm:$0xff]  }
 0x4e1   : > { %3561 = vmatprep.subr.bf16.mxu0 %v5496_v28  ;;  %v5581_v28 = vld [vmem:[%s6886_s16 + $0x6c] ss:$16 sps:$4 sm:$0xff]  }
 0x4e3   : > { %4767 = vmatmul.mubr.msk.bf16.vlgmr.msra.gmra.mxu0 %vm2812_vm3, %v3115_v25  ;;  %v5573_v25 = vld [vmem:[%s6886_s16 + $0xa8] ss:$16 sps:$4 sm:$0xff]  }
 0x4e4   : > { %3562 = vmatpush1.bf16.msra.mxu0 %v5494_v30  ;;  %3593 = vmatprep.mubr.bf16.mxu0 %v6345_v52  ;;  %v5503_v52 = vld [vmem:[%s6883_s13 + $0x80] ss:$16 sps:$4 sm:$0xff]   ;;  %v5584_v30 = vld [vmem:[%s6886_s16 + $0x4c] ss:$16 sps:$4 sm:$0xff]  }
 0x4e5   : > { %3563 = vmatprep.subr.bf16.mxu0 %v5499_v31  ;;  %v5582_v31 = vld [vmem:[%s6886_s16 + $0x48] ss:$16 sps:$4 sm:$0xff]  }
 0x4e8   : > { %3564 = vmatpush1.bf16.msra.mxu0 %v5497_v10  ;;  %v5587_v10 = vld [vmem:[%s6886_s16 + $0x2c] ss:$16 sps:$4 sm:$0xff]  }
 0x4e9   : > { %3565 = vmatprep.subr.bf16.mxu0 %v5502_v33  ;;  %v5585_v33 = vld [vmem:[%s6886_s16 + $0x28] ss:$16 sps:$4 sm:$0xff]  }
 0x4ec   : > { %3566 = vmatpush1.bf16.msra.mxu0 %v5500_v35  ;;  %v5590_v35 = vld [vmem:[%s6886_s16 + $0xc] ss:$16 sps:$4 sm:$0xff]  }
 0x4ed   : > { %3567 = vmatprep.subr.bf16.mxu0 %v5505_v36  ;;  %v5588_v36 = vld [vmem:[%s6886_s16 + $0x8] ss:$16 sps:$4 sm:$0xff]  }
 0x4f0   : > { %3568 = vmatpush1.bf16.msra.mxu0 %v5503_v52 }
 0x4f1   : > { %3569 = vmatprep.subr.bf16.mxu0 %v5508_v37 }
 0x4f4   : > { %3570 = vmatpush1.bf16.msra.mxu0 %v5506_v38 }
 0x4f5   : > { %3571 = vmatprep.subr.bf16.mxu0 %v5511_v39 }
 0x4f8   : > { %3572 = vmatpush1.bf16.msra.mxu0 %v5509_v32 }
 0x4f9   : > { %3573 = vmatprep.subr.bf16.mxu0 %v5514_v40 }
 0x4fc   : > { %3574 = vmatpush1.bf16.msra.mxu0 %v5512_v41  ;;  %v5591_v41 = vld [vmem:[%s6888_s18 + $0x38] sm:$0xff]  }
 0x4fd   : > { %3575 = vmatprep.subr.bf16.mxu0 %v5517_v34  ;;  %v5592_v34 = vld [vmem:[%s6890_s20 + $0x38] sm:$0xff]   ;;  %4954 = vmatpush3.bf16.msra.mxu1 %v5591_v41 }
 0x4fe   : > { %4955 = vmatprep.subr.bf16.mxu1 %v5802_v24 }
 0x500   : > { %3576 = vmatpush1.bf16.msra.mxu0 %v5515_v44 }
 0x501   : > { %3577 = vmatprep.subr.bf16.mxu0 %v5520_v45  ;;  %v5593_v45 = vld [vmem:[%s6888_s18 + $0x30] sm:$0xff]  }
 0x502   : > { %4956 = vmatpush3.bf16.msra.mxu1 %v5593_v45 }
 0x503   : > { %4957 = vmatprep.subr.bf16.mxu1 %v5802_v24 }
 0x504   : > { %3578 = vmatpush2.bf16.msra.mxu0 %v5518_v46  ;;  %v5594_v46 = vld [vmem:[%s6890_s20 + $0x30] sm:$0xff]  }
 0x505   : > { %3579 = vmatprep.subr.bf16.mxu0 %v5523_v48 }
 0x508   : > { %3580 = vmatpush2.bf16.msra.mxu0 %v5521_v50 }
 0x509   : > { %3581 = vmatprep.subr.bf16.mxu0 %v5526_v51  ;;  %v5595_v51 = vld [vmem:[%s6888_s18 + $0x28] sm:$0xff]  }
 0x50a   : > { %4958 = vmatpush3.bf16.msra.mxu1 %v5595_v51 }
 0x50b   : > { %4959 = vmatprep.subr.bf16.mxu1 %v5802_v24 }
 0x50c   : > { %3582 = vmatpush2.bf16.msra.mxu0 %v5524_v54  ;;  %v5596_v54 = vld [vmem:[%s6890_s20 + $0x28] sm:$0xff]  }
 0x50d   : > { %3583 = vmatprep.subr.bf16.mxu0 %v5532_v56 }
 0x510   : > { %3584 = vmatpush2.bf16.msra.mxu0 %v5530_v57 }
 0x511   : > { %3585 = vmatprep.subr.bf16.mxu0 %v5538_v58  ;;  %v5597_v58 = vld [vmem:[%s6888_s18 + $0x20] sm:$0xff]  }
 0x512   : > { %4960 = vmatpush3.bf16.msra.mxu1 %v5597_v58 }
 0x513   : > { %4961 = vmatprep.subr.bf16.mxu1 %v5802_v24 }
 0x514   : > { %3586 = vmatpush2.bf16.msra.mxu0 %v5536_v61  ;;  %v5600_v61 = vld [vmem:[%s6890_s20 + $0x18] sm:$0xff]  }
 0x515   : > { %3587 = vmatprep.subr.bf16.mxu0 %v5544_v62  ;;  %v5601_v62 = vld [vmem:[%s6888_s18 + $0x10] sm:$0xff]  }
 0x516   : > { %4962 = vmatpush3.bf16.msra.mxu1 %v5599_v60 }
 0x517   : > { %4963 = vmatprep.subr.bf16.mxu1 %v5802_v24 }
 0x518   : > { %3588 = vmatpush2.bf16.msra.mxu0 %v5542_v0  ;;  %v5603_v0 = vld [vmem:[%s6888_s18 + $0x8] sm:$0xff]  }
 0x519   : > { %3589 = vmatprep.subr.bf16.mxu0 %v5550_v1  ;;  %v5604_v1 = vld [vmem:[%s6890_s20 + $0x8] sm:$0xff]  }
 0x51a   : > { %4964 = vmatpush3.bf16.msra.mxu1 %v5601_v62 }
 0x51b   : > { %4965 = vmatprep.subr.bf16.mxu1 %v5802_v24 }
 0x51c   : > { %3590 = vmatpush2.bf16.msra.mxu0 %v5548_v4 }
 0x51d   : > { %3591 = vmatprep.subr.bf16.mxu0 %v5556_v5 }
 0x51e   : > { %4966 = vmatpush3.bf16.msra.mxu1 %v5603_v0  ;;  %v4222_v0 = vld [vmem:[#allocation4] sm:$0x1] }
 0x51f   : > { %4967 = vmatprep.subr.bf16.mxu1 %v5802_v24 }
 0x520   : > { %3592 = vmatpush2.bf16.msra.mxu0 %v5554_v8 }
 0x521   : > { %4832 = vmatprep.subr.msk.bf16.mxu0 %vm3668_vm5, %v3662_v9 }
 0x522   : > { %4968 = vmatpush3.bf16.msra.mxu1 %v5605_v2 }
 0x523   : > { %3594 = vmatmul.mubr.bf16.vlgmr.msra.gmra.mxu0 %v6349_v55  ;;  %v5569_v55 = vld [vmem:[%s6886_s16 + $0xec] ss:$16 sps:$4 sm:$0xff]  }
 0x524   : > { %3696 = vmatpush1.bf16.msra.mxu0 %v3670_v12  ;;  %3713 = vmatprep.mubr.bf16.mxu0 %v5804_v26 }
 0x525   : > { %4834 = vmatprep.subr.msk.bf16.mxu0 %vm3668_vm5, %v3663_v13 }
 0x52b   : > { %4833 = vmatmul.mubr.msk.bf16.vlgmr.msra.gmra.mxu0 %vm3664_vm6, %v3644_v17 }
 0x52c   : > { %3737 = vmatpush1.bf16.msra.mxu0 %v3676_v19  ;;  %3754 = vmatprep.mubr.bf16.mxu0 %v5804_v26 }
 0x52d   : > { %4002 = vmatprep.subr.bf16.mxu0 %v5569_v55  ;;  %v4047_v55 = vld [vmem:[%s6887_s17] sm:$0xf] }
 0x533   : > { %4835 = vmatmul.mubr.msk.bf16.vlgmr.msra.gmra.mxu0 %vm3664_vm6, %v3644_v17 }
 0x534   : > { %4003 = vmatpush1.bf16.msra.mxu0 %v5567_v21  ;;  %4034 = vmatprep.mubr.bf16.mxu0 %v5804_v26  ;;  %v5576_v26 = vld [vmem:[%s6886_s16 + $0x88] ss:$16 sps:$4 sm:$0xff]   ;;  %v6718_v52 = vpop.f32.mrf.mxu1  ;;  %v4056_v21 = vrot.slane %v4047_v55, %v2756_v43  ;;  %v4063_v43 = vsub.s32 3, %v6024_v47 }
 0x535   : > { %4004 = vmatprep.subr.bf16.mxu0 %v5572_v23 }
 0x536   : > { %v6720_v37 = vpop.f32.mrf.mxu1 }
 0x538   : > { %4005 = vmatpush1.bf16.msra.mxu0 %v5570_v42  ;;  %v3999_v38 = vpop.f32.mrf.mxu1  ;;  %v4052_v42 = vrot.slane %v4047_v55, %v6337_v49 }
 0x539   : > { %4006 = vmatprep.subr.bf16.mxu0 %v5575_v53 }
 0x53a   : > { %v4000_v39 = vpop.f32.mrf.mxu1 }
 0x53c   : > { %4007 = vmatpush1.bf16.msra.mxu0 %v5573_v25 }
 0x53d   : > { %4008 = vmatprep.subr.bf16.mxu0 %v5578_v27 }
 0x540   : > { %4009 = vmatpush1.bf16.msra.mxu0 %v5576_v26 }
 0x541   : > { %4010 = vmatprep.subr.bf16.mxu0 %v5581_v28 }
 0x544   : > { %4011 = vmatpush1.bf16.msra.mxu0 %v5579_v29 }
 0x545   : > { %4012 = vmatprep.subr.bf16.mxu0 %v5584_v30  ;;  %v4059_v30 = vsub.s32 2, %v6024_v47 }
 0x548   : > { %4013 = vmatpush1.bf16.msra.mxu0 %v5582_v31 }
 0x549   : > { %4014 = vmatprep.subr.bf16.mxu0 %v5587_v10 }
 0x54c   : > { %4015 = vmatpush1.bf16.msra.mxu0 %v5585_v33 }
 0x54d   : > { %4016 = vmatprep.subr.bf16.mxu0 %v5590_v35 }
 0x550   : > { %4017 = vmatpush1.bf16.msra.mxu0 %v5588_v36 }
 0x551   : > { %4973 = vmatprep.subr.bf16.mxu0 %v5802_v24 }
 0x553   : > { %4035 = vmatmul.mubr.bf16.vlgmr.msra.gmra.mxu0 %v6536_v22 }
 0x554   : > { %4989 = vmatprep.mubr.msk.bf16.mxu0 %vm5803_vm2, %v5802_v24  ;;  %4974 = vmatpush3.bf16.msra.mxu0 %v5592_v34 }
 0x555   : > { %4975 = vmatprep.subr.bf16.mxu0 %v5802_v24 }
 0x558   : > { %4976 = vmatpush3.bf16.msra.mxu0 %v5594_v46  ;;  %v4073_v46 = vld [vmem:[%s6923_s8] sm:$0x1] }
 0x559   : > { %4977 = vmatprep.subr.bf16.mxu0 %v5802_v24 }
 0x55c   : > { %4978 = vmatpush3.bf16.msra.mxu0 %v5596_v54 }
 0x55d   : > { %4979 = vmatprep.subr.bf16.mxu0 %v5802_v24 }
 0x560   : > { %4980 = vmatpush3.bf16.msra.mxu0 %v5598_v59 }
 0x561   : > { %4981 = vmatprep.subr.bf16.mxu0 %v5802_v24 }
 0x564   : > { %4982 = vmatpush3.bf16.msra.mxu0 %v5600_v61 }
 0x565   : > { %4983 = vmatprep.subr.bf16.mxu0 %v5802_v24 }
 0x568   : > { %4984 = vmatpush3.bf16.msra.mxu0 %v5602_v63  ;;  %v4115_v63 = vld [vmem:[%s6889_s19] sm:$0x1] }
 0x569   : > { %4985 = vmatprep.subr.bf16.mxu0 %v5802_v24 }
 0x56c   : > { %4986 = vmatpush3.bf16.msra.mxu0 %v5604_v1 }
 0x56d   : > { %4987 = vmatprep.subr.bf16.mxu0 %v5802_v24 }
 0x570   : > { %4988 = vmatpush3.bf16.msra.mxu0 %v5606_v3 }
 0x59b   : > { %v3193_v32 = vpop.f32.mrf.mxu0 }
 0x59d   : > { %v3195_v40 = vpop.f32.mrf.mxu0 }
 0x59f   : > { %v3197_v22 = vpop.f32.mrf.mxu0 }
 0x5a1   : > { %v3198_v44 = vpop.f32.mrf.mxu0 }
 0x5a3   : > { %v6736_v48 = vpop.f32.mrf.mxu0 }
 0x5a4   : > { %v3637_v33 = vadd.f32 %v6660_v15, %v6736_v48 }
 0x5a5   : > { %v6740_v50 = vpop.f32.mrf.mxu0 }
 0x5a6   : > { %v3639_v49 = vadd.f32 %v6662_v16, %v6740_v50 }
 0x5a7   : > { %v3238_v56 = vpop.f32.mrf.mxu0 }
 0x5a9   : > { %v3239_v57 = vpop.f32.mrf.mxu0 }
 0x5e3   : > { %v3595_v4 = vpop.f32.mrf.mxu0 }
 0x5e4   : > { %v3596_v13 = vadd.f32 %v3595_v4, %v3193_v32 }
 0x5e5   : > { %v3597_v5 = vpop.f32.mrf.mxu0 }
 0x5e6   : > { %v3598_v12 = vadd.f32 %v3597_v5, %v3195_v40  ;;  %v4064_v40 = vrot.slane %v4047_v55, %v4063_v43 }
 0x5e7   : > { %v3599_v6 = vpop.f32.mrf.mxu0 }
 0x5e9   : > { %v3600_v7 = vpop.f32.mrf.mxu0 }
 0x5eb   : > { %v3715_v8 = vpop.f32.mrf.mxu0 }
 0x5ec   : > { %v3763_v18 = vadd.f32 %v3715_v8, %v3596_v13 }
 0x5ed   : > { %v3717_v9 = vpop.f32.mrf.mxu0 }
 0x5ee   : > { %v3764_v17 = vadd.f32 %v3717_v9, %v3598_v12  ;;  %v4043_v23 = vadd.f32 %v6718_v52, %v3763_v18  ;;  %v4060_v52 = vrot.slane %v4047_v55, %v4059_v30 }
 0x5ef   : > { %v3719_v11 = vpop.f32.mrf.mxu0 }
 0x5f0   : > { %v4044_v20 = vadd.f32 %v6720_v37, %v3764_v17  ;;  %v4069_v26 = vadd.f32 %v4052_v42, %v4043_v23 }
 0x5f1   : > { %v3720_v14 = vpop.f32.mrf.mxu0 }
 0x5f2   : > { %v4070_v27 = vadd.f32 %v4056_v21, %v4044_v20  ;;  %v4868_v29 = vmul.f32 -1.442695, %v4069_v26 }
 0x5f3   : > { %v3756_v19 = vpop.f32.mrf.mxu0 }
 0x5f4   : > { %v4869_v28 = vmul.f32 -1.442695, %v4070_v27  ;;  %v3765_v36 = vadd.f32 %v3756_v19, %v3637_v33 }
 0x5f5   : > { %v3758_v24 = vpop.f32.mrf.mxu0 }
 0x5f6   : > { %5615 = vpow2.f32 %v4869_v28  ;;  %v3766_v39 = vadd.f32 %v3758_v24, %v3639_v49 }
 0x5f7   : > { %v3760_v53 = vpop.f32.mrf.mxu0  ;;  %5617 = vpow2.f32 %v4868_v29 }
 0x5f9   : > { %v3761_v25 = vpop.f32.mrf.mxu0 }
 0x603   : > { %v5616_v31 = vpop.eup %5615 }
 0x604   : > { %v5618_v10 = vpop.eup %5617  ;;  %v4083_v35 = vadd.f32 1.0, %v5616_v31 }
 0x605   : > { %v4077_v37 = vadd.f32 1.0, %v5618_v10 }
 0x606   : > { %5619 = vrcp.f32 %v4083_v35 }
 0x607   : > { %5621 = vrcp.f32 %v4077_v37 }
 0x613   : > { %v4036_v38 = vpop.f32.mrf.mxu0  ;;  %v5620_v16 = vpop.eup %5619 }
 0x614   : > { %v4045_v32 = vadd.f32 %v4036_v38, %v3765_v36  ;;  %v5622_v48 = vpop.eup %5621  ;;  %v4093_v51 = vmul.f32 %v5620_v16, %v4073_v46 }
 0x615   : > { %v4038_v41 = vpop.f32.mrf.mxu0 }
 0x616   : > { %v4071_v34 = vadd.f32 %v4060_v52, %v4045_v32  ;;  %v4046_v22 = vadd.f32 %v4038_v41, %v3766_v39 }
 0x617   : > { %v4040_v44 = vpop.f32.mrf.mxu0 }
 0x618   : > { %5623 = vtanh.f32 %v4071_v34  ;;  %v4072_v15 = vadd.f32 %v4064_v40, %v4046_v22 }
 0x619   : > { %v4041_v47 = vpop.f32.mrf.mxu0 }
 0x61a   : > { %v4870_v45 = vmul.f32 -1.442695, %v4072_v15 }
 0x61c   : > { %5625 = vpow2.f32 %v4870_v45 }
 0x625   : > { %v5624_v50 = vpop.eup %5623 }
 0x626   : > { %v4094_v54 = vmul.f32 %v5624_v50, %v5622_v48 }
 0x628   : > { %v4095_v56 = vadd.f32 %v4094_v54, %v4093_v51 }
 0x629   : > { %v5626_v57 = vpop.eup %5625 }
 0x62a   : > { %4325 = vst [vmem:[#allocation13] sm:$0x1] %v4095_v56  ;;  %v4090_v58 = vadd.f32 1.0, %v5626_v57  ;;  %5627 = vtanh.f32 %v4095_v56 }
 0x62c   : > { %5629 = vrcp.f32 %v4090_v58 }
 0x637   : > { %v5628_v59 = vpop.eup %5627 }
 0x639   : > { %v5630_v60 = vpop.eup %5629 }
 0x63a   : > { %v4097_v61 = vmul.f32 %v5630_v60, %v5628_v59 }
 0x63c   : > { %v4098_v62 = vpack.c.bf16 %v4097_v61, %v4097_v61  ;;  %4324 = vst [vmem:[#allocation12] sm:$0x1] %v4097_v61 }
 0x63e   : > { %4970 = vmatmul.mubr.bf16.vlgmr.msra.gmra.mxu1 %v4098_v62  ;;  %4990 = vmatmul.mubr.bf16.vlgmr.msra.gmra.mxu0 %v4098_v62 }
 0x6fe   : > { %v4198_v1 = vpop.f32.mrf.mxu1  ;;  %v4305_v2 = vpop.f32.mrf.mxu0 }
 0x6ff   : > { %v4199_v3 = vadd.f32 %v4198_v1, %v4115_v63  ;;  %v4306_v4 = vadd.f32 %v4305_v2, %v4222_v0 }
 0x700   : > { %v4971_v5 = vpop.f32.mrf.mxu1  ;;  %v4991_v6 = vpop.f32.mrf.mxu0 }
 0x701   : > { %4205 = vst.msk [vmem:[#allocation5] sm:$0x1] %vm4204_vm7, %v4199_v3 }
 0x702   : > { %4312 = vst.msk [vmem:[#allocation7] sm:$0x1] %vm4311_vm8, %v4306_v4  ;;  %v4201_v7 = vpop.f32.mrf.mxu1  ;;  %v4308_v8 = vpop.f32.mrf.mxu0 }
 0x704   : > { %v4972_v9 = vpop.f32.mrf.mxu1  ;;  %v4992_v11 = vpop.f32.mrf.mxu0 }
 0x705 PF: > { %p5017_p7 = scmp.eq.s32.totalorder %s5967_s28, 3  ;;  %s5809_s0 = smov [#allocation7]  }
 0x706   : > { %s4344_s29 = sshll.u32 %s5809_s0, 4  ;;  %s5810_s1 = smov [#allocation10]   ;;  %s4345_s29 = int_to_ptr.vmem [resolvable:$true] %s4344_s29 }
 0x707   : > { %s4366_s11 = sshll.u32 %s5810_s1, 4  ;;  %s5631_s2 = scalar_lea.vmem %s4345_s29, 16  ;;  %s4367_s11 = int_to_ptr.vmem [resolvable:$true] %s4366_s11 }
 0x708   : > { %p5632_p8 = scmp.ne.s32.totalorder %s4345_s29, %s5631_s2  ;;  %s5637_s3 = scalar_lea.vmem %s4345_s29, 32 }
 0x709   : > { %p5638_p11 = scmp.lt.s32.totalorder %s4345_s29, %s4345_s29  ;;  %p5639_p12 = scmp.lt.s32.totalorder %s5637_s3, %s5631_s2 }
 0x70a   : > { %p5633_p9 = pnand %p5632_p8, %p5017_p7 }
 0x70b   : > { %p5640_p13 = por %p5639_p12, %p5638_p11 }
 0x70c   : > { %p5634_p10 = pneg %p5633_p9 }
 0x70e   : > { %p5641_p0 = pnand %p5640_p13, %p5634_p10 }
 0x710   : > { %5644 = shalt.err (!%p5641_p0)
}
 0x711   : > { %4996 = dma.vmem_to_hbm [thread:$0]  (%p5017_p7), %s4345_s29, 16, %s6892_s23, [#allocation8]  }
 0x712   : > { %s5655_s4 = scalar_lea.vmem %s4367_s11, 16  ;;  %s5661_s8 = scalar_lea.vmem %s4367_s11, 32 }
 0x713   : > { %p5656_p1 = scmp.ne.s32.totalorder %s4367_s11, %s5655_s4  ;;  %p5662_p4 = scmp.lt.s32.totalorder %s4367_s11, %s4367_s11 }
 0x714   : > { %p5663_p5 = scmp.lt.s32.totalorder %s5661_s8, %s5655_s4 }
 0x715   : > { %p5657_p2 = pnand %p5656_p1, %p5017_p7 }
 0x716   : > { %p5664_p6 = por %p5663_p5, %p5662_p4 }
 0x717   : > { %p5658_p3 = pneg %p5657_p2 }
 0x719   : > { %p5665_p8 = pnand %p5664_p6, %p5658_p3 }
 0x71b   : > { %5668 = shalt.err (!%p5665_p8)
}
 0x71c   : > { %5000 = dma.vmem_to_hbm [thread:$0]  (%p5017_p7), %s4367_s11, 16, %s6894_s25, [#allocation11]  }
 0x71d   : > { %s5811_s0 = smov [#allocation5]   ;;  %s5812_s1 = smov [#allocation9]  }
 0x71e   : > { %s4333_s29 = sshll.u32 %s5811_s0, 4  ;;  %s4355_s2 = sshll.u32 %s5812_s1, 4  ;;  %s4334_s29 = int_to_ptr.vmem [resolvable:$true] %s4333_s29  ;;  %s4356_s2 = int_to_ptr.vmem [resolvable:$true] %s4355_s2 }
 0x71f   : > { %s5679_s3 = scalar_lea.vmem %s4334_s29, 16  ;;  %s5685_s7 = scalar_lea.vmem %s4334_s29, 32 }
 0x720   : > { %p5680_p9 = scmp.ne.s32.totalorder %s4334_s29, %s5679_s3  ;;  %p5686_p12 = scmp.lt.s32.totalorder %s4334_s29, %s4334_s29 }
 0x721   : > { %p5687_p13 = scmp.lt.s32.totalorder %s5685_s7, %s5679_s3 }
 0x722   : > { %p5681_p10 = pnand %p5680_p9, %p5017_p7 }
 0x723   : > { %p5688_p0 = por %p5687_p13, %p5686_p12 }
 0x724   : > { %p5682_p11 = pneg %p5681_p10 }
 0x726   : > { %p5689_p1 = pnand %p5688_p0, %p5682_p11 }
 0x728   : > { %5692 = shalt.err (!%p5689_p1)
}
 0x729   : > { %4994 = dma.vmem_to_hbm [thread:$0]  (%p5017_p7), %s4334_s29, 16, %s6891_s22, [#allocation6]  }
 0x72a   : > { %s5703_s4 = scalar_lea.vmem %s4356_s2, 16  ;;  %s5709_s8 = scalar_lea.vmem %s4356_s2, 32 }
 0x72b   : > { %p5704_p2 = scmp.ne.s32.totalorder %s4356_s2, %s5703_s4  ;;  %p5710_p5 = scmp.lt.s32.totalorder %s4356_s2, %s4356_s2 }
 0x72c   : > { %p5711_p6 = scmp.lt.s32.totalorder %s5709_s8, %s5703_s4 }
 0x72d   : > { %p5705_p3 = pnand %p5704_p2, %p5017_p7 }
 0x72e   : > { %p5712_p8 = por %p5711_p6, %p5710_p5 }
 0x72f   : > { %p5706_p4 = pneg %p5705_p3 }
 0x731   : > { %p5713_p9 = pnand %p5712_p8, %p5706_p4 }
 0x733   : > { %5716 = shalt.err (!%p5713_p9)
}
 0x734   : > { %4998 = dma.vmem_to_hbm [thread:$0]  (%p5017_p7), %s4356_s2, 16, %s6893_s24, [#allocation8]  }
 0x735   : > { %s5813_s0 = smov [#allocation12]   ;;  %s5814_s1 = smov [#allocation13]  }
 0x736   : > { %s4377_s29 = sshll.u32 %s5813_s0, 4  ;;  %s4388_s3 = sshll.u32 %s5814_s1, 4  ;;  %s4378_s29 = int_to_ptr.vmem [resolvable:$true] %s4377_s29  ;;  %s4389_s3 = int_to_ptr.vmem [resolvable:$true] %s4388_s3 }
 0x737   : > { %s5727_s7 = scalar_lea.vmem %s4378_s29, 16  ;;  %s5733_s10 = scalar_lea.vmem %s4378_s29, 32 }
 0x738   : > { %p5728_p10 = scmp.ne.s32.totalorder %s4378_s29, %s5727_s7  ;;  %p5734_p13 = scmp.lt.s32.totalorder %s4378_s29, %s4378_s29 }
 0x739   : > { %p5735_p0 = scmp.lt.s32.totalorder %s5733_s10, %s5727_s7 }
 0x73a   : > { %p5729_p11 = pnand %p5728_p10, %p5017_p7 }
 0x73b   : > { %p5736_p1 = por %p5735_p0, %p5734_p13 }
 0x73c   : > { %p5730_p12 = pneg %p5729_p11 }
 0x73e   : > { %p5737_p2 = pnand %p5736_p1, %p5730_p12 }
 0x740   : > { %5740 = shalt.err (!%p5737_p2)
}
 0x741   : > { %5002 = dma.vmem_to_hbm [thread:$0]  (%p5017_p7), %s4378_s29, 16, %s6895_s26, [#allocation11]  }
 0x742   : > { %s5751_s4 = scalar_lea.vmem %s4389_s3, 16  ;;  %s5757_s8 = scalar_lea.vmem %s4389_s3, 32 }
 0x743   : > { %p5752_p3 = scmp.ne.s32.totalorder %s4389_s3, %s5751_s4  ;;  %p5758_p6 = scmp.lt.s32.totalorder %s4389_s3, %s4389_s3 }
 0x744   : > { %p5759_p8 = scmp.lt.s32.totalorder %s5757_s8, %s5751_s4 }
 0x745   : > { %p5753_p4 = pnand %p5752_p3, %p5017_p7 }
 0x746   : > { %p5760_p9 = por %p5759_p8, %p5758_p6 }
 0x747   : > { %p5754_p5 = pneg %p5753_p4 }
 0x749   : > { %p5761_p10 = pnand %p5760_p9, %p5754_p5 }
 0x74b   : > { %5764 = shalt.err (!%p5761_p10)
}
 0x74c   : > { %5004 = dma.vmem_to_hbm [thread:$0]  (%p5017_p7), %s4389_s3, 16, %s6896_s27, [#allocation14]  }
 0x74d   : > { %5780 = dma.done.wait (%p5017_p7), [#allocation6], 16  }
 0x74e   : > { %5782 = vsyncadd (%p5017_p7), [#allocation6], 4294967280 }
 0x74f   : > { %5784 = dma.done.wait (%p5017_p7), [#allocation8], 32  }
 0x750   : > { %5786 = vsyncadd (%p5017_p7), [#allocation8], 4294967264 }
 0x751   : > { %5788 = dma.done.wait (%p5017_p7), [#allocation11], 32  }
 0x752   : > { %5790 = vsyncadd (%p5017_p7), [#allocation11], 4294967264 }
 0x753   : > { %5792 = dma.done.wait (%p5017_p7), [#allocation14], 16  }
 0x754   : > { %5794 = vsyncadd (%p5017_p7), [#allocation14], 4294967280 }
 0x755 PF: > { %s46_s5 = sadd.s32 1, %s5797_s5  }
 0x756   : > { %p43_p11 = scmp.ge.s32.totalorder %s46_s5, 6  }
 0x758   :  { %45 = sbr.rel (!%p43_p11) target bundleno = 25 (0x19), region = 186 }
 0x75d   :  { %4421 = vsyncpa [#allocation6], 1 }
 0x75e   :  { %4423 = vsyncpa [#allocation6 + $0x1], 1 }
 0x75f   :  { %4424 = vsyncpa [#allocation8], 1 }
 0x760   :  { %4425 = vsyncpa [#allocation11], 1 }
 0x761   :  { %4426 = vsyncpa [#allocation14], 1 }

</bundles_post_ra>
